<compile_context>
chip_gen: v6e
topology: v6e:2x2x1
jax: 0.10.0
libtpu: 0.0.40
codegen_flags: <defaults>
</compile_context>

<pallas_src>
import functools

import jax
import jax.numpy as jnp
from jax.experimental import pallas as pl
from jax.experimental.pallas import tpu as pltpu

EPS = 1e-5
HIDDEN = 512
LANE = 128


def _round_up(x, m):
    return (x + m - 1) // m * m


# ----------------------------------------------------------------------------
# Whole-batch moment accumulation (numerically robust chunk merging)
# ----------------------------------------------------------------------------
def _merge_moments(vals, i, tb, n_valid, mean_ref, m2_ref, *, masked):
    """Chan/Welford merge of one (tb, F) f32 tile into running (mean, M2)."""
    if masked:
        row = i * tb + jax.lax.broadcasted_iota(jnp.int32, (vals.shape[0], 1), 0)
        valid = row < n_valid
        n_b = jnp.minimum(n_valid - i * tb, tb).astype(jnp.float32)
        t_sum = jnp.sum(jnp.where(valid, vals, 0.0), axis=0, keepdims=True)
        t_mean = t_sum / n_b
        d = jnp.where(valid, vals - t_mean, 0.0)
    else:
        n_b = jnp.float32(tb)
        t_mean = jnp.sum(vals, axis=0, keepdims=True) * (1.0 / tb)
        d = vals - t_mean
    t_m2 = jnp.sum(d * d, axis=0, keepdims=True)

    n_a = (i * tb).astype(jnp.float32)          # all earlier tiles are full
    n = n_a + n_b
    delta = t_mean - mean_ref[...]
    mean_ref[...] = mean_ref[...] + delta * (n_b / n)
    m2_ref[...] = m2_ref[...] + t_m2 + (delta * delta) * (n_a * n_b / n)


def _acc_chunk(vals, i, tb, n_valid, mean_ref, m2_ref, *, ragged):
    """Accumulate one tile; only the LAST tile is masked (if batch is ragged)."""
    if not ragged:
        _merge_moments(vals, i, tb, n_valid, mean_ref, m2_ref, masked=False)
        return
    last = pl.num_programs(1) - 1

    @pl.when(i < last)
    def _full():
        _merge_moments(vals, i, tb, n_valid, mean_ref, m2_ref, masked=False)

    @pl.when(i == last)
    def _ragged_tile():
        _merge_moments(vals, i, tb, n_valid, mean_ref, m2_ref, masked=True)


def _finalize_affine(mean_ref, m2_ref, gamma, beta, n_valid):
    """Turn running (mean, M2) into fused BN (scale, shift), stored in place."""
    var = jnp.maximum(m2_ref[...] * (1.0 / n_valid), 0.0)   # biased variance
    scale = gamma * jax.lax.rsqrt(var + EPS)
    shift = beta - mean_ref[...] * scale
    mean_ref[...] = scale
    m2_ref[...] = shift


# ----------------------------------------------------------------------------
# Fused kernel: grid = (phase, batch_tile)
# ----------------------------------------------------------------------------
def _fused_kernel(x_ref, g1_ref, be1_ref, w1_ref, b1_ref,
                  g2_ref, be2_ref, w2_ref, b2_ref,
                  o_ref,
                  m1_ref, v1_ref, m2_ref, v2_ref, *h_scr,
                  n_valid, tb, mm_dtype, keep_h, ragged):
    p = pl.program_id(0)          # 0: BN1 stats, 1: Linear1 + BN2 stats, 2: head
    i = pl.program_id(1)          # batch tile
    last = pl.num_programs(1) - 1

    # ------------- phase 0: whole-batch BN1 moments of x ---------------------
    @pl.when(p == 0)
    def _phase0():
        @pl.when(i == 0)
        def _():
            m1_ref[...] = jnp.zeros_like(m1_ref)
            v1_ref[...] = jnp.zeros_like(v1_ref)

        _acc_chunk(x_ref[...], i, tb, n_valid, m1_ref, v1_ref, ragged=ragged)

        @pl.when(i == last)
        def _():      # fold gamma / beta / rsqrt once -> (scale1, shift1)
            _finalize_affine(m1_ref, v1_ref, g1_ref[...], be1_ref[...], n_valid)

    # ----- phase 1: h = Linear1(ReLU(BN1(x))) ; whole-batch BN2 moments ------
    @pl.when(p == 1)
    def _phase1():
        @pl.when(i == 0)
        def _():
            m2_ref[...] = jnp.zeros_like(m2_ref)
            v2_ref[...] = jnp.zeros_like(v2_ref)

        a = jnp.maximum(x_ref[...] * m1_ref[...] + v1_ref[...], 0.0)   # f32 VPU
        h = jnp.dot(a.astype(mm_dtype), w1_ref[...],                   # MXU
                    preferred_element_type=jnp.float32) + b1_ref[...]
        if keep_h:        # keep intermediate resident in VMEM (no HBM traffic)
            h_scr[0][i] = h.astype(h_scr[0].dtype)

        _acc_chunk(h, i, tb, n_valid, m2_ref, v2_ref, ragged=ragged)

        @pl.when(i == last)
        def _():
            _finalize_affine(m2_ref, v2_ref, g2_ref[...], be2_ref[...], n_valid)

    # ------------- phase 2: out = Linear2(ReLU(BN2(h))) ----------------------
    @pl.when(p == 2)
    def _phase2():
        if keep_h:
            h = h_scr[0][i].astype(jnp.float32)
        else:             # very large batch: recompute h from x (cheap matmul)
            a1 = jnp.maximum(x_ref[...] * m1_ref[...] + v1_ref[...], 0.0)
            h = jnp.dot(a1.astype(mm_dtype), w1_ref[...],
                        preferred_element_type=jnp.float32) + b1_ref[...]
        a2 = jnp.maximum(h * m2_ref[...] + v2_ref[...], 0.0)
        o_ref[...] = jnp.dot(a2.astype(mm_dtype), w2_ref[...],
                             preferred_element_type=jnp.float32) + b2_ref[...]


# ----------------------------------------------------------------------------
# Wrapper
# ----------------------------------------------------------------------------
def conf_model_bc_forward(x, params, *, tile_b=1024, matmul_dtype=jnp.float32,
                          keep_h=None):
    """Forward pass of ConfModelBC (training-mode whole-batch BatchNorm).

    matmul_dtype: jnp.float32 (reference-exact) or jnp.bfloat16 (recommended
    production setting on v5e/v6e/v7x: full-rate MXU, half the weight bytes;
    all element-wise BN/ReLU math and stat accumulation stay f32).
    keep_h: force (True/False) the resident-h path; None = auto by VMEM budget.
    """
    B, F_in = x.shape
    H = params["w1"].shape[1]
    n_cls = params["w2"].shape[1]

    # Batch tiling on the sublane axis; pad only if B is not a tile multiple.
    tb = max(8, min(_round_up(tile_b, 8), _round_up(B, 8)))
    B_pad = _round_up(B, tb)
    n_t = B_pad // tb
    ragged = B_pad != B
    if ragged:
        x = jnp.pad(x, ((0, B_pad - B), (0, 0)))   # padded rows masked in stats

    # Pre-cast MXU operands once (halves weight DMA + removes per-tile casts).
    w1 = params["w1"].astype(matmul_dtype)
    b1 = params["b1"]
    w2p = jnp.pad(params["w2"], ((0, 0), (0, LANE - n_cls))).astype(matmul_dtype)
    b2p = jnp.pad(params["b2"], ((0, 0), (0, LANE - n_cls)))

    # Generation-aware VMEM budgeting (v7x: 64 MiB/TC, v5e/v6e: 128 MiB).
    try:
        vmem_cap = int(pltpu.get_tpu_info().vmem_capacity_bytes)
    except Exception:
        vmem_cap = 64 * 1024 * 1024                # conservative fallback
    itemsize = jnp.dtype(matmul_dtype).itemsize
    h_bytes = B_pad * H * itemsize
    blk_bytes = 2 * (tb * F_in * 4 + tb * LANE * 4)          # x + out, dbl-buf
    w_bytes = (F_in * H + H * LANE) * itemsize + (2 * F_in + 3 * H + LANE) * 4
    base_need = blk_bytes + w_bytes + (2 << 20)
    if keep_h is None:
        keep_h = (base_need + h_bytes) <= vmem_cap // 2
    need = base_need + (h_bytes if keep_h else 0)
    vmem_limit = int(min(max(32 * 1024 * 1024, need + (8 << 20)),
                         int(0.75 * vmem_cap)))

    const2 = lambda p, i: (0, 0)
    if keep_h:
        x_map = lambda p, i: (jnp.where(p == 2, 0, i), 0)    # x unused in phase 2
    else:
        x_map = lambda p, i: (i, 0)                          # phase 2 re-reads x
    # Output tile index only advances in phase 2 -> no garbage HBM write-back.
    out_map = lambda p, i: (jnp.where(p == 2, i, 0), 0)

    scratch = [pltpu.VMEM((1, F_in), jnp.float32),   # BN1 mean -> scale1
               pltpu.VMEM((1, F_in), jnp.float32),   # BN1 M2   -> shift1
               pltpu.VMEM((1, H), jnp.float32),      # BN2 mean -> scale2
               pltpu.VMEM((1, H), jnp.float32)]      # BN2 M2   -> shift2
    if keep_h:
        scratch.append(pltpu.VMEM((n_t, tb, H), matmul_dtype))  # resident h

    kernel = functools.partial(_fused_kernel, n_valid=B, tb=tb,
                               mm_dtype=matmul_dtype, keep_h=keep_h,
                               ragged=ragged)

    out = pl.pallas_call(
        kernel,
        out_shape=jax.ShapeDtypeStruct((B_pad, LANE), jnp.float32),
        grid=(3, n_t),                     # (phase, batch tile), both sequential
        in_specs=[
            pl.BlockSpec((tb, F_in), x_map),        # x tile
            pl.BlockSpec((1, F_in), const2),        # bn1 gamma
            pl.BlockSpec((1, F_in), const2),        # bn1 beta
            pl.BlockSpec((F_in, H), const2),        # w1 (mm dtype)
            pl.BlockSpec((1, H), const2),           # b1
            pl.BlockSpec((1, H), const2),           # bn2 gamma
            pl.BlockSpec((1, H), const2),           # bn2 beta
            pl.BlockSpec((H, LANE), const2),        # w2 (lane-padded, mm dtype)
            pl.BlockSpec((1, LANE), const2),        # b2 (lane-padded)
        ],
        out_specs=pl.BlockSpec((tb, LANE), out_map),
        scratch_shapes=scratch,
        compiler_params=pltpu.CompilerParams(
            dimension_semantics=("arbitrary", "arbitrary"),
            vmem_limit_bytes=vmem_limit),
    )(x, params["bn1_gamma"], params["bn1_beta"], w1, b1,
      params["bn2_gamma"], params["bn2_beta"], w2p, b2p)

    # Drop padded rows / padded lanes (cheap XLA slice outside the kernel).
    return out[:B, :n_cls]


# ----------------------------------------------------------------------------
# Parameters / reference
# ----------------------------------------------------------------------------
def init_params(key, n_out):
    """Deterministic synthetic parameters matching ConfModelBC shapes."""
    in_features = n_out * 2
    hidden = HIDDEN
    k1, k2, k3, k4 = jax.random.split(key, 4)

    bn1_gamma = jnp.ones((1, in_features), jnp.float32) + 0.01 * jnp.arange(
        in_features, dtype=jnp.float32).reshape(1, -1)
    bn1_beta = 0.01 * jnp.arange(in_features, dtype=jnp.float32).reshape(1, -1)
    bn2_gamma = jnp.ones((1, hidden), jnp.float32)
    bn2_beta = jnp.zeros((1, hidden), jnp.float32)

    # Linear weights stored pre-transposed as (in, out).
    w1 = (jax.random.normal(k1, (in_features, hidden), jnp.float32)
          * (1.0 / jnp.sqrt(in_features)))
    b1 = (jax.random.normal(k2, (1, hidden), jnp.float32)
          * (1.0 / jnp.sqrt(in_features)))
    w2 = (jax.random.normal(k3, (hidden, 2), jnp.float32)
          * (1.0 / jnp.sqrt(hidden)))
    b2 = (jax.random.normal(k4, (1, 2), jnp.float32)
          * (1.0 / jnp.sqrt(hidden)))

    return {
        "bn1_gamma": bn1_gamma, "bn1_beta": bn1_beta,
        "w1": w1, "b1": b1,
        "bn2_gamma": bn2_gamma, "bn2_beta": bn2_beta,
        "w2": w2, "b2": b2,
    }


def reference_forward(x, p):
    """Pure-JAX reference matching PyTorch training-mode BN semantics."""
    mean1 = jnp.mean(x, axis=0, keepdims=True)
    var1 = jnp.mean((x - mean1) ** 2, axis=0, keepdims=True)
    h = (x - mean1) / jnp.sqrt(var1 + EPS) * p["bn1_gamma"] + p["bn1_beta"]
    h = jnp.maximum(h, 0.0)
    h = h @ p["w1"] + p["b1"]
    mean2 = jnp.mean(h, axis=0, keepdims=True)
    var2 = jnp.mean((h - mean2) ** 2, axis=0, keepdims=True)
    h2 = (h - mean2) / jnp.sqrt(var2 + EPS) * p["bn2_gamma"] + p["bn2_beta"]
    h2 = jnp.maximum(h2, 0.0)
    return h2 @ p["w2"] + p["b2"]


if __name__ == "__main__":
    n_out = 16           # ConfModelBC(nOut=16) -> in_features = 32
    batch = 200          # NOT a tile multiple at tile_b=128 -> exercises masking

    key = jax.random.PRNGKey(0)
    k_x, k_p = jax.random.split(key)
    x = jax.random.normal(k_x, (batch, n_out * 2), jnp.float32)
    params = init_params(k_p, n_out)
    ref = reference_forward(x, params)

    # 1) f32 MXU path: multi-tile + ragged last tile + resident-h (auto).
    out = conf_model_bc_forward(x, params, tile_b=128, matmul_dtype=jnp.float32)
    out = jax.block_until_ready(out)
    assert out.shape == (batch, 2), out.shape
    err = float(jnp.max(jnp.abs(out - ref)))
    assert jnp.allclose(out, ref, atol=1e-3, rtol=1e-3), f"f32 max abs err {err}"

    # 2) bf16 MXU path (production setting on v5e/v6e/v7x) with accuracy check.
    out_bf = conf_model_bc_forward(x, params, tile_b=128,
                                   matmul_dtype=jnp.bfloat16)
    out_bf = jax.block_until_ready(out_bf)
    err_bf = float(jnp.max(jnp.abs(out_bf - ref)))
    assert jnp.allclose(out_bf, ref, atol=3e-2, rtol=3e-2), \
        f"bf16 max abs err {err_bf}"

    # 3) Recompute-h path (what very large batches fall back to), forced here
    #    for coverage at small shapes.
    out_rc = conf_model_bc_forward(x, params, tile_b=64,
                                   matmul_dtype=jnp.float32, keep_h=False)
    out_rc = jax.block_until_ready(out_rc)
    err_rc = float(jnp.max(jnp.abs(out_rc - ref)))
    assert jnp.allclose(out_rc, ref, atol=1e-3, rtol=1e-3), \
        f"recompute-h max abs err {err_rc}"

    print("KERNEL_OK")
</pallas_src>

<mosaic_0001>
module attributes {stable_mosaic.version = 11 : i64} {
  func.func @_fused_kernel(%arg0: i32, %arg1: i32, %arg2: memref<128x32xf32, #tpu.memory_space<vmem>>, %arg3: memref<1x32xf32, #tpu.memory_space<vmem>>, %arg4: memref<1x32xf32, #tpu.memory_space<vmem>>, %arg5: memref<32x512xf32, #tpu.memory_space<vmem>>, %arg6: memref<1x512xf32, #tpu.memory_space<vmem>>, %arg7: memref<1x512xf32, #tpu.memory_space<vmem>>, %arg8: memref<1x512xf32, #tpu.memory_space<vmem>>, %arg9: memref<512x128xf32, #tpu.memory_space<vmem>>, %arg10: memref<1x128xf32, #tpu.memory_space<vmem>>, %arg11: memref<128x128xf32, #tpu.memory_space<vmem>>, %arg12: memref<1x32xf32, #tpu.memory_space<vmem>>, %arg13: memref<1x32xf32, #tpu.memory_space<vmem>>, %arg14: memref<1x512xf32, #tpu.memory_space<vmem>>, %arg15: memref<1x512xf32, #tpu.memory_space<vmem>>, %arg16: memref<2x128x512xf32, #tpu.memory_space<vmem>>) attributes {dimension_semantics = [#tpu.dimension_semantics<arbitrary>, #tpu.dimension_semantics<arbitrary>], iteration_bounds = array<i64: 3, 2>, scalar_prefetch = 0 : i64, scratch_operands = 5 : i64, tpu.core_type = #tpu.core_type<tc>, window_params = [{transform_indices = @transform_0, window_bounds = array<i64: 128, 32>}, {pipeline_mode = #tpu.pipeline_mode<synchronous>, transform_indices = @transform_1, window_bounds = array<i64: 1, 32>}, {pipeline_mode = #tpu.pipeline_mode<synchronous>, transform_indices = @transform_2, window_bounds = array<i64: 1, 32>}, {pipeline_mode = #tpu.pipeline_mode<synchronous>, transform_indices = @transform_3, window_bounds = array<i64: 32, 512>}, {pipeline_mode = #tpu.pipeline_mode<synchronous>, transform_indices = @transform_4, window_bounds = array<i64: 1, 512>}, {pipeline_mode = #tpu.pipeline_mode<synchronous>, transform_indices = @transform_5, window_bounds = array<i64: 1, 512>}, {pipeline_mode = #tpu.pipeline_mode<synchronous>, transform_indices = @transform_6, window_bounds = array<i64: 1, 512>}, {pipeline_mode = #tpu.pipeline_mode<synchronous>, transform_indices = @transform_7, window_bounds = array<i64: 512, 128>}, {pipeline_mode = #tpu.pipeline_mode<synchronous>, transform_indices = @transform_8, window_bounds = array<i64: 1, 128>}, {transform_indices = @transform_9, window_bounds = array<i64: 128, 128>}]} {
    %c0_i32 = arith.constant 0 : i32
    %0 = arith.cmpi eq, %arg0, %c0_i32 : i32
    %1 = arith.extui %0 : i1 to i32
    %c0_i32_0 = arith.constant 0 : i32
    %2 = arith.cmpi ne, %1, %c0_i32_0 : i32
    scf.if %2 {
      %c0_i32_3 = arith.constant 0 : i32
      %9 = arith.cmpi eq, %arg1, %c0_i32_3 : i32
      %10 = arith.extui %9 : i1 to i32
      %c0_i32_4 = arith.constant 0 : i32
      %11 = arith.cmpi ne, %10, %c0_i32_4 : i32
      scf.if %11 {
        %cst = arith.constant 0.000000e+00 : f32
        %22 = vector.broadcast %cst : f32 to vector<1x32xf32>
        %c0_12 = arith.constant 0 : index
        %c0_13 = arith.constant 0 : index
        %23 = vector.load %arg12[%c0_12, %c0_13] : memref<1x32xf32, #tpu.memory_space<vmem>>, vector<1x32xf32>
        tpu.vector_store %arg12[%c0_12, %c0_13], %22 {strides = array<i32>} : memref<1x32xf32, #tpu.memory_space<vmem>>, vector<1x32xf32>,
        %cst_14 = arith.constant 0.000000e+00 : f32
        %24 = vector.broadcast %cst_14 : f32 to vector<1x32xf32>
        %c0_15 = arith.constant 0 : index
        %c0_16 = arith.constant 0 : index
        %25 = vector.load %arg13[%c0_15, %c0_16] : memref<1x32xf32, #tpu.memory_space<vmem>>, vector<1x32xf32>
        tpu.vector_store %arg13[%c0_15, %c0_16], %24 {strides = array<i32>} : memref<1x32xf32, #tpu.memory_space<vmem>>, vector<1x32xf32>,
      } else {
      }
      %c0 = arith.constant 0 : index
      %c0_5 = arith.constant 0 : index
      %12 = vector.load %arg2[%c0, %c0_5] : memref<128x32xf32, #tpu.memory_space<vmem>>, vector<128x32xf32>
      %c1_i32_6 = arith.constant 1 : i32
      %13 = arith.cmpi slt, %arg1, %c1_i32_6 : i32
      %14 = arith.extui %13 : i1 to i32
      %c0_i32_7 = arith.constant 0 : i32
      %15 = arith.cmpi ne, %14, %c0_i32_7 : i32
      scf.if %15 {
        %cst = arith.constant dense<0.000000e+00> : vector<32xf32>
        %22 = vector.multi_reduction <add>, %12, %cst [0] : vector<128x32xf32> to vector<32xf32>
        %23 = vector.shape_cast %22 : vector<32xf32> to vector<1x32xf32>
        %cst_12 = arith.constant 7.812500e-03 : f32
        %24 = vector.broadcast %cst_12 : f32 to vector<1x32xf32>
        %25 = arith.mulf %23, %24 : vector<1x32xf32>
        %26 = vector.broadcast %25 : vector<1x32xf32> to vector<128x32xf32>
        %27 = arith.subf %12, %26 : vector<128x32xf32>
        %28 = arith.mulf %27, %27 : vector<128x32xf32>
        %cst_13 = arith.constant dense<0.000000e+00> : vector<32xf32>
        %29 = vector.multi_reduction <add>, %28, %cst_13 [0] : vector<128x32xf32> to vector<32xf32>
        %30 = vector.shape_cast %29 : vector<32xf32> to vector<1x32xf32>
        %c128_i32 = arith.constant 128 : i32
        %31 = arith.muli %arg1, %c128_i32 : i32
        %32 = arith.sitofp %31 : i32 to f32
        %cst_14 = arith.constant 1.280000e+02 : f32
        %33 = arith.addf %32, %cst_14 : f32
        %c0_15 = arith.constant 0 : index
        %c0_16 = arith.constant 0 : index
        %34 = vector.load %arg12[%c0_15, %c0_16] : memref<1x32xf32, #tpu.memory_space<vmem>>, vector<1x32xf32>
        %35 = arith.subf %25, %34 : vector<1x32xf32>
        %c0_17 = arith.constant 0 : index
        %c0_18 = arith.constant 0 : index
        %36 = vector.load %arg12[%c0_17, %c0_18] : memref<1x32xf32, #tpu.memory_space<vmem>>, vector<1x32xf32>
        %cst_19 = arith.constant 1.280000e+02 : f32
        %37 = arith.divf %cst_19, %33 : f32
        %38 = vector.broadcast %37 : f32 to vector<1x32xf32>
        %39 = arith.mulf %35, %38 : vector<1x32xf32>
        %40 = arith.addf %36, %39 : vector<1x32xf32>
        %c0_20 = arith.constant 0 : index
        %c0_21 = arith.constant 0 : index
        %41 = vector.load %arg12[%c0_20, %c0_21] : memref<1x32xf32, #tpu.memory_space<vmem>>, vector<1x32xf32>
        tpu.vector_store %arg12[%c0_20, %c0_21], %40 {strides = array<i32>} : memref<1x32xf32, #tpu.memory_space<vmem>>, vector<1x32xf32>,
        %c0_22 = arith.constant 0 : index
        %c0_23 = arith.constant 0 : index
        %42 = vector.load %arg13[%c0_22, %c0_23] : memref<1x32xf32, #tpu.memory_space<vmem>>, vector<1x32xf32>
        %43 = arith.addf %42, %30 : vector<1x32xf32>
        %44 = arith.mulf %35, %35 : vector<1x32xf32>
        %cst_24 = arith.constant 1.280000e+02 : f32
        %45 = arith.mulf %32, %cst_24 : f32
        %46 = arith.divf %45, %33 : f32
        %47 = vector.broadcast %46 : f32 to vector<1x32xf32>
        %48 = arith.mulf %44, %47 : vector<1x32xf32>
        %49 = arith.addf %43, %48 : vector<1x32xf32>
        %c0_25 = arith.constant 0 : index
        %c0_26 = arith.constant 0 : index
        %50 = vector.load %arg13[%c0_25, %c0_26] : memref<1x32xf32, #tpu.memory_space<vmem>>, vector<1x32xf32>
        tpu.vector_store %arg13[%c0_25, %c0_26], %49 {strides = array<i32>} : memref<1x32xf32, #tpu.memory_space<vmem>>, vector<1x32xf32>,
      } else {
      }
      %c1_i32_8 = arith.constant 1 : i32
      %16 = arith.cmpi eq, %arg1, %c1_i32_8 : i32
      %17 = arith.extui %16 : i1 to i32
      %c0_i32_9 = arith.constant 0 : i32
      %18 = arith.cmpi ne, %17, %c0_i32_9 : i32
      scf.if %18 {
        %c128_i32 = arith.constant 128 : i32
        %22 = arith.muli %arg1, %c128_i32 : i32
        %23 = tpu.iota {dimensions = array<i32: 0>} : vector<128x1xi32>
        %24 = vector.broadcast %22 : i32 to vector<128x1xi32>
        %25 = arith.addi %24, %23 : vector<128x1xi32>
        %c200_i32 = arith.constant 200 : i32
        %26 = vector.broadcast %c200_i32 : i32 to vector<128x1xi32>
        %27 = arith.cmpi slt, %25, %26 : vector<128x1xi32>
        %c128_i32_12 = arith.constant 128 : i32
        %28 = arith.muli %arg1, %c128_i32_12 : i32
        %c200_i32_13 = arith.constant 200 : i32
        %29 = arith.subi %c200_i32_13, %28 : i32
        %c128_i32_14 = arith.constant 128 : i32
        %30 = arith.minsi %29, %c128_i32_14 : i32
        %31 = arith.sitofp %30 : i32 to f32
        %cst = arith.constant 0.000000e+00 : f32
        %32 = vector.shape_cast %27 : vector<128x1xi1> to vector<128x1xi1>
        %33 = vector.broadcast %32 : vector<128x1xi1> to vector<128x32xi1>
        %34 = vector.broadcast %cst : f32 to vector<128x32xf32>
        %35 = arith.select %33, %12, %34 : vector<128x32xi1>, vector<128x32xf32>
        %cst_15 = arith.constant dense<0.000000e+00> : vector<32xf32>
        %36 = vector.multi_reduction <add>, %35, %cst_15 [0] : vector<128x32xf32> to vector<32xf32>
        %37 = vector.shape_cast %36 : vector<32xf32> to vector<1x32xf32>
        %38 = vector.broadcast %31 : f32 to vector<1x32xf32>
        %39 = arith.divf %37, %38 : vector<1x32xf32>
        %40 = vector.broadcast %39 : vector<1x32xf32> to vector<128x32xf32>
        %41 = arith.subf %12, %40 : vector<128x32xf32>
        %cst_16 = arith.constant 0.000000e+00 : f32
        %42 = vector.shape_cast %27 : vector<128x1xi1> to vector<128x1xi1>
        %43 = vector.broadcast %42 : vector<128x1xi1> to vector<128x32xi1>
        %44 = vector.broadcast %cst_16 : f32 to vector<128x32xf32>
        %45 = arith.select %43, %41, %44 : vector<128x32xi1>, vector<128x32xf32>
        %46 = arith.mulf %45, %45 : vector<128x32xf32>
        %cst_17 = arith.constant dense<0.000000e+00> : vector<32xf32>
        %47 = vector.multi_reduction <add>, %46, %cst_17 [0] : vector<128x32xf32> to vector<32xf32>
        %48 = vector.shape_cast %47 : vector<32xf32> to vector<1x32xf32>
        %c128_i32_18 = arith.constant 128 : i32
        %49 = arith.muli %arg1, %c128_i32_18 : i32
        %50 = arith.sitofp %49 : i32 to f32
        %51 = arith.addf %50, %31 : f32
        %c0_19 = arith.constant 0 : index
        %c0_20 = arith.constant 0 : index
        %52 = vector.load %arg12[%c0_19, %c0_20] : memref<1x32xf32, #tpu.memory_space<vmem>>, vector<1x32xf32>
        %53 = arith.subf %39, %52 : vector<1x32xf32>
        %c0_21 = arith.constant 0 : index
        %c0_22 = arith.constant 0 : index
        %54 = vector.load %arg12[%c0_21, %c0_22] : memref<1x32xf32, #tpu.memory_space<vmem>>, vector<1x32xf32>
        %55 = arith.divf %31, %51 : f32
        %56 = vector.broadcast %55 : f32 to vector<1x32xf32>
        %57 = arith.mulf %53, %56 : vector<1x32xf32>
        %58 = arith.addf %54, %57 : vector<1x32xf32>
        %c0_23 = arith.constant 0 : index
        %c0_24 = arith.constant 0 : index
        %59 = vector.load %arg12[%c0_23, %c0_24] : memref<1x32xf32, #tpu.memory_space<vmem>>, vector<1x32xf32>
        tpu.vector_store %arg12[%c0_23, %c0_24], %58 {strides = array<i32>} : memref<1x32xf32, #tpu.memory_space<vmem>>, vector<1x32xf32>,
        %c0_25 = arith.constant 0 : index
        %c0_26 = arith.constant 0 : index
        %60 = vector.load %arg13[%c0_25, %c0_26] : memref<1x32xf32, #tpu.memory_space<vmem>>, vector<1x32xf32>
        %61 = arith.addf %60, %48 : vector<1x32xf32>
        %62 = arith.mulf %53, %53 : vector<1x32xf32>
        %63 = arith.mulf %50, %31 : f32
        %64 = arith.divf %63, %51 : f32
        %65 = vector.broadcast %64 : f32 to vector<1x32xf32>
        %66 = arith.mulf %62, %65 : vector<1x32xf32>
        %67 = arith.addf %61, %66 : vector<1x32xf32>
        %c0_27 = arith.constant 0 : index
        %c0_28 = arith.constant 0 : index
        %68 = vector.load %arg13[%c0_27, %c0_28] : memref<1x32xf32, #tpu.memory_space<vmem>>, vector<1x32xf32>
        tpu.vector_store %arg13[%c0_27, %c0_28], %67 {strides = array<i32>} : memref<1x32xf32, #tpu.memory_space<vmem>>, vector<1x32xf32>,
      } else {
      }
      %c1_i32_10 = arith.constant 1 : i32
      %19 = arith.cmpi eq, %arg1, %c1_i32_10 : i32
      %20 = arith.extui %19 : i1 to i32
      %c0_i32_11 = arith.constant 0 : i32
      %21 = arith.cmpi ne, %20, %c0_i32_11 : i32
      scf.if %21 {
        %c0_12 = arith.constant 0 : index
        %c0_13 = arith.constant 0 : index
        %22 = vector.load %arg3[%c0_12, %c0_13] : memref<1x32xf32, #tpu.memory_space<vmem>>, vector<1x32xf32>
        %c0_14 = arith.constant 0 : index
        %c0_15 = arith.constant 0 : index
        %23 = vector.load %arg4[%c0_14, %c0_15] : memref<1x32xf32, #tpu.memory_space<vmem>>, vector<1x32xf32>
        %c0_16 = arith.constant 0 : index
        %c0_17 = arith.constant 0 : index
        %24 = vector.load %arg13[%c0_16, %c0_17] : memref<1x32xf32, #tpu.memory_space<vmem>>, vector<1x32xf32>
        %cst = arith.constant 5.000000e-03 : f32
        %25 = vector.broadcast %cst : f32 to vector<1x32xf32>
        %26 = arith.mulf %24, %25 : vector<1x32xf32>
        %cst_18 = arith.constant 0.000000e+00 : f32
        %27 = vector.broadcast %cst_18 : f32 to vector<1x32xf32>
        %28 = arith.maximumf %26, %27 : vector<1x32xf32>
        %cst_19 = arith.constant 9.99999974E-6 : f32
        %29 = vector.broadcast %cst_19 : f32 to vector<1x32xf32>
        %30 = arith.addf %28, %29 : vector<1x32xf32>
        %31 = math.rsqrt %30 : vector<1x32xf32>
        %32 = arith.mulf %22, %31 : vector<1x32xf32>
        %c0_20 = arith.constant 0 : index
        %c0_21 = arith.constant 0 : index
        %33 = vector.load %arg12[%c0_20, %c0_21] : memref<1x32xf32, #tpu.memory_space<vmem>>, vector<1x32xf32>
        %34 = arith.mulf %33, %32 : vector<1x32xf32>
        %35 = arith.subf %23, %34 : vector<1x32xf32>
        %c0_22 = arith.constant 0 : index
        %c0_23 = arith.constant 0 : index
        %36 = vector.load %arg12[%c0_22, %c0_23] : memref<1x32xf32, #tpu.memory_space<vmem>>, vector<1x32xf32>
        tpu.vector_store %arg12[%c0_22, %c0_23], %32 {strides = array<i32>} : memref<1x32xf32, #tpu.memory_space<vmem>>, vector<1x32xf32>,
        %c0_24 = arith.constant 0 : index
        %c0_25 = arith.constant 0 : index
        %37 = vector.load %arg13[%c0_24, %c0_25] : memref<1x32xf32, #tpu.memory_space<vmem>>, vector<1x32xf32>
        tpu.vector_store %arg13[%c0_24, %c0_25], %35 {strides = array<i32>} : memref<1x32xf32, #tpu.memory_space<vmem>>, vector<1x32xf32>,
      } else {
      }
    } else {
    }
    %c1_i32 = arith.constant 1 : i32
    %3 = arith.cmpi eq, %arg0, %c1_i32 : i32
    %4 = arith.extui %3 : i1 to i32
    %c0_i32_1 = arith.constant 0 : i32
    %5 = arith.cmpi ne, %4, %c0_i32_1 : i32
    scf.if %5 {
      %c0_i32_3 = arith.constant 0 : i32
      %9 = arith.cmpi eq, %arg1, %c0_i32_3 : i32
      %10 = arith.extui %9 : i1 to i32
      %c0_i32_4 = arith.constant 0 : i32
      %11 = arith.cmpi ne, %10, %c0_i32_4 : i32
      scf.if %11 {
        %cst_23 = arith.constant 0.000000e+00 : f32
        %39 = vector.broadcast %cst_23 : f32 to vector<1x512xf32>
        %c0_24 = arith.constant 0 : index
        %c0_25 = arith.constant 0 : index
        %40 = vector.load %arg14[%c0_24, %c0_25] : memref<1x512xf32, #tpu.memory_space<vmem>>, vector<1x512xf32>
        tpu.vector_store %arg14[%c0_24, %c0_25], %39 {strides = array<i32>} : memref<1x512xf32, #tpu.memory_space<vmem>>, vector<1x512xf32>,
        %cst_26 = arith.constant 0.000000e+00 : f32
        %41 = vector.broadcast %cst_26 : f32 to vector<1x512xf32>
        %c0_27 = arith.constant 0 : index
        %c0_28 = arith.constant 0 : index
        %42 = vector.load %arg15[%c0_27, %c0_28] : memref<1x512xf32, #tpu.memory_space<vmem>>, vector<1x512xf32>
        tpu.vector_store %arg15[%c0_27, %c0_28], %41 {strides = array<i32>} : memref<1x512xf32, #tpu.memory_space<vmem>>, vector<1x512xf32>,
      } else {
      }
      %c0 = arith.constant 0 : index
      %c0_5 = arith.constant 0 : index
      %12 = vector.load %arg2[%c0, %c0_5] : memref<128x32xf32, #tpu.memory_space<vmem>>, vector<128x32xf32>
      %c0_6 = arith.constant 0 : index
      %c0_7 = arith.constant 0 : index
      %13 = vector.load %arg12[%c0_6, %c0_7] : memref<1x32xf32, #tpu.memory_space<vmem>>, vector<1x32xf32>
      %14 = vector.broadcast %13 : vector<1x32xf32> to vector<128x32xf32>
      %15 = arith.mulf %12, %14 : vector<128x32xf32>
      %c0_8 = arith.constant 0 : index
      %c0_9 = arith.constant 0 : index
      %16 = vector.load %arg13[%c0_8, %c0_9] : memref<1x32xf32, #tpu.memory_space<vmem>>, vector<1x32xf32>
      %17 = vector.broadcast %16 : vector<1x32xf32> to vector<128x32xf32>
      %18 = arith.addf %15, %17 : vector<128x32xf32>
      %cst = arith.constant 0.000000e+00 : f32
      %19 = vector.broadcast %cst : f32 to vector<128x32xf32>
      %20 = arith.maximumf %18, %19 : vector<128x32xf32>
      %c0_10 = arith.constant 0 : index
      %c0_11 = arith.constant 0 : index
      %21 = vector.load %arg5[%c0_10, %c0_11] : memref<32x512xf32, #tpu.memory_space<vmem>>, vector<32x512xf32>
      %cst_12 = arith.constant dense<0.000000e+00> : vector<128x512xf32>
      %22 = tpu.matmul %20, %21, %cst_12 {dimension_numbers = #tpu.dot_dimension_numbers<[1], [0], [0], [1], [0, 0, 1, 1], [], []>} : vector<128x32xf32>, vector<32x512xf32>, vector<128x512xf32> -> vector<128x512xf32>
      %c0_13 = arith.constant 0 : index
      %c0_14 = arith.constant 0 : index
      %23 = vector.load %arg6[%c0_13, %c0_14] : memref<1x512xf32, #tpu.memory_space<vmem>>, vector<1x512xf32>
      %24 = vector.broadcast %23 : vector<1x512xf32> to vector<128x512xf32>
      %25 = arith.addf %22, %24 : vector<128x512xf32>
      %26 = arith.index_cast %arg1 : i32 to index
      %c0_15 = arith.constant 0 : index
      %c0_16 = arith.constant 0 : index
      %27 = vector.load %arg16[%26, %c0_15, %c0_16] : memref<2x128x512xf32, #tpu.memory_space<vmem>>, vector<1x128x512xf32>
      %28 = vector.shape_cast %27 : vector<1x128x512xf32> to vector<128x512xf32>
      %29 = vector.shape_cast %25 : vector<128x512xf32> to vector<1x128x512xf32>
      tpu.vector_store %arg16[%26, %c0_15, %c0_16], %29 {strides = array<i32>} : memref<2x128x512xf32, #tpu.memory_space<vmem>>, vector<1x128x512xf32>,
      %c1_i32_17 = arith.constant 1 : i32
      %30 = arith.cmpi slt, %arg1, %c1_i32_17 : i32
      %31 = arith.extui %30 : i1 to i32
      %c0_i32_18 = arith.constant 0 : i32
      %32 = arith.cmpi ne, %31, %c0_i32_18 : i32
      scf.if %32 {
        %cst_23 = arith.constant dense<0.000000e+00> : vector<512xf32>
        %39 = vector.multi_reduction <add>, %25, %cst_23 [0] : vector<128x512xf32> to vector<512xf32>
        %40 = vector.shape_cast %39 : vector<512xf32> to vector<1x512xf32>
        %cst_24 = arith.constant 7.812500e-03 : f32
        %41 = vector.broadcast %cst_24 : f32 to vector<1x512xf32>
        %42 = arith.mulf %40, %41 : vector<1x512xf32>
        %43 = vector.broadcast %42 : vector<1x512xf32> to vector<128x512xf32>
        %44 = arith.subf %25, %43 : vector<128x512xf32>
        %45 = arith.mulf %44, %44 : vector<128x512xf32>
        %cst_25 = arith.constant dense<0.000000e+00> : vector<512xf32>
        %46 = vector.multi_reduction <add>, %45, %cst_25 [0] : vector<128x512xf32> to vector<512xf32>
        %47 = vector.shape_cast %46 : vector<512xf32> to vector<1x512xf32>
        %c128_i32 = arith.constant 128 : i32
        %48 = arith.muli %arg1, %c128_i32 : i32
        %49 = arith.sitofp %48 : i32 to f32
        %cst_26 = arith.constant 1.280000e+02 : f32
        %50 = arith.addf %49, %cst_26 : f32
        %c0_27 = arith.constant 0 : index
        %c0_28 = arith.constant 0 : index
        %51 = vector.load %arg14[%c0_27, %c0_28] : memref<1x512xf32, #tpu.memory_space<vmem>>, vector<1x512xf32>
        %52 = arith.subf %42, %51 : vector<1x512xf32>
        %c0_29 = arith.constant 0 : index
        %c0_30 = arith.constant 0 : index
        %53 = vector.load %arg14[%c0_29, %c0_30] : memref<1x512xf32, #tpu.memory_space<vmem>>, vector<1x512xf32>
        %cst_31 = arith.constant 1.280000e+02 : f32
        %54 = arith.divf %cst_31, %50 : f32
        %55 = vector.broadcast %54 : f32 to vector<1x512xf32>
        %56 = arith.mulf %52, %55 : vector<1x512xf32>
        %57 = arith.addf %53, %56 : vector<1x512xf32>
        %c0_32 = arith.constant 0 : index
        %c0_33 = arith.constant 0 : index
        %58 = vector.load %arg14[%c0_32, %c0_33] : memref<1x512xf32, #tpu.memory_space<vmem>>, vector<1x512xf32>
        tpu.vector_store %arg14[%c0_32, %c0_33], %57 {strides = array<i32>} : memref<1x512xf32, #tpu.memory_space<vmem>>, vector<1x512xf32>,
        %c0_34 = arith.constant 0 : index
        %c0_35 = arith.constant 0 : index
        %59 = vector.load %arg15[%c0_34, %c0_35] : memref<1x512xf32, #tpu.memory_space<vmem>>, vector<1x512xf32>
        %60 = arith.addf %59, %47 : vector<1x512xf32>
        %61 = arith.mulf %52, %52 : vector<1x512xf32>
        %cst_36 = arith.constant 1.280000e+02 : f32
        %62 = arith.mulf %49, %cst_36 : f32
        %63 = arith.divf %62, %50 : f32
        %64 = vector.broadcast %63 : f32 to vector<1x512xf32>
        %65 = arith.mulf %61, %64 : vector<1x512xf32>
        %66 = arith.addf %60, %65 : vector<1x512xf32>
        %c0_37 = arith.constant 0 : index
        %c0_38 = arith.constant 0 : index
        %67 = vector.load %arg15[%c0_37, %c0_38] : memref<1x512xf32, #tpu.memory_space<vmem>>, vector<1x512xf32>
        tpu.vector_store %arg15[%c0_37, %c0_38], %66 {strides = array<i32>} : memref<1x512xf32, #tpu.memory_space<vmem>>, vector<1x512xf32>,
      } else {
      }
      %c1_i32_19 = arith.constant 1 : i32
      %33 = arith.cmpi eq, %arg1, %c1_i32_19 : i32
      %34 = arith.extui %33 : i1 to i32
      %c0_i32_20 = arith.constant 0 : i32
      %35 = arith.cmpi ne, %34, %c0_i32_20 : i32
      scf.if %35 {
        %c128_i32 = arith.constant 128 : i32
        %39 = arith.muli %arg1, %c128_i32 : i32
        %40 = tpu.iota {dimensions = array<i32: 0>} : vector<128x1xi32>
        %41 = vector.broadcast %39 : i32 to vector<128x1xi32>
        %42 = arith.addi %41, %40 : vector<128x1xi32>
        %c200_i32 = arith.constant 200 : i32
        %43 = vector.broadcast %c200_i32 : i32 to vector<128x1xi32>
        %44 = arith.cmpi slt, %42, %43 : vector<128x1xi32>
        %c128_i32_23 = arith.constant 128 : i32
        %45 = arith.muli %arg1, %c128_i32_23 : i32
        %c200_i32_24 = arith.constant 200 : i32
        %46 = arith.subi %c200_i32_24, %45 : i32
        %c128_i32_25 = arith.constant 128 : i32
        %47 = arith.minsi %46, %c128_i32_25 : i32
        %48 = arith.sitofp %47 : i32 to f32
        %cst_26 = arith.constant 0.000000e+00 : f32
        %49 = vector.shape_cast %44 : vector<128x1xi1> to vector<128x1xi1>
        %50 = vector.broadcast %49 : vector<128x1xi1> to vector<128x512xi1>
        %51 = vector.broadcast %cst_26 : f32 to vector<128x512xf32>
        %52 = arith.select %50, %25, %51 : vector<128x512xi1>, vector<128x512xf32>
        %cst_27 = arith.constant dense<0.000000e+00> : vector<512xf32>
        %53 = vector.multi_reduction <add>, %52, %cst_27 [0] : vector<128x512xf32> to vector<512xf32>
        %54 = vector.shape_cast %53 : vector<512xf32> to vector<1x512xf32>
        %55 = vector.broadcast %48 : f32 to vector<1x512xf32>
        %56 = arith.divf %54, %55 : vector<1x512xf32>
        %57 = vector.broadcast %56 : vector<1x512xf32> to vector<128x512xf32>
        %58 = arith.subf %25, %57 : vector<128x512xf32>
        %cst_28 = arith.constant 0.000000e+00 : f32
        %59 = vector.shape_cast %44 : vector<128x1xi1> to vector<128x1xi1>
        %60 = vector.broadcast %59 : vector<128x1xi1> to vector<128x512xi1>
        %61 = vector.broadcast %cst_28 : f32 to vector<128x512xf32>
        %62 = arith.select %60, %58, %61 : vector<128x512xi1>, vector<128x512xf32>
        %63 = arith.mulf %62, %62 : vector<128x512xf32>
        %cst_29 = arith.constant dense<0.000000e+00> : vector<512xf32>
        %64 = vector.multi_reduction <add>, %63, %cst_29 [0] : vector<128x512xf32> to vector<512xf32>
        %65 = vector.shape_cast %64 : vector<512xf32> to vector<1x512xf32>
        %c128_i32_30 = arith.constant 128 : i32
        %66 = arith.muli %arg1, %c128_i32_30 : i32
        %67 = arith.sitofp %66 : i32 to f32
        %68 = arith.addf %67, %48 : f32
        %c0_31 = arith.constant 0 : index
        %c0_32 = arith.constant 0 : index
        %69 = vector.load %arg14[%c0_31, %c0_32] : memref<1x512xf32, #tpu.memory_space<vmem>>, vector<1x512xf32>
        %70 = arith.subf %56, %69 : vector<1x512xf32>
        %c0_33 = arith.constant 0 : index
        %c0_34 = arith.constant 0 : index
        %71 = vector.load %arg14[%c0_33, %c0_34] : memref<1x512xf32, #tpu.memory_space<vmem>>, vector<1x512xf32>
        %72 = arith.divf %48, %68 : f32
        %73 = vector.broadcast %72 : f32 to vector<1x512xf32>
        %74 = arith.mulf %70, %73 : vector<1x512xf32>
        %75 = arith.addf %71, %74 : vector<1x512xf32>
        %c0_35 = arith.constant 0 : index
        %c0_36 = arith.constant 0 : index
        %76 = vector.load %arg14[%c0_35, %c0_36] : memref<1x512xf32, #tpu.memory_space<vmem>>, vector<1x512xf32>
        tpu.vector_store %arg14[%c0_35, %c0_36], %75 {strides = array<i32>} : memref<1x512xf32, #tpu.memory_space<vmem>>, vector<1x512xf32>,
        %c0_37 = arith.constant 0 : index
        %c0_38 = arith.constant 0 : index
        %77 = vector.load %arg15[%c0_37, %c0_38] : memref<1x512xf32, #tpu.memory_space<vmem>>, vector<1x512xf32>
        %78 = arith.addf %77, %65 : vector<1x512xf32>
        %79 = arith.mulf %70, %70 : vector<1x512xf32>
        %80 = arith.mulf %67, %48 : f32
        %81 = arith.divf %80, %68 : f32
        %82 = vector.broadcast %81 : f32 to vector<1x512xf32>
        %83 = arith.mulf %79, %82 : vector<1x512xf32>
        %84 = arith.addf %78, %83 : vector<1x512xf32>
        %c0_39 = arith.constant 0 : index
        %c0_40 = arith.constant 0 : index
        %85 = vector.load %arg15[%c0_39, %c0_40] : memref<1x512xf32, #tpu.memory_space<vmem>>, vector<1x512xf32>
        tpu.vector_store %arg15[%c0_39, %c0_40], %84 {strides = array<i32>} : memref<1x512xf32, #tpu.memory_space<vmem>>, vector<1x512xf32>,
      } else {
      }
      %c1_i32_21 = arith.constant 1 : i32
      %36 = arith.cmpi eq, %arg1, %c1_i32_21 : i32
      %37 = arith.extui %36 : i1 to i32
      %c0_i32_22 = arith.constant 0 : i32
      %38 = arith.cmpi ne, %37, %c0_i32_22 : i32
      scf.if %38 {
        %c0_23 = arith.constant 0 : index
        %c0_24 = arith.constant 0 : index
        %39 = vector.load %arg7[%c0_23, %c0_24] : memref<1x512xf32, #tpu.memory_space<vmem>>, vector<1x512xf32>
        %c0_25 = arith.constant 0 : index
        %c0_26 = arith.constant 0 : index
        %40 = vector.load %arg8[%c0_25, %c0_26] : memref<1x512xf32, #tpu.memory_space<vmem>>, vector<1x512xf32>
        %c0_27 = arith.constant 0 : index
        %c0_28 = arith.constant 0 : index
        %41 = vector.load %arg15[%c0_27, %c0_28] : memref<1x512xf32, #tpu.memory_space<vmem>>, vector<1x512xf32>
        %cst_29 = arith.constant 5.000000e-03 : f32
        %42 = vector.broadcast %cst_29 : f32 to vector<1x512xf32>
        %43 = arith.mulf %41, %42 : vector<1x512xf32>
        %cst_30 = arith.constant 0.000000e+00 : f32
        %44 = vector.broadcast %cst_30 : f32 to vector<1x512xf32>
        %45 = arith.maximumf %43, %44 : vector<1x512xf32>
        %cst_31 = arith.constant 9.99999974E-6 : f32
        %46 = vector.broadcast %cst_31 : f32 to vector<1x512xf32>
        %47 = arith.addf %45, %46 : vector<1x512xf32>
        %48 = math.rsqrt %47 : vector<1x512xf32>
        %49 = arith.mulf %39, %48 : vector<1x512xf32>
        %c0_32 = arith.constant 0 : index
        %c0_33 = arith.constant 0 : index
        %50 = vector.load %arg14[%c0_32, %c0_33] : memref<1x512xf32, #tpu.memory_space<vmem>>, vector<1x512xf32>
        %51 = arith.mulf %50, %49 : vector<1x512xf32>
        %52 = arith.subf %40, %51 : vector<1x512xf32>
        %c0_34 = arith.constant 0 : index
        %c0_35 = arith.constant 0 : index
        %53 = vector.load %arg14[%c0_34, %c0_35] : memref<1x512xf32, #tpu.memory_space<vmem>>, vector<1x512xf32>
        tpu.vector_store %arg14[%c0_34, %c0_35], %49 {strides = array<i32>} : memref<1x512xf32, #tpu.memory_space<vmem>>, vector<1x512xf32>,
        %c0_36 = arith.constant 0 : index
        %c0_37 = arith.constant 0 : index
        %54 = vector.load %arg15[%c0_36, %c0_37] : memref<1x512xf32, #tpu.memory_space<vmem>>, vector<1x512xf32>
        tpu.vector_store %arg15[%c0_36, %c0_37], %52 {strides = array<i32>} : memref<1x512xf32, #tpu.memory_space<vmem>>, vector<1x512xf32>,
      } else {
      }
    } else {
    }
    %c2_i32 = arith.constant 2 : i32
    %6 = arith.cmpi eq, %arg0, %c2_i32 : i32
    %7 = arith.extui %6 : i1 to i32
    %c0_i32_2 = arith.constant 0 : i32
    %8 = arith.cmpi ne, %7, %c0_i32_2 : i32
    scf.if %8 {
      %9 = arith.index_cast %arg1 : i32 to index
      %c0 = arith.constant 0 : index
      %c0_3 = arith.constant 0 : index
      %10 = vector.load %arg16[%9, %c0, %c0_3] : memref<2x128x512xf32, #tpu.memory_space<vmem>>, vector<1x128x512xf32>
      %11 = vector.shape_cast %10 : vector<1x128x512xf32> to vector<128x512xf32>
      %c0_4 = arith.constant 0 : index
      %c0_5 = arith.constant 0 : index
      %12 = vector.load %arg14[%c0_4, %c0_5] : memref<1x512xf32, #tpu.memory_space<vmem>>, vector<1x512xf32>
      %13 = vector.broadcast %12 : vector<1x512xf32> to vector<128x512xf32>
      %14 = arith.mulf %11, %13 : vector<128x512xf32>
      %c0_6 = arith.constant 0 : index
      %c0_7 = arith.constant 0 : index
      %15 = vector.load %arg15[%c0_6, %c0_7] : memref<1x512xf32, #tpu.memory_space<vmem>>, vector<1x512xf32>
      %16 = vector.broadcast %15 : vector<1x512xf32> to vector<128x512xf32>
      %17 = arith.addf %14, %16 : vector<128x512xf32>
      %cst = arith.constant 0.000000e+00 : f32
      %18 = vector.broadcast %cst : f32 to vector<128x512xf32>
      %19 = arith.maximumf %17, %18 : vector<128x512xf32>
      %c0_8 = arith.constant 0 : index
      %c0_9 = arith.constant 0 : index
      %20 = vector.load %arg9[%c0_8, %c0_9] : memref<512x128xf32, #tpu.memory_space<vmem>>, vector<512x128xf32>
      %cst_10 = arith.constant dense<0.000000e+00> : vector<128x128xf32>
      %21 = tpu.matmul %19, %20, %cst_10 {dimension_numbers = #tpu.dot_dimension_numbers<[1], [0], [0], [1], [0, 0, 1, 1], [], []>} : vector<128x512xf32>, vector<512x128xf32>, vector<128x128xf32> -> vector<128x128xf32>
      %c0_11 = arith.constant 0 : index
      %c0_12 = arith.constant 0 : index
      %22 = vector.load %arg10[%c0_11, %c0_12] : memref<1x128xf32, #tpu.memory_space<vmem>>, vector<1x128xf32>
      %23 = vector.broadcast %22 : vector<1x128xf32> to vector<128x128xf32>
      %24 = arith.addf %21, %23 : vector<128x128xf32>
      %c0_13 = arith.constant 0 : index
      %c0_14 = arith.constant 0 : index
      %25 = vector.load %arg11[%c0_13, %c0_14] : memref<128x128xf32, #tpu.memory_space<vmem>>, vector<128x128xf32>
      tpu.vector_store %arg11[%c0_13, %c0_14], %24 {strides = array<i32>} : memref<128x128xf32, #tpu.memory_space<vmem>>, vector<128x128xf32>,
    } else {
    }
    return
  }
  func.func @transform_0(%arg0: i32, %arg1: i32) -> (i32, i32) {
    %c2_i32 = arith.constant 2 : i32
    %0 = arith.cmpi eq, %arg0, %c2_i32 : i32
    %c0_i32 = arith.constant 0 : i32
    %1 = arith.select %0, %c0_i32, %arg1 : i32
    %c0_i32_0 = arith.constant 0 : i32
    %c0_i32_1 = arith.constant 0 : i32
    return %1, %c0_i32_0 : i32, i32
  }
  func.func @transform_1(%arg0: i32, %arg1: i32) -> (i32, i32) {
    %c0_i32 = arith.constant 0 : i32
    %c0_i32_0 = arith.constant 0 : i32
    %c0_i32_1 = arith.constant 0 : i32
    return %c0_i32, %c0_i32_0 : i32, i32
  }
  func.func @transform_2(%arg0: i32, %arg1: i32) -> (i32, i32) {
    %c0_i32 = arith.constant 0 : i32
    %c0_i32_0 = arith.constant 0 : i32
    %c0_i32_1 = arith.constant 0 : i32
    return %c0_i32, %c0_i32_0 : i32, i32
  }
  func.func @transform_3(%arg0: i32, %arg1: i32) -> (i32, i32) {
    %c0_i32 = arith.constant 0 : i32
    %c0_i32_0 = arith.constant 0 : i32
    %c0_i32_1 = arith.constant 0 : i32
    return %c0_i32, %c0_i32_0 : i32, i32
  }
  func.func @transform_4(%arg0: i32, %arg1: i32) -> (i32, i32) {
    %c0_i32 = arith.constant 0 : i32
    %c0_i32_0 = arith.constant 0 : i32
    %c0_i32_1 = arith.constant 0 : i32
    return %c0_i32, %c0_i32_0 : i32, i32
  }
  func.func @transform_5(%arg0: i32, %arg1: i32) -> (i32, i32) {
    %c0_i32 = arith.constant 0 : i32
    %c0_i32_0 = arith.constant 0 : i32
    %c0_i32_1 = arith.constant 0 : i32
    return %c0_i32, %c0_i32_0 : i32, i32
  }
  func.func @transform_6(%arg0: i32, %arg1: i32) -> (i32, i32) {
    %c0_i32 = arith.constant 0 : i32
    %c0_i32_0 = arith.constant 0 : i32
    %c0_i32_1 = arith.constant 0 : i32
    return %c0_i32, %c0_i32_0 : i32, i32
  }
  func.func @transform_7(%arg0: i32, %arg1: i32) -> (i32, i32) {
    %c0_i32 = arith.constant 0 : i32
    %c0_i32_0 = arith.constant 0 : i32
    %c0_i32_1 = arith.constant 0 : i32
    return %c0_i32, %c0_i32_0 : i32, i32
  }
  func.func @transform_8(%arg0: i32, %arg1: i32) -> (i32, i32) {
    %c0_i32 = arith.constant 0 : i32
    %c0_i32_0 = arith.constant 0 : i32
    %c0_i32_1 = arith.constant 0 : i32
    return %c0_i32, %c0_i32_0 : i32, i32
  }
  func.func @transform_9(%arg0: i32, %arg1: i32) -> (i32, i32) {
    %c2_i32 = arith.constant 2 : i32
    %0 = arith.cmpi eq, %arg0, %c2_i32 : i32
    %c0_i32 = arith.constant 0 : i32
    %1 = arith.select %0, %arg1, %c0_i32 : i32
    %c0_i32_0 = arith.constant 0 : i32
    %c0_i32_1 = arith.constant 0 : i32
    return %1, %c0_i32_0 : i32, i32
  }
}

</mosaic_0001>

<bundles_post_ra>
// kernel: tpu_custom_call.1
= control target key start
LH: loop header
LB: loop body
LE: loop exit
PB: predicated region body
PF: predicated region fallthrough
CT: control target
= control target key end

     0   :  { %s6783_s0 = inlined_call_operand.vmem [shape: f32[256,32], index: 0, kind: input, shape index: {}]   ;;  %s6784_s1 = inlined_call_operand.vmem [shape: f32[1,32], index: 1, kind: input, shape index: {}]   ;;  %s6785_s2 = inlined_call_operand.vmem [shape: f32[1,32], index: 2, kind: input, shape index: {}]   ;;  %s6786_s3 = inlined_call_operand.vmem [shape: f32[32,512], index: 3, kind: input, shape index: {}]   ;;  %s6787_s4 = inlined_call_operand.vmem [shape: f32[1,512], index: 4, kind: input, shape index: {}]   ;;  %s6788_s5 = inlined_call_operand.vmem [shape: f32[1,512], index: 5, kind: input, shape index: {}]   ;;  %s6789_s6 = inlined_call_operand.vmem [shape: f32[1,512], index: 6, kind: input, shape index: {}]   ;;  %s6790_s7 = inlined_call_operand.hbm [shape: f32[512,128], index: 7, kind: input, shape index: {}]   ;;  %s6791_s8 = inlined_call_operand.vmem [shape: f32[1,128], index: 8, kind: input, shape index: {}]   ;;  %s6792_s9 = inlined_call_operand.hbm [shape: f32[256,128], index: 9, kind: output, shape index: {}]  }
   0x1   :  { %6983 = sst [smem:[#allocation122_spill]] %s6783_s0 }
   0x2   :  { %6984 = sst [smem:[#allocation123_spill]] %s6784_s1 }
   0x3   :  { %14 = vsyncpa [#allocation8], 0 }
   0x4   :  { %15 = vsyncpa [#allocation9], 0 }
   0x5   :  { %17 = vsyncpa [#allocation9 + $0x1], 0  ;;  %s3839_s30 = smov 0   ;;  %s3841_s10 = smov 0  }
   0x6   :  { %s3843_s11 = smov 0   ;;  %s3845_s12 = smov 0  }
   0x7   :  { %s3847_s13 = smov 0   ;;  %s3849_s14 = smov 0  }
   0x8   :  { %s3851_s15 = smov 0   ;;  %s3853_s16 = smov 0  }
   0x9 LB: > { %s3309_s17 = sadd.s32 4294967295, %s3776_s16   ;;  %s3310_s18 = sadd.s32 4294967294, %s3776_s16   ;;  %s3776_s16 = sphi %s3853_s16, %s23_s16   ;;  %s3772_s15 = sphi %s3851_s15, %s7418_s15   ;;  %s3768_s14 = sphi %s3849_s14, %s7417_s14   ;;  %s3764_s13 = sphi %s3847_s13, %s7416_s13   ;;  %s3760_s12 = sphi %s3845_s12, %s7415_s12   ;;  %s3756_s11 = sphi %s3843_s11, %s7414_s11   ;;  %s3752_s10 = sphi %s3841_s10, %s7413_s10   ;;  %s3748_s30 = sphi %s3839_s30, %s7412_s30  }
   0xa   : > { %s32_s19 = sadd.s32 1, %s3768_s14  ;;  %s35_s20 = sadd.s32 1, %s3772_s15 }
   0xb   : > { %p33_p0 = scmp.ge.s32.totalorder %s32_s19, 2  ;;  %p237_p1 = scmp.eq.s32.totalorder %s3772_s15, 2 }
   0xc   : > { %s244_s21 = sadd.s32 1, %s3756_s11  ;;  %p254_p2 = scmp.ne.s32.totalorder %s3756_s11, %s3752_s10 }
   0xd   : > { %s7420_s19 = smov (%p33_p0, %s32_s19), 0  ;;  %s7422_s20 = smov (!%p33_p0, %s35_s20), %s3772_s15 }
   0xe   : > { %6985 = sst [smem:[#allocation13_spill]] %s7420_s19  ;;  %p37_p3 = scmp.ge.s32.totalorder %s7422_s20, 3 }
   0xf   : > { %s238_s22 = scalar_select %p237_p1, %s3768_s14, 0 }
  0x10   : > { %p255_p4 = scmp.eq.s32.totalorder %s3309_s17, 5  ;;  %p260_p5 = scmp.ne.s32.totalorder %s3752_s10, %s3748_s30 }
  0x11   : > { %p261_p6 = scmp.eq.s32.totalorder %s3310_s18, 5  ;;  %s7424_s20 = smov (%p37_p3, %s7422_s20), 0 }
  0x12   : > { %6986 = sst [smem:[#allocation14_spill]] %s7424_s20  ;;  %p3895_p7 = por %p255_p4, %p254_p2 }
  0x13   : > { %p3899_p8 = por %p261_p6, %p260_p5  ;;  %p239_p9 = scmp.eq.s32.totalorder %s7424_s20, 2 }
  0x14   : > { %p3311_p10 = scmp.ge.s32.totalorder %s3776_s16, 1  ;;  %p268_p11 = scmp.lt.s32.totalorder %s3776_s16, 7 }
  0x15   : > { %s6988_s24 = scalar_select %p3899_p8, 1, 0 }
  0x16   : > { %s240_s25 = scalar_select %p239_p9, %s7420_s19, 0 }
  0x17   : > { %p3907_p12 = pnand %p3311_p10, %p268_p11  ;;  %p3911_p13 = scmp.eq.s32.totalorder %s3309_s17, 0 }
  0x18   : > { %s241_s28 = ssub.s32 %s238_s22, %s240_s25  ;;  %s3778_s29 = smov [#allocation7]  }
  0x19   : > { %p242_p0 = scmp.eq.s32.totalorder %s241_s28, 0  ;;  %p3553_p1 = pneg %p3907_p12 }
  0x1a   : > { %s298_s18 = sshll.u32 %s3778_s29, 4  ;;  %s299_s18 = int_to_ptr.vmem [resolvable:$true] %s298_s18 }
  0x1b   : > { %s3918_s20 = scalar_select %p242_p0, %s3756_s11, %s244_s21  }
  0x1c   : > { %p3554_p2 = pnand %p3911_p13, %p3553_p1  ;;  %s3665_s19 = scalar_lea.vmem %s299_s18, 8192 }
  0x1d   : > { %p3666_p4 = scmp.ne.s32.totalorder %s299_s18, %s3665_s19  ;;  %p3673_p9 = scmp.lt.s32.totalorder %s299_s18, %s299_s18 }
  0x1e   : > { %p3656_p3 = pneg %p3554_p2  ;;  %p3674_p10 = scmp.lt.s32.totalorder %s3665_s19, %s3665_s19 }
  0x20   : > { %p3668_p5 = pnand %p3666_p4, %p3656_p3  ;;  %p3675_p11 = por %p3674_p10, %p3673_p9 }
  0x22   : > { %p3669_p6 = pneg %p3668_p5 }
  0x24   : > { %p3676_p8 = pnand %p3675_p11, %p3669_p6 }
  0x26   : > { %3679 = shalt.err (!%p3676_p8)
}
  0x27   : > { %s3779_s17 = smov 128   ;;  %s3780_s22 = smov 8  }
  0x28   : > { %3556 = dma.hbm_to_vmem [thread:$0]  (!%p3554_p2), %s6790_s7, 8192, %s299_s18, [#allocation8], %s3779_s17, %s3779_s17, %s3780_s22  }
  0x29   : > { %330 = sbr.rel (%p3907_p12) target bundleno = 1269 (0x4f5), region = 56 }
  0x2e   : > { %3739 = dma.done.wait (%p3911_p13), [#allocation8], 8192  }
  0x2f   : > { %3741 = vsyncadd (%p3911_p13), [#allocation8], 4294959104  ;;  %s6796_s19 = sand.u32 1, %s3752_s10   ;;  %p368_p8 = scmp.eq.s32.totalorder %s3764_s13, 2 }
  0x30   : > { %s3316_s21 = sshll.u32 %s6796_s19, 7  ;;  %s6991_s0 = sld [smem:[#allocation122_spill]] }
  0x31   : > { %s369_s29 = scalar_select %p368_p8, 0, %s3760_s12 }
  0x32   : > { %s3943_s25 = scalar_lea.vmem [#allocation10], %s3316_s21  ;;  %p3319_p12 = scmp.ne.s32.totalorder %s3764_s13, 0 }
  0x33   : > { %s3317_s18 = sshll.u32 %s369_s29, 4  ;;  %p3320_p13 = scmp.ne.s32.totalorder (!%p3319_p12), %s3760_s12, 0 }
  0x34   : > { %p371_p0 = scmp.lt.s32.totalorder %s3317_s18, 31  ;;  %384 = sbr.rel (%p3319_p12) target bundleno = 319 (0x13f), region = 64 }
  0x36   : > { %s7426_s18 = smov (!%p371_p0, %s3317_s18), 31 }
  0x37   : > { %s3318_s26 = sshll.u32 %s7426_s18, 3 }
  0x38   : > { %s3941_s27 = scalar_lea.vmem %s6991_s0, %s3318_s26 }
  0x39   : > { %388 = sbr.rel (%p3320_p13) target bundleno = 64 (0x40), region = 68 }
  0x3e   : > { %vm389_vm0 = vcmask 253952   ;;  %v3781_v0 = vmov 0.0  }
  0x3f   : > { %390 = vst.msk [vmem:[#allocation2] sm:$0x1] %vm389_vm0, %v3781_v0  ;;  %391 = vst.msk [vmem:[#allocation3] sm:$0x1] %vm389_vm0, %v3781_v0 }
  0x40 PF: > { %v3948_v1 = vld [vmem:[%s3941_s27] sm:$0xff]  ;;  %v3951_v2 = vld [vmem:[%s3941_s27 + $0x8] sm:$0xff]  ;;  %v3954_v3 = vld [vmem:[%s3941_s27 + $0x10] sm:$0xff]  ;;  %p3321_p1 = scmp.ge.s32.totalorder %s3760_s12, 1 }
  0x41   : > { %v3957_v4 = vld [vmem:[%s3941_s27 + $0x18] sm:$0xff]  ;;  %v3960_v5 = vld [vmem:[%s3941_s27 + $0x20] sm:$0xff]  ;;  %v3963_v6 = vld [vmem:[%s3941_s27 + $0x28] sm:$0xff]  ;;  %s3322_s28 = sshll.u32 (!%p3321_p1), %s3760_s12, 7 }
  0x42   : > { %v3966_v7 = vld [vmem:[%s3941_s27 + $0x30] sm:$0xff]  ;;  %v3969_v8 = vld [vmem:[%s3941_s27 + $0x38] sm:$0xff]  ;;  %v3972_v9 = vld [vmem:[%s3941_s27 + $0x40] sm:$0xff]  ;;  %411 = sbr.rel (%p3321_p1) target bundleno = 169 (0xa9), region = 72  ;;  %s4003_s21 = scvt.s32.f32 (!%p3321_p1), %s3322_s28 }
  0x43   : > { %v3975_v10 = vld [vmem:[%s3941_s27 + $0x48] sm:$0xff]  ;;  %v3978_v11 = vld [vmem:[%s3941_s27 + $0x50] sm:$0xff]  ;;  %v3981_v12 = vld [vmem:[%s3941_s27 + $0x58] sm:$0xff] }
  0x44   : > { %v3984_v13 = vld [vmem:[%s3941_s27 + $0x60] sm:$0xff]  ;;  %v3987_v14 = vld [vmem:[%s3941_s27 + $0x68] sm:$0xff]  ;;  %v3990_v15 = vld [vmem:[%s3941_s27 + $0x70] sm:$0xff]  ;;  %s522_s29 = sadd.f32 (!%p3321_p1), 128.0, %s4003_s21  ;;  %s537_s17 = smul.f32 (!%p3321_p1), 128.0, %s4003_s21 }
  0x45   : > { %v3993_v16 = vld [vmem:[%s3941_s27 + $0x78] sm:$0xff] }
  0x47   : > { %vm412_vm1 = vcmask 261120   ;;  %v525_v24 = vstv %s522_s29  ;;  %vm532_vm2 = vcmask 253952  }
  0x48   : > { %v413_v17 = vsel %vm412_vm1, %v3948_v1, 0.0  ;;  %v414_v18 = vsel %vm412_vm1, %v3951_v2, 0.0  ;;  %v416_v19 = vsel %vm412_vm1, %v3954_v3, 0.0  ;;  %v418_v21 = vsel %vm412_vm1, %v3957_v4, 0.0 }
  0x49   : > { %v415_v20 = vadd.f32 %v414_v18, %v413_v17  ;;  %v420_v23 = vsel %vm412_vm1, %v3960_v5, 0.0  ;;  %3638 = vrcp.f32 %v525_v24  ;;  %v422_v26 = vsel %vm412_vm1, %v3963_v6, 0.0 }
  0x4a   : > { %v424_v28 = vsel %vm412_vm1, %v3966_v7, 0.0  ;;  %v426_v30 = vsel %vm412_vm1, %v3969_v8, 0.0  ;;  %v428_v32 = vsel %vm412_vm1, %v3972_v9, 0.0  ;;  %v430_v34 = vsel %vm412_vm1, %v3975_v10, 0.0 }
  0x4b   : > { %v417_v22 = vadd.f32 %v416_v19, %v415_v20  ;;  %v432_v36 = vsel %vm412_vm1, %v3978_v11, 0.0  ;;  %v434_v39 = vsel %vm412_vm1, %v3981_v12, 0.0  ;;  %v436_v41 = vsel %vm412_vm1, %v3984_v13, 0.0 }
  0x4c   : > { %v438_v43 = vsel %vm412_vm1, %v3987_v14, 0.0  ;;  %v440_v45 = vsel %vm412_vm1, %v3990_v15, 0.0  ;;  %v442_v47 = vsel %vm412_vm1, %v3993_v16, 0.0 }
  0x4d   : > { %v419_v25 = vadd.f32 %v418_v21, %v417_v22 }
  0x4f   : > { %v421_v27 = vadd.f32 %v420_v23, %v419_v25 }
  0x51   : > { %v423_v29 = vadd.f32 %v422_v26, %v421_v27 }
  0x53   : > { %v425_v31 = vadd.f32 %v424_v28, %v423_v29 }
  0x55   : > { %v427_v33 = vadd.f32 %v426_v30, %v425_v31 }
  0x56   : > { %v3639_v38 = vpop.eup %3638 }
  0x57   : > { %v429_v35 = vadd.f32 %v428_v32, %v427_v33  ;;  %3539 = vpush %v3639_v38 }
  0x59   : > { %v431_v37 = vadd.f32 %v430_v34, %v429_v35 }
  0x5b   : > { %v433_v40 = vadd.f32 %v432_v36, %v431_v37 }
  0x5d   : > { %v435_v42 = vadd.f32 %v434_v39, %v433_v40 }
  0x5f   : > { %v437_v44 = vadd.f32 %v436_v41, %v435_v42 }
  0x61   : > { %v439_v46 = vadd.f32 %v438_v43, %v437_v44 }
  0x63   : > { %v441_v48 = vadd.f32 %v440_v45, %v439_v46 }
  0x65   : > { %v443_v49 = vadd.f32 %v442_v47, %v441_v48 }
  0x67   : > { %v444_v50 = vrot.slane %v443_v49, 4 }
  0x69   : > { %v445_v51 = vadd.f32 %v444_v50, %v443_v49 }
  0x6b   : > { %v446_v52 = vrot.slane %v445_v51, 2 }
  0x6d   : > { %v447_v53 = vadd.f32 %v446_v52, %v445_v51  ;;  %v523_v52 = vld [vmem:[#allocation2] sm:$0x1] }
  0x6f   : > { %v448_v54 = vrot.slane %v447_v53, 1 }
  0x71   : > { %v449_v55 = vadd.f32 %v448_v54, %v447_v53 }
  0x73   : > { %v450_v56 = vmul.f32 0.0078125, %v449_v55 }
  0x75   : > { %v451_v57 = vsub.f32 %v3948_v1, %v450_v56  ;;  %v452_v58 = vsub.f32 %v3951_v2, %v450_v56  ;;  %v453_v59 = vsub.f32 %v3954_v3, %v450_v56  ;;  %v454_v60 = vsub.f32 %v3957_v4, %v450_v56 }
  0x76   : > { %v455_v61 = vsub.f32 %v3960_v5, %v450_v56  ;;  %v456_v17 = vsub.f32 %v3963_v6, %v450_v56  ;;  %v457_v19 = vsub.f32 %v3966_v7, %v450_v56  ;;  %v458_v25 = vsub.f32 %v3969_v8, %v450_v56 }
  0x77   : > { %v467_v62 = vmul.f32 %v451_v57, %v451_v57  ;;  %v468_v63 = vmul.f32 %v452_v58, %v452_v58  ;;  %v469_v0 = vmul.f32 %v453_v59, %v453_v59  ;;  %v470_v18 = vmul.f32 %v454_v60, %v454_v60 }
  0x78   : > { %v471_v20 = vmul.f32 %v455_v61, %v455_v61  ;;  %v472_v26 = vmul.f32 %v456_v17, %v456_v17  ;;  %v459_v29 = vsub.f32 %v3972_v9, %v450_v56  ;;  %v473_v30 = vmul.f32 %v457_v19, %v457_v19 }
  0x79   : > { %v483_v21 = vsel %vm412_vm1, %v467_v62, 0.0  ;;  %v484_v22 = vsel %vm412_vm1, %v468_v63, 0.0  ;;  %v486_v23 = vsel %vm412_vm1, %v469_v0, 0.0  ;;  %v488_v27 = vsel %vm412_vm1, %v470_v18, 0.0 }
  0x7a   : > { %v485_v24 = vadd.f32 %v484_v22, %v483_v21  ;;  %v490_v31 = vsel %vm412_vm1, %v471_v20, 0.0  ;;  %v460_v33 = vsub.f32 %v3975_v10, %v450_v56  ;;  %v474_v34 = vmul.f32 %v458_v25, %v458_v25 }
  0x7b   : > { %v492_v35 = vsel %vm412_vm1, %v472_v26, 0.0  ;;  %v461_v37 = vsub.f32 %v3978_v11, %v450_v56  ;;  %v475_v38 = vmul.f32 %v459_v29, %v459_v29  ;;  %v494_v39 = vsel %vm412_vm1, %v473_v30, 0.0 }
  0x7c   : > { %v487_v28 = vadd.f32 %v486_v23, %v485_v24  ;;  %v462_v41 = vsub.f32 %v3981_v12, %v450_v56  ;;  %v476_v42 = vmul.f32 %v460_v33, %v460_v33  ;;  %v496_v43 = vsel %vm412_vm1, %v474_v34, 0.0 }
  0x7d   : > { %v463_v45 = vsub.f32 %v3984_v13, %v450_v56  ;;  %v477_v46 = vmul.f32 %v461_v37, %v461_v37  ;;  %v498_v47 = vsel %vm412_vm1, %v475_v38, 0.0  ;;  %v464_v49 = vsub.f32 %v3987_v14, %v450_v56 }
  0x7e   : > { %v489_v32 = vadd.f32 %v488_v27, %v487_v28  ;;  %v478_v50 = vmul.f32 %v462_v41, %v462_v41  ;;  %v500_v51 = vsel %vm412_vm1, %v476_v42, 0.0  ;;  %v465_v54 = vsub.f32 %v3990_v15, %v450_v56 }
  0x7f   : > { %v479_v55 = vmul.f32 %v463_v45, %v463_v45  ;;  %v502_v57 = vsel %vm412_vm1, %v477_v46, 0.0  ;;  %v524_v59 = vsub.f32 %v450_v56, %v523_v52  ;;  %v466_v60 = vsub.f32 %v3993_v16, %v450_v56 }
  0x80   : > { %v491_v36 = vadd.f32 %v490_v31, %v489_v32  ;;  %v480_v61 = vmul.f32 %v464_v49, %v464_v49  ;;  %v504_v62 = vsel %vm412_vm1, %v478_v50, 0.0  ;;  %v481_v18 = vmul.f32 %v465_v54, %v465_v54 }
  0x81   : > { %v506_v19 = vsel %vm412_vm1, %v479_v55, 0.0  ;;  %v482_v22 = vmul.f32 %v466_v60, %v466_v60  ;;  %v536_v33 = vmul.f32 %v524_v59, %v524_v59 }
  0x82   : > { %v493_v40 = vadd.f32 %v492_v35, %v491_v36  ;;  %v508_v23 = vsel %vm412_vm1, %v480_v61, 0.0  ;;  %v510_v56 = vsel %vm412_vm1, %v481_v18, 0.0  ;;  %v534_v36 = vld [vmem:[#allocation3] sm:$0x1] }
  0x83   : > { %v512_v26 = vsel %vm412_vm1, %v482_v22, 0.0 }
  0x84   : > { %v495_v44 = vadd.f32 %v494_v39, %v493_v40 }
  0x86   : > { %v497_v48 = vadd.f32 %v496_v43, %v495_v44 }
  0x88   : > { %v499_v53 = vadd.f32 %v498_v47, %v497_v48  ;;  %s4056_s18 = spop %3539 }
  0x89   : > { %s528_s26 = smul.f32 128.0, %s4056_s18 }
  0x8a   : > { %v501_v58 = vadd.f32 %v500_v51, %v499_v53  ;;  %s541_s22 = smul.f32 %s4056_s18, %s537_s17 }
  0x8b   : > { %v529_v63 = vstv %s528_s26 }
  0x8c   : > { %v503_v0 = vadd.f32 %v502_v57, %v501_v58  ;;  %v530_v17 = vmul.f32 %v529_v63, %v524_v59  ;;  %v542_v34 = vstv %s541_s22 }
  0x8d   : > { %v543_v38 = vmul.f32 %v542_v34, %v536_v33 }
  0x8e   : > { %v505_v20 = vadd.f32 %v504_v62, %v503_v0  ;;  %v531_v21 = vadd.f32 %v530_v17, %v523_v52 }
  0x90   : > { %v507_v24 = vadd.f32 %v506_v19, %v505_v20  ;;  %533 = vst.msk [vmem:[#allocation2] sm:$0x1] %vm532_vm2, %v531_v21 }
  0x92   : > { %v509_v25 = vadd.f32 %v508_v23, %v507_v24 }
  0x94   : > { %v511_v27 = vadd.f32 %v510_v56, %v509_v25 }
  0x96   : > { %v513_v28 = vadd.f32 %v512_v26, %v511_v27 }
  0x98   : > { %v514_v29 = vrot.slane %v513_v28, 4 }
  0x9a   : > { %v515_v30 = vadd.f32 %v514_v29, %v513_v28 }
  0x9c   : > { %v516_v31 = vrot.slane %v515_v30, 2 }
  0x9e   : > { %v517_v32 = vadd.f32 %v516_v31, %v515_v30 }
  0xa0   : > { %v518_v35 = vrot.slane %v517_v32, 1 }
  0xa2   : > { %v519_v37 = vadd.f32 %v518_v35, %v517_v32 }
  0xa4   : > { %v535_v39 = vadd.f32 %v534_v36, %v519_v37 }
  0xa6   : > { %v544_v40 = vadd.f32 %v543_v38, %v535_v39 }
  0xa8   : > { %545 = vst.msk [vmem:[#allocation3] sm:$0x1] %vm532_vm2, %v544_v40 }
  0xa9 PF: > { %p3323_p2 = scmp.ne.s32.totalorder %s3760_s12, 1 }
  0xaa   : > { %s4075_s28 = sshll.u32 (!%p3323_p2), %s3760_s12, 7  ;;  %s6993_s1 = sld [smem:[#allocation123_spill]] (!%p3323_p2) }
  0xab   : > { %549 = sbr.rel (%p3323_p2) target bundleno = 319 (0x13f), region = 76  ;;  %s601_s21 = ssub.s32 (!%p3323_p2), 200, %s4075_s28 }
  0xac   : > { %p602_p3 = scmp.lt.s32.totalorder (!%p3323_p2), %s601_s21, 128  ;;  %s779_s18 = scvt.s32.f32 (!%p3323_p2), %s4075_s28 }
  0xb0   : > { %v551_v41 = vlaneseq  ;;  %v4081_v45 = vstv %s4075_s28  ;;  %s7428_s21 = smov (!%p602_p3, %s601_s21), 128  ;;  %vm653_vm6 = vcmask 261120  }
  0xb1   : > { %s4111_s29 = scvt.s32.f32 %s7428_s21 }
  0xb2   : > { %v4072_v42 = vshrl.u32 %v551_v41, 7 }
  0xb3   : > { %s780_s26 = sadd.f32 %s779_s18, %s4111_s29  ;;  %s795_s21 = smul.f32 %s779_s18, %s4111_s29 }
  0xb4   : > { %v553_v43 = vadd.s32 8, %v4072_v42  ;;  %v554_v44 = vadd.s32 16, %v4072_v42  ;;  %v555_v46 = vadd.s32 24, %v4072_v42  ;;  %v4086_v47 = vadd.s32 %v4081_v45, %v4072_v42 }
  0xb5   : > { %v556_v48 = vadd.s32 32, %v4072_v42  ;;  %v557_v51 = vadd.s32 40, %v4072_v42  ;;  %v558_v53 = vadd.s32 48, %v4072_v42  ;;  %v559_v55 = vadd.s32 56, %v4072_v42 }
  0xb6   : > { %v4090_v49 = vadd.s32 %v4081_v45, %v553_v43  ;;  %v4093_v50 = vadd.s32 %v4081_v45, %v554_v44  ;;  %v4097_v52 = vadd.s32 %v4081_v45, %v555_v46  ;;  %vm585_vm3 = vcmp.lt.s32.totalorder %v4086_v47, 200 }
  0xb7   : > { %v4102_v54 = vadd.s32 %v4081_v45, %v556_v48  ;;  %v4108_v57 = vadd.s32 %v4081_v45, %v557_v51  ;;  %v637_v58 = vsel %vm585_vm3, %v3948_v1, 0.0  ;;  %v560_v61 = vadd.s32 64, %v4072_v42 }
  0xb8   : > { %vm586_vm4 = vcmp.lt.s32.totalorder %v4090_v49, 200  ;;  %vm587_vm5 = vcmp.lt.s32.totalorder %v4093_v50, 200  ;;  %vm588_vm7 = vcmp.lt.s32.totalorder %v4097_v52, 200  ;;  %v4125_v62 = vadd.s32 %v4081_v45, %v558_v53 }
  0xb9   : > { %v638_v59 = vsel %vm586_vm4, %v3951_v2, 0.0  ;;  %v639_v60 = vsel %vm587_vm5, %v3954_v3, 0.0  ;;  %vm589_vm8 = vcmp.lt.s32.totalorder %v4102_v54, 200  ;;  %v561_v63 = vadd.s32 72, %v4072_v42 }
  0xba   : > { %v640_v0 = vsel %vm588_vm7, %v3957_v4, 0.0  ;;  %v654_v17 = vsel %vm653_vm6, %v637_v58, 0.0  ;;  %v4134_v18 = vadd.s32 %v4081_v45, %v559_v55  ;;  %vm590_vm9 = vcmp.lt.s32.totalorder %v4108_v57, 200 }
  0xbb   : > { %v655_v19 = vsel %vm653_vm6, %v638_v59, 0.0  ;;  %v657_v20 = vsel %vm653_vm6, %v639_v60, 0.0  ;;  %v641_v21 = vsel %vm589_vm8, %v3960_v5, 0.0  ;;  %v562_v23 = vadd.s32 80, %v4072_v42 }
  0xbc   : > { %v656_v22 = vadd.f32 %v655_v19, %v654_v17  ;;  %v4147_v24 = vadd.s32 %v4081_v45, %v560_v61  ;;  %vm591_vm10 = vcmp.lt.s32.totalorder %v4125_v62, 200  ;;  %v659_v56 = vsel %vm653_vm6, %v640_v0, 0.0 }
  0xbd   : > { %v563_v25 = vadd.s32 88, %v4072_v42  ;;  %v642_v26 = vsel %vm590_vm9, %v3963_v6, 0.0  ;;  %v4156_v28 = vadd.s32 %v4081_v45, %v561_v63  ;;  %vm592_vm11 = vcmp.lt.s32.totalorder %v4134_v18, 200 }
  0xbe   : > { %v658_v27 = vadd.f32 %v657_v20, %v656_v22  ;;  %v661_v29 = vsel %vm653_vm6, %v641_v21, 0.0  ;;  %v783_v30 = vstv %s780_s26  ;;  %v564_v31 = vadd.s32 96, %v4072_v42 }
  0xbf   : > { %v643_v32 = vsel %vm591_vm10, %v3966_v7, 0.0  ;;  %v4165_v34 = vadd.s32 %v4081_v45, %v562_v23  ;;  %vm593_vm12 = vcmp.lt.s32.totalorder %v4147_v24, 200  ;;  %v663_v35 = vsel %vm653_vm6, %v642_v26, 0.0 }
  0xc0   : > { %v660_v33 = vadd.f32 %v659_v56, %v658_v27  ;;  %3640 = vrcp.f32 %v783_v30  ;;  %v644_v36 = vsel %vm592_vm11, %v3969_v8, 0.0  ;;  %v565_v38 = vadd.s32 104, %v4072_v42 }
  0xc1   : > { %v4174_v39 = vadd.s32 %v4081_v45, %v563_v25  ;;  %vm594_vm13 = vcmp.lt.s32.totalorder %v4156_v28, 200  ;;  %v665_v40 = vsel %vm653_vm6, %v643_v32, 0.0  ;;  %v645_v41 = vsel %vm593_vm12, %v3972_v9, 0.0 }
  0xc2   : > { %v662_v37 = vadd.f32 %v661_v29, %v660_v33  ;;  %v566_v44 = vadd.s32 112, %v4072_v42  ;;  %v4183_v46 = vadd.s32 %v4081_v45, %v564_v31  ;;  %vm595_vm14 = vcmp.lt.s32.totalorder %v4165_v34, 200 }
  0xc3   : > { %v667_v48 = vsel %vm653_vm6, %v644_v36, 0.0  ;;  %v646_v51 = vsel %vm594_vm13, %v3975_v10, 0.0  ;;  %v567_v55 = vadd.s32 120, %v4072_v42  ;;  %v4192_v58 = vadd.s32 %v4081_v45, %v565_v38 }
  0xc4   : > { %v664_v43 = vadd.f32 %v663_v35, %v662_v37  ;;  %vm6795_vm15 = vcmp.lt.s32.totalorder %v4174_v39, 200  ;;  %v669_v59 = vsel %vm653_vm6, %v645_v41, 0.0  ;;  %v647_v60 = vsel %vm595_vm14, %v3978_v11, 0.0 }
  0xc5   : > { %v4200_v63 = vadd.s32 %v4081_v45, %v566_v44  ;;  %vm597_vm0 = vcmp.lt.s32.totalorder %v4183_v46, 200  ;;  %v671_v0 = vsel %vm653_vm6, %v646_v51, 0.0  ;;  %v648_v42 = vsel %vm6795_vm15, %v3981_v12, 0.0 }
  0xc6   : > { %v666_v53 = vadd.f32 %v665_v40, %v664_v43  ;;  %v4208_v19 = vadd.s32 %v4081_v45, %v567_v55  ;;  %vm598_vm1 = vcmp.lt.s32.totalorder %v4192_v58, 200  ;;  %v673_v20 = vsel %vm653_vm6, %v647_v60, 0.0 }
  0xc7   : > { %v649_v21 = vsel %vm597_vm0, %v3984_v13, 0.0  ;;  %vm599_vm2 = vcmp.lt.s32.totalorder %v4200_v63, 200  ;;  %v675_v23 = vsel %vm653_vm6, %v648_v42, 0.0  ;;  %v650_v45 = vsel %vm598_vm1, %v3987_v14, 0.0 }
  0xc8   : > { %v668_v61 = vadd.f32 %v667_v48, %v666_v53  ;;  %vm600_vm15 = vcmp.lt.s32.totalorder %v4208_v19, 200  ;;  %v677_v26 = vsel %vm653_vm6, %v649_v21, 0.0  ;;  %v651_v27 = vsel %vm599_vm2, %v3990_v15, 0.0 }
  0xc9   : > { %v679_v30 = vsel %vm653_vm6, %v650_v45, 0.0  ;;  %v652_v31 = vsel %vm600_vm15, %v3993_v16, 0.0  ;;  %v681_v33 = vsel %vm653_vm6, %v651_v27, 0.0  ;;  %v691_v35 = vstv %s4111_s29 }
  0xca   : > { %v670_v17 = vadd.f32 %v669_v59, %v668_v61  ;;  %v683_v37 = vsel %vm653_vm6, %v652_v31, 0.0  ;;  %3642 = vrcp.f32 %v691_v35 }
  0xcc   : > { %v672_v22 = vadd.f32 %v671_v0, %v670_v17 }
  0xcd   : > { %v3641_v56 = vpop.eup %3640 }
  0xce   : > { %v674_v25 = vadd.f32 %v673_v20, %v672_v22  ;;  %3541 = vpush %v3641_v56 }
  0xd0   : > { %v676_v29 = vadd.f32 %v675_v23, %v674_v25 }
  0xd2   : > { %v678_v32 = vadd.f32 %v677_v26, %v676_v29 }
  0xd4   : > { %v680_v36 = vadd.f32 %v679_v30, %v678_v32 }
  0xd6   : > { %v682_v38 = vadd.f32 %v681_v33, %v680_v36 }
  0xd7   : > { %v3643_v53 = vpop.eup %3642 }
  0xd8   : > { %v684_v40 = vadd.f32 %v683_v37, %v682_v38 }
  0xda   : > { %v685_v41 = vrot.slane %v684_v40, 4 }
  0xdc   : > { %v686_v43 = vadd.f32 %v685_v41, %v684_v40 }
  0xde   : > { %v687_v44 = vrot.slane %v686_v43, 2 }
  0xe0   : > { %v688_v48 = vadd.f32 %v687_v44, %v686_v43 }
  0xe2   : > { %v689_v51 = vrot.slane %v688_v48, 1 }
  0xe4   : > { %v690_v55 = vadd.f32 %v689_v51, %v688_v48  ;;  %v781_v51 = vld [vmem:[#allocation2] sm:$0x1] }
  0xe6   : > { %v4232_v59 = vmul.f32 %v3643_v53, %v690_v55 }
  0xe8   : > { %v694_v60 = vsub.f32 %v3948_v1, %v4232_v59  ;;  %v695_v61 = vsub.f32 %v3951_v2, %v4232_v59  ;;  %v696_v0 = vsub.f32 %v3954_v3, %v4232_v59  ;;  %v697_v42 = vsub.f32 %v3957_v4, %v4232_v59 }
  0xe9   : > { %v698_v17 = vsub.f32 %v3960_v5, %v4232_v59  ;;  %v699_v2 = vsub.f32 %v3963_v6, %v4232_v59  ;;  %v700_v5 = vsub.f32 %v3966_v7, %v4232_v59  ;;  %v701_v50 = vsub.f32 %v3969_v8, %v4232_v59 }
  0xea   : > { %v710_v20 = vsel %vm585_vm3, %v694_v60, 0.0  ;;  %v711_v21 = vsel %vm586_vm4, %v695_v61, 0.0  ;;  %v712_v1 = vsel %vm587_vm5, %v696_v0, 0.0  ;;  %v713_v3 = vsel %vm588_vm7, %v697_v42, 0.0 }
  0xeb   : > { %v726_v22 = vmul.f32 %v710_v20, %v710_v20  ;;  %v727_v4 = vmul.f32 %v711_v21, %v711_v21  ;;  %v728_v23 = vmul.f32 %v712_v1, %v712_v1  ;;  %v714_v47 = vsel %vm589_vm8, %v698_v17, 0.0 }
  0xec   : > { %v729_v49 = vmul.f32 %v713_v3, %v713_v3  ;;  %v715_v56 = vsel %vm590_vm9, %v699_v2, 0.0  ;;  %v730_v6 = vmul.f32 %v714_v47, %v714_v47  ;;  %v702_v7 = vsub.f32 %v3972_v9, %v4232_v59 }
  0xed   : > { %v742_v52 = vsel %vm653_vm6, %v726_v22, 0.0  ;;  %v743_v45 = vsel %vm653_vm6, %v727_v4, 0.0  ;;  %v745_v25 = vsel %vm653_vm6, %v728_v23, 0.0  ;;  %v716_v54 = vsel %vm591_vm10, %v700_v5, 0.0 }
  0xee   : > { %v744_v26 = vadd.f32 %v743_v45, %v742_v52  ;;  %v731_v27 = vmul.f32 %v715_v56, %v715_v56  ;;  %v747_v8 = vsel %vm653_vm6, %v729_v49, 0.0  ;;  %v703_v57 = vsub.f32 %v3975_v10, %v4232_v59 }
  0xef   : > { %v717_v29 = vsel %vm592_vm11, %v701_v50, 0.0  ;;  %v732_v31 = vmul.f32 %v716_v54, %v716_v54  ;;  %v749_v32 = vsel %vm653_vm6, %v730_v6, 0.0  ;;  %v704_v9 = vsub.f32 %v3978_v11, %v4232_v59 }
  0xf0   : > { %v746_v30 = vadd.f32 %v745_v25, %v744_v26  ;;  %v718_v62 = vsel %vm593_vm12, %v702_v7, 0.0  ;;  %v733_v35 = vmul.f32 %v717_v29, %v717_v29  ;;  %v751_v36 = vsel %vm653_vm6, %v731_v27, 0.0 }
  0xf1   : > { %v705_v10 = vsub.f32 %v3981_v12, %v4232_v59  ;;  %v719_v18 = vsel %vm594_vm13, %v703_v57, 0.0  ;;  %v734_v38 = vmul.f32 %v718_v62, %v718_v62  ;;  %v753_v40 = vsel %vm653_vm6, %v732_v31, 0.0  ;;  %v792_v57 = vld [vmem:[#allocation3] sm:$0x1] }
  0xf2   : > { %v748_v33 = vadd.f32 %v747_v8, %v746_v30  ;;  %v706_v11 = vsub.f32 %v3984_v13, %v4232_v59  ;;  %v720_v24 = vsel %vm595_vm14, %v704_v9, 0.0  ;;  %v735_v43 = vmul.f32 %v719_v18, %v719_v18 }
  0xf3   : > { %v755_v44 = vsel %vm653_vm6, %v733_v35, 0.0  ;;  %v707_v12 = vsub.f32 %v3987_v14, %v4232_v59  ;;  %vm6992_vm3 = vcmp.lt.s32.totalorder %v4174_v39, 200  ;;  %v736_v53 = vmul.f32 %v720_v24, %v720_v24 }
  0xf4   : > { %v750_v37 = vadd.f32 %v749_v32, %v748_v33  ;;  %v721_v28 = vsel %vm6992_vm3, %v705_v10, 0.0  ;;  %v757_v55 = vsel %vm653_vm6, %v734_v38, 0.0  ;;  %v708_v13 = vsub.f32 %v3990_v15, %v4232_v59 }
  0xf5   : > { %v722_v34 = vsel %vm597_vm0, %v706_v11, 0.0  ;;  %v737_v14 = vmul.f32 %v721_v28, %v721_v28  ;;  %v759_v39 = vsel %vm653_vm6, %v735_v43, 0.0  ;;  %v782_v61 = vsub.f32 %v4232_v59, %v781_v51 }
  0xf6   : > { %v752_v41 = vadd.f32 %v751_v36, %v750_v37  ;;  %v709_v0 = vsub.f32 %v3993_v16, %v4232_v59  ;;  %v723_v42 = vsel %vm598_vm1, %v707_v12, 0.0  ;;  %v738_v21 = vmul.f32 %v722_v34, %v722_v34  ;;  %v804_v36 = vld [vmem:[%s6993_s1] sm:$0x1] }
  0xf7   : > { %v761_v15 = vsel %vm653_vm6, %v736_v53, 0.0  ;;  %v724_v1 = vsel %vm599_vm2, %v708_v13, 0.0  ;;  %vm790_vm4 = vcmask 253952   ;;  %v739_v3 = vmul.f32 %v723_v42, %v723_v42  ;;  %v805_v37 = vld [vmem:[%s6785_s2] sm:$0x1] }
  0xf8   : > { %v754_v48 = vadd.f32 %v753_v40, %v752_v41  ;;  %v763_v22 = vsel %vm653_vm6, %v737_v14, 0.0  ;;  %v725_v58 = vsel %vm600_vm15, %v709_v0, 0.0  ;;  %v740_v4 = vmul.f32 %v724_v1, %v724_v1 }
  0xf9   : > { %v765_v23 = vsel %vm653_vm6, %v738_v21, 0.0  ;;  %v741_v5 = vmul.f32 %v725_v58, %v725_v58  ;;  %v767_v47 = vsel %vm653_vm6, %v739_v3, 0.0  ;;  %v794_v26 = vmul.f32 %v782_v61, %v782_v61 }
  0xfa   : > { %v756_v60 = vadd.f32 %v755_v44, %v754_v48  ;;  %v769_v50 = vsel %vm653_vm6, %v740_v4, 0.0 }
  0xfb   : > { %v771_v6 = vsel %vm653_vm6, %v741_v5, 0.0 }
  0xfc   : > { %v758_v17 = vadd.f32 %v757_v55, %v756_v60 }
  0xfe   : > { %v760_v2 = vadd.f32 %v759_v39, %v758_v17 }
  0xff   : > { %s4295_s17 = spop %3541 }
 0x100   : > { %s786_s22 = smul.f32 %s4295_s17, %s4111_s29  ;;  %v762_v59 = vadd.f32 %v761_v15, %v760_v2 }
 0x101   : > { %s799_s26 = smul.f32 %s4295_s17, %s795_s21 }
 0x102   : > { %v787_v20 = vstv %s786_s22  ;;  %v764_v63 = vadd.f32 %v763_v22, %v762_v59 }
 0x103   : > { %v788_v46 = vmul.f32 %v787_v20, %v782_v61  ;;  %v800_v27 = vstv %s799_s26 }
 0x104   : > { %v766_v49 = vadd.f32 %v765_v23, %v764_v63  ;;  %v801_v30 = vmul.f32 %v800_v27, %v794_v26 }
 0x105   : > { %v789_v16 = vadd.f32 %v788_v46, %v781_v51 }
 0x106   : > { %v768_v56 = vadd.f32 %v767_v47, %v766_v49 }
 0x107   : > { %791 = vst.msk [vmem:[#allocation2] sm:$0x1] %vm790_vm4, %v789_v16 }
 0x108   : > { %v770_v52 = vadd.f32 %v769_v50, %v768_v56 }
 0x10a   : > { %v772_v19 = vadd.f32 %v771_v6, %v770_v52 }
 0x10c   : > { %v773_v45 = vrot.slane %v772_v19, 4 }
 0x10e   : > { %v774_v25 = vadd.f32 %v773_v45, %v772_v19  ;;  %v812_v38 = vld [vmem:[#allocation2] sm:$0x1] }
 0x110   : > { %v775_v7 = vrot.slane %v774_v25, 2 }
 0x112   : > { %v776_v54 = vadd.f32 %v775_v7, %v774_v25 }
 0x114   : > { %v777_v8 = vrot.slane %v776_v54, 1 }
 0x116   : > { %v778_v29 = vadd.f32 %v777_v8, %v776_v54 }
 0x118   : > { %v793_v31 = vadd.f32 %v792_v57, %v778_v29 }
 0x11a   : > { %v802_v32 = vadd.f32 %v801_v30, %v793_v31 }
 0x11c   : > { %803 = vst.msk [vmem:[#allocation3] sm:$0x1] %vm790_vm4, %v802_v32 }
 0x123   : > { %v806_v9 = vld [vmem:[#allocation3] sm:$0x1] }
 0x124   : > { %v807_v62 = vmul.f32 0.005, %v806_v9 }
 0x126   : > { %v808_v33 = vmax.f32 %v807_v62, 0.0 }
 0x128   : > { %v809_v35 = vadd.f32 1e-05, %v808_v33 }
 0x12a   : > { %3644 = vrsqrt.f32 %v809_v35 }
 0x137   : > { %v3645_v10 = vpop.eup %3644 }
 0x138   : > { %v811_v18 = vmul.f32 %v3645_v10, %v804_v36 }
 0x13a   : > { %v813_v40 = vmul.f32 %v812_v38, %v811_v18  ;;  %815 = vst.msk [vmem:[#allocation2] sm:$0x1] %vm790_vm4, %v811_v18 }
 0x13c   : > { %v814_v11 = vsub.f32 %v805_v37, %v813_v40 }
 0x13e   : > { %816 = vst.msk [vmem:[#allocation3] sm:$0x1] %vm790_vm4, %v814_v11 }
 0x13f PF: > { %p3325_p4 = scmp.ne.s32.totalorder %s3764_s13, 1 }
 0x141   : > { %820 = sbr.rel (%p3325_p4) target bundleno = 940 (0x3ac), region = 80 }
 0x146   : > { %p3326_p5 = scmp.ne.s32.totalorder %s3760_s12, 0 }
 0x148   : > { %824 = sbr.rel (%p3326_p5) target bundleno = 337 (0x151), region = 84 }
 0x14d   : > { %v825_v24 = vlaneseq  ;;  %v3782_v41 = vmov 0.0  }
 0x14f   : > { %vm827_vm5 = vcmp.lt.s32.totalorder %v825_v24, 512 }
 0x150   : > { %829 = vst.msk [vmem:[#allocation4] sm:$0xf] %vm827_vm5, %v3782_v41  ;;  %830 = vst.msk [vmem:[#allocation5] sm:$0xf] %vm827_vm5, %v3782_v41 }
 0x151 PF: > { %v922_v43 = vld [vmem:[%s6786_s3 + $0x68] sm:$0xff]  ;;  %v924_v44 = vld [vmem:[%s6786_s3 + $0x78] sm:$0xff]  ;;  %v921_v12 = vld [vmem:[%s6786_s3 + $0x60] sm:$0xff]  ;;  %v3783_v3 = vmov 0.0   ;;  %vm947_vm6 = vcmask 261120   ;;  %s3376_s28 = sshll.u32 %s3760_s12, 9 }
 0x152   : > { %1020 = vmatprep.subr.mxu0 %v922_v43  ;;  %1181 = vmatprep.subr.mxu1 %v924_v44  ;;  %v923_v28 = vld [vmem:[%s6786_s3 + $0x70] sm:$0xff]  ;;  %v918_v48 = vld [vmem:[%s6786_s3 + $0x48] sm:$0xff]  ;;  %v920_v51 = vld [vmem:[%s6786_s3 + $0x58] sm:$0xff]  ;;  %s4536_s29 = scalar_lea.vmem [#allocation6], %s3376_s28  ;;  %p3363_p6 = scmp.ge.s32.totalorder %s3760_s12, 1 }
 0x153   : > { %1021 = vmatpush1.msra.mxu0 %v921_v12  ;;  %1182 = vmatpush1.msra.mxu1 %v923_v28  ;;  %v917_v53 = vld [vmem:[%s6786_s3 + $0x40] sm:$0xff]  ;;  %v919_v55 = vld [vmem:[%s6786_s3 + $0x50] sm:$0xff]  ;;  %v914_v13 = vld [vmem:[%s6786_s3 + $0x28] sm:$0xff] }
 0x154   : > { %1022 = vmatprep.subr.mxu0 %v918_v48  ;;  %1183 = vmatprep.subr.mxu1 %v920_v51  ;;  %v916_v34 = vld [vmem:[%s6786_s3 + $0x38] sm:$0xff]  ;;  %v913_v60 = vld [vmem:[%s6786_s3 + $0x20] sm:$0xff]  ;;  %v915_v14 = vld [vmem:[%s6786_s3 + $0x30] sm:$0xff] }
 0x155   : > { %1023 = vmatpush1.msra.mxu0 %v917_v53  ;;  %1184 = vmatpush1.msra.mxu1 %v919_v55  ;;  %v910_v39 = vld [vmem:[%s6786_s3 + $0x8] sm:$0xff]  ;;  %v912_v61 = vld [vmem:[%s6786_s3 + $0x18] sm:$0xff]  ;;  %v909_v0 = vld [vmem:[%s6786_s3] sm:$0xff] }
 0x156   : > { %1024 = vmatprep.subr.mxu0 %v914_v13  ;;  %1185 = vmatprep.subr.mxu1 %v916_v34  ;;  %v911_v42 = vld [vmem:[%s6786_s3 + $0x10] sm:$0xff]  ;;  %v831_v17 = vld [vmem:[%s3941_s27] sm:$0xff]  ;;  %v832_v46 = vld [vmem:[%s3941_s27 + $0x8] sm:$0xff] }
 0x157   : > { %v4384_v20 = vld [vmem:[#allocation2] ss:$0 sm:$0xff]  ;;  %1025 = vmatpush1.msra.mxu0 %v913_v60  ;;  %1186 = vmatpush1.msra.mxu1 %v915_v14  ;;  %v4387_v15 = vld [vmem:[#allocation3] ss:$0 sm:$0xff]  ;;  %v833_v1 = vld [vmem:[%s3941_s27 + $0x10] sm:$0xff] }
 0x158   : > { %v854_v21 = vmul.f32 %v4384_v20, %v831_v17  ;;  %1026 = vmatprep.subr.mxu0 %v910_v39  ;;  %1187 = vmatprep.subr.mxu1 %v912_v61  ;;  %v855_v2 = vmul.f32 %v4384_v20, %v832_v46  ;;  %v856_v16 = vmul.f32 %v4384_v20, %v833_v1  ;;  %v834_v59 = vld [vmem:[%s3941_s27 + $0x18] sm:$0xff]  ;;  %v835_v47 = vld [vmem:[%s3941_s27 + $0x20] sm:$0xff]  ;;  %v836_v6 = vld [vmem:[%s3941_s27 + $0x28] sm:$0xff]  ;;  %v6797_v46 = vlaneseq }
 0x159   : > { %1027 = vmatpush1.msra.mxu0 %v909_v0  ;;  %1060 = vmatprep.mubr.f32.mxu0 %v3783_v3  ;;  %v857_v5 = vmul.f32 %v4384_v20, %v834_v59  ;;  %v858_v56 = vmul.f32 %v4384_v20, %v835_v47  ;;  %v859_v45 = vmul.f32 %v4384_v20, %v836_v6  ;;  %v837_v25 = vld [vmem:[%s3941_s27 + $0x30] sm:$0xff]  ;;  %v838_v27 = vld [vmem:[%s3941_s27 + $0x38] sm:$0xff]  ;;  %v839_v30 = vld [vmem:[%s3941_s27 + $0x40] sm:$0xff] }
 0x15a   : > { %v877_v22 = vadd.f32 %v4387_v15, %v854_v21  ;;  %1188 = vmatpush1.msra.mxu1 %v911_v42  ;;  %1221 = vmatprep.mubr.f32.mxu1 %v3783_v3  ;;  %v878_v58 = vadd.f32 %v4387_v15, %v855_v2  ;;  %v879_v63 = vadd.f32 %v4387_v15, %v856_v16  ;;  %v840_v62 = vld [vmem:[%s3941_s27 + $0x48] sm:$0xff]  ;;  %v841_v10 = vld [vmem:[%s3941_s27 + $0x50] sm:$0xff]  ;;  %v842_v40 = vld [vmem:[%s3941_s27 + $0x58] sm:$0xff] }
 0x15b   : > { %v880_v50 = vadd.f32 %v4387_v15, %v857_v5  ;;  %v881_v19 = vadd.f32 %v4387_v15, %v858_v56  ;;  %v882_v54 = vadd.f32 %v4387_v15, %v859_v45  ;;  %v860_v26 = vmul.f32 %v4384_v20, %v837_v25  ;;  %v843_v43 = vld [vmem:[%s3941_s27 + $0x60] sm:$0xff]  ;;  %v844_v48 = vld [vmem:[%s3941_s27 + $0x68] sm:$0xff]  ;;  %v845_v13 = vld [vmem:[%s3941_s27 + $0x70] sm:$0xff] }
 0x15c   : > { %v893_v4 = vmax.f32 %v877_v22, 0.0  ;;  %v894_v23 = vmax.f32 %v878_v58, 0.0  ;;  %v895_v49 = vmax.f32 %v879_v63, 0.0  ;;  %v861_v29 = vmul.f32 %v4384_v20, %v838_v27  ;;  %v846_v39 = vld [vmem:[%s3941_s27 + $0x78] sm:$0xff]  ;;  %v925_v22 = vld [vmem:[%s6787_s4] sm:$0xf] }
 0x15d   : > { %v896_v52 = vmax.f32 %v880_v50, 0.0  ;;  %v897_v7 = vmax.f32 %v881_v19, 0.0  ;;  %v898_v8 = vmax.f32 %v882_v54, 0.0  ;;  %v883_v57 = vadd.f32 %v4387_v15, %v860_v26 }
 0x15e   : > { %3329 = vmatmul.mubr.msk.f32.vlgmr.msra.gmra.mxu0 %vm947_vm6, %v893_v4  ;;  %3345 = vmatmul.mubr.msk.f32.vlgmr.msra.gmra.mxu1 %vm947_vm6, %v893_v4  ;;  %v884_v32 = vadd.f32 %v4387_v15, %v861_v29  ;;  %v862_v9 = vmul.f32 %v4384_v20, %v839_v30  ;;  %v863_v36 = vmul.f32 %v4384_v20, %v840_v62 }
 0x15f   : > { %1066 = vmatprep.mubr.f32.mxu0 %v3783_v3  ;;  %1227 = vmatprep.mubr.f32.mxu1 %v3783_v3  ;;  %v899_v31 = vmax.f32 %v883_v57, 0.0  ;;  %v864_v38 = vmul.f32 %v4384_v20, %v841_v10  ;;  %v865_v41 = vmul.f32 %v4384_v20, %v842_v40  ;;  %v866_v28 = vmul.f32 %v4384_v20, %v843_v43 }
 0x160   : > { %v900_v33 = vmax.f32 %v884_v32, 0.0  ;;  %v885_v35 = vadd.f32 %v4387_v15, %v862_v9  ;;  %v886_v37 = vadd.f32 %v4387_v15, %v863_v36  ;;  %v867_v55 = vmul.f32 %v4384_v20, %v844_v48 }
 0x161   : > { %v887_v24 = vadd.f32 %v4387_v15, %v864_v38  ;;  %v888_v12 = vadd.f32 %v4387_v15, %v865_v41  ;;  %v889_v53 = vadd.f32 %v4387_v15, %v866_v28  ;;  %v868_v14 = vmul.f32 %v4384_v20, %v845_v13 }
 0x162   : > { %3330 = vmatmul.mubr.msk.f32.gmra.mxu0 %vm947_vm6, %v894_v23  ;;  %3346 = vmatmul.mubr.msk.f32.gmra.mxu1 %vm947_vm6, %v894_v23  ;;  %v901_v18 = vmax.f32 %v885_v35, 0.0  ;;  %v902_v11 = vmax.f32 %v886_v37, 0.0  ;;  %v890_v60 = vadd.f32 %v4387_v15, %v867_v55  ;;  %v869_v42 = vmul.f32 %v4384_v20, %v846_v39 }
 0x163   : > { %1072 = vmatprep.mubr.f32.mxu0 %v3783_v3  ;;  %1233 = vmatprep.mubr.f32.mxu1 %v3783_v3  ;;  %v903_v44 = vmax.f32 %v887_v24, 0.0  ;;  %v904_v51 = vmax.f32 %v888_v12, 0.0  ;;  %v905_v34 = vmax.f32 %v889_v53, 0.0  ;;  %v891_v0 = vadd.f32 %v4387_v15, %v868_v14 }
 0x164   : > { %v906_v61 = vmax.f32 %v890_v60, 0.0  ;;  %v892_v21 = vadd.f32 %v4387_v15, %v869_v42  ;;  %v4500_v15 = vshrl.u32 %v6797_v46, 7 }
 0x165   : > { %v907_v17 = vmax.f32 %v891_v0, 0.0 }
 0x166   : > { %3331 = vmatmul.mubr.msk.f32.gmra.mxu0 %vm947_vm6, %v895_v49  ;;  %3347 = vmatmul.mubr.msk.f32.gmra.mxu1 %vm947_vm6, %v895_v49  ;;  %v908_v20 = vmax.f32 %v892_v21, 0.0  ;;  %6994 = vst [vmem:[#allocation15_spill] sm:$0xff] %v4500_v15  ;;  %v4503_v1 = vsub.s32 0, %v4500_v15  ;;  %v4506_v2 = vsub.s32 2, %v4500_v15  ;;  %v4515_v16 = vsub.s32 3, %v4500_v15 }
 0x167   : > { %1078 = vmatprep.mubr.f32.mxu0 %v3783_v3  ;;  %1239 = vmatprep.mubr.f32.mxu1 %v3783_v3 }
 0x168   : > { %6995 = vst [vmem:[#allocation16_spill] sm:$0xff] %v4503_v1  ;;  %6996 = vst [vmem:[#allocation17_spill] sm:$0xff] %v4506_v2  ;;  %v4518_v58 = vrot.slane %v925_v22, %v4503_v1  ;;  %v4522_v59 = vrot.slane %v925_v22, %v4506_v2  ;;  %v4528_v23 = vrot.slane %v925_v22, %v4515_v16 }
 0x169   : > { %6998 = vst [vmem:[#allocation19_spill] sm:$0xff] %v4515_v16 }
 0x16a   : > { %3332 = vmatmul.mubr.msk.f32.gmra.mxu0 %vm947_vm6, %v896_v52  ;;  %3348 = vmatmul.mubr.msk.f32.gmra.mxu1 %vm947_vm6, %v896_v52 }
 0x16b   : > { %1084 = vmatprep.mubr.f32.mxu0 %v3783_v3  ;;  %1245 = vmatprep.mubr.f32.mxu1 %v3783_v3 }
 0x16e   : > { %3333 = vmatmul.mubr.msk.f32.gmra.mxu0 %vm947_vm6, %v897_v7  ;;  %3349 = vmatmul.mubr.msk.f32.gmra.mxu1 %vm947_vm6, %v897_v7 }
 0x16f   : > { %1090 = vmatprep.mubr.f32.mxu0 %v3783_v3  ;;  %1251 = vmatprep.mubr.f32.mxu1 %v3783_v3 }
 0x172   : > { %3334 = vmatmul.mubr.msk.f32.gmra.mxu0 %vm947_vm6, %v898_v8  ;;  %3350 = vmatmul.mubr.msk.f32.gmra.mxu1 %vm947_vm6, %v898_v8 }
 0x173   : > { %1096 = vmatprep.mubr.f32.mxu0 %v3783_v3  ;;  %1257 = vmatprep.mubr.f32.mxu1 %v3783_v3 }
 0x176   : > { %3335 = vmatmul.mubr.msk.f32.gmra.mxu0 %vm947_vm6, %v899_v31  ;;  %3351 = vmatmul.mubr.msk.f32.gmra.mxu1 %vm947_vm6, %v899_v31 }
 0x177   : > { %1102 = vmatprep.mubr.f32.mxu0 %v3783_v3  ;;  %1263 = vmatprep.mubr.f32.mxu1 %v3783_v3 }
 0x17a   : > { %3336 = vmatmul.mubr.msk.f32.gmra.mxu0 %vm947_vm6, %v900_v33  ;;  %3352 = vmatmul.mubr.msk.f32.gmra.mxu1 %vm947_vm6, %v900_v33 }
 0x17b   : > { %1108 = vmatprep.mubr.f32.mxu0 %v3783_v3  ;;  %1269 = vmatprep.mubr.f32.mxu1 %v3783_v3 }
 0x17e   : > { %3337 = vmatmul.mubr.msk.f32.gmra.mxu0 %vm947_vm6, %v901_v18  ;;  %3353 = vmatmul.mubr.msk.f32.gmra.mxu1 %vm947_vm6, %v901_v18 }
 0x17f   : > { %1114 = vmatprep.mubr.f32.mxu0 %v3783_v3  ;;  %1275 = vmatprep.mubr.f32.mxu1 %v3783_v3 }
 0x182   : > { %3338 = vmatmul.mubr.msk.f32.gmra.mxu0 %vm947_vm6, %v902_v11  ;;  %3354 = vmatmul.mubr.msk.f32.gmra.mxu1 %vm947_vm6, %v902_v11 }
 0x183   : > { %1120 = vmatprep.mubr.f32.mxu0 %v3783_v3  ;;  %1281 = vmatprep.mubr.f32.mxu1 %v3783_v3 }
 0x186   : > { %3339 = vmatmul.mubr.msk.f32.gmra.mxu0 %vm947_vm6, %v903_v44  ;;  %3355 = vmatmul.mubr.msk.f32.gmra.mxu1 %vm947_vm6, %v903_v44 }
 0x187   : > { %1126 = vmatprep.mubr.f32.mxu0 %v3783_v3  ;;  %1287 = vmatprep.mubr.f32.mxu1 %v3783_v3 }
 0x18a   : > { %3340 = vmatmul.mubr.msk.f32.gmra.mxu0 %vm947_vm6, %v904_v51  ;;  %3356 = vmatmul.mubr.msk.f32.gmra.mxu1 %vm947_vm6, %v904_v51 }
 0x18b   : > { %1132 = vmatprep.mubr.f32.mxu0 %v3783_v3  ;;  %1293 = vmatprep.mubr.f32.mxu1 %v3783_v3 }
 0x18e   : > { %3341 = vmatmul.mubr.msk.f32.gmra.mxu0 %vm947_vm6, %v905_v34  ;;  %3357 = vmatmul.mubr.msk.f32.gmra.mxu1 %vm947_vm6, %v905_v34 }
 0x18f   : > { %1138 = vmatprep.mubr.f32.mxu0 %v3783_v3  ;;  %1299 = vmatprep.mubr.f32.mxu1 %v3783_v3 }
 0x192   : > { %3342 = vmatmul.mubr.msk.f32.gmra.mxu0 %vm947_vm6, %v906_v61  ;;  %3358 = vmatmul.mubr.msk.f32.gmra.mxu1 %vm947_vm6, %v906_v61 }
 0x193   : > { %1144 = vmatprep.mubr.f32.mxu0 %v3783_v3  ;;  %1305 = vmatprep.mubr.f32.mxu1 %v3783_v3 }
 0x196   : > { %3343 = vmatmul.mubr.msk.f32.gmra.mxu0 %vm947_vm6, %v907_v17  ;;  %3359 = vmatmul.mubr.msk.f32.gmra.mxu1 %vm947_vm6, %v907_v17 }
 0x197   : > { %1150 = vmatprep.mubr.f32.mxu0 %v3783_v3  ;;  %1311 = vmatprep.mubr.f32.mxu1 %v3783_v3  ;;  %v4512_v3 = vsub.s32 1, %v4500_v15 }
 0x199   : > { %6997 = vst [vmem:[#allocation18_spill] sm:$0xff] %v4512_v3  ;;  %v4525_v4 = vrot.slane %v925_v22, %v4512_v3 }
 0x19a   : > { %3344 = vmatmul.mubr.msk.f32.gmra.mxu0 %vm947_vm6, %v908_v20  ;;  %3360 = vmatmul.mubr.msk.f32.gmra.mxu1 %vm947_vm6, %v908_v20 }
 0x21e   : > { %v1062_v63 = vpop.f32.mrf.mxu0  ;;  %v1223_v5 = vpop.f32.mrf.mxu1 }
 0x21f   : > { %v4531_v47 = vadd.f32 %v1062_v63, %v4518_v58  ;;  %v4534_v49 = vadd.f32 %v1223_v5, %v4522_v59 }
 0x220   : > { %v1064_v50 = vpop.f32.mrf.mxu0  ;;  %v1225_v56 = vpop.f32.mrf.mxu1 }
 0x221   : > { %6999 = vst [vmem:[#allocation20_spill] sm:$0xff] %v4531_v47  ;;  %7000 = vst [vmem:[#allocation21_spill] sm:$0xff] %v4534_v49  ;;  %v4543_v6 = vadd.f32 %v1064_v50, %v4525_v4  ;;  %v4546_v52 = vadd.f32 %v1225_v56, %v4528_v23 }
 0x222   : > { %1321 = vst [vmem:[%s4536_s29] sm:$0xff] %v4531_v47  ;;  %1323 = vst [vmem:[%s4536_s29 + $0x10] sm:$0xff] %v4534_v49  ;;  %v1068_v19 = vpop.f32.mrf.mxu0  ;;  %v1229_v45 = vpop.f32.mrf.mxu1 }
 0x223   : > { %7001 = vst [vmem:[#allocation22_spill] sm:$0xff] %v4543_v6  ;;  %7002 = vst [vmem:[#allocation23_spill] sm:$0xff] %v4546_v52  ;;  %v4553_v25 = vadd.f32 %v1068_v19, %v4518_v58  ;;  %v4556_v7 = vadd.f32 %v1229_v45, %v4522_v59 }
 0x224   : > { %1322 = vst [vmem:[%s4536_s29 + $0x8] sm:$0xff] %v4543_v6  ;;  %1324 = vst [vmem:[%s4536_s29 + $0x18] sm:$0xff] %v4546_v52  ;;  %v1070_v54 = vpop.f32.mrf.mxu0  ;;  %v1231_v26 = vpop.f32.mrf.mxu1 }
 0x225   : > { %7003 = vst [vmem:[#allocation24_spill] sm:$0xff] %v4553_v25  ;;  %7004 = vst [vmem:[#allocation25_spill] sm:$0xff] %v4556_v7  ;;  %v4563_v27 = vadd.f32 %v1070_v54, %v4525_v4  ;;  %v4566_v8 = vadd.f32 %v1231_v26, %v4528_v23 }
 0x226   : > { %1325 = vst [vmem:[%s4536_s29 + $0x20] sm:$0xff] %v4553_v25  ;;  %1327 = vst [vmem:[%s4536_s29 + $0x30] sm:$0xff] %v4556_v7  ;;  %v1074_v57 = vpop.f32.mrf.mxu0  ;;  %v1235_v29 = vpop.f32.mrf.mxu1 }
 0x227   : > { %7005 = vst [vmem:[#allocation26_spill] sm:$0xff] %v4563_v27  ;;  %7006 = vst [vmem:[#allocation27_spill] sm:$0xff] %v4566_v8  ;;  %v4573_v30 = vadd.f32 %v1074_v57, %v4518_v58  ;;  %v4576_v31 = vadd.f32 %v1235_v29, %v4522_v59 }
 0x228   : > { %1326 = vst [vmem:[%s4536_s29 + $0x28] sm:$0xff] %v4563_v27  ;;  %1328 = vst [vmem:[%s4536_s29 + $0x38] sm:$0xff] %v4566_v8  ;;  %v1076_v32 = vpop.f32.mrf.mxu0  ;;  %v1237_v9 = vpop.f32.mrf.mxu1 }
 0x229   : > { %7007 = vst [vmem:[#allocation28_spill] sm:$0xff] %v4573_v30  ;;  %7008 = vst [vmem:[#allocation29_spill] sm:$0xff] %v4576_v31  ;;  %v4583_v62 = vadd.f32 %v1076_v32, %v4525_v4  ;;  %v4586_v33 = vadd.f32 %v1237_v9, %v4528_v23 }
 0x22a   : > { %1329 = vst [vmem:[%s4536_s29 + $0x40] sm:$0xff] %v4573_v30  ;;  %1331 = vst [vmem:[%s4536_s29 + $0x50] sm:$0xff] %v4576_v31  ;;  %v1080_v35 = vpop.f32.mrf.mxu0  ;;  %v1241_v36 = vpop.f32.mrf.mxu1 }
 0x22b   : > { %7009 = vst [vmem:[#allocation30_spill] sm:$0xff] %v4583_v62  ;;  %7010 = vst [vmem:[#allocation31_spill] sm:$0xff] %v4586_v33  ;;  %v4593_v10 = vadd.f32 %v1080_v35, %v4518_v58  ;;  %v4596_v18 = vadd.f32 %v1241_v36, %v4522_v59 }
 0x22c   : > { %1330 = vst [vmem:[%s4536_s29 + $0x48] sm:$0xff] %v4583_v62  ;;  %1332 = vst [vmem:[%s4536_s29 + $0x58] sm:$0xff] %v4586_v33  ;;  %v1082_v37 = vpop.f32.mrf.mxu0  ;;  %v1243_v38 = vpop.f32.mrf.mxu1 }
 0x22d   : > { %7011 = vst [vmem:[#allocation32_spill] sm:$0xff] %v4593_v10  ;;  %7012 = vst [vmem:[#allocation33_spill] sm:$0xff] %v4596_v18  ;;  %v4603_v40 = vadd.f32 %v1082_v37, %v4525_v4  ;;  %v4606_v11 = vadd.f32 %v1243_v38, %v4528_v23 }
 0x22e   : > { %1333 = vst [vmem:[%s4536_s29 + $0x60] sm:$0xff] %v4593_v10  ;;  %1335 = vst [vmem:[%s4536_s29 + $0x70] sm:$0xff] %v4596_v18  ;;  %v1086_v24 = vpop.f32.mrf.mxu0  ;;  %v1247_v41 = vpop.f32.mrf.mxu1 }
 0x22f   : > { %7013 = vst [vmem:[#allocation34_spill] sm:$0xff] %v4603_v40  ;;  %7014 = vst [vmem:[#allocation35_spill] sm:$0xff] %v4606_v11  ;;  %v4613_v43 = vadd.f32 %v1086_v24, %v4518_v58  ;;  %v4616_v44 = vadd.f32 %v1247_v41, %v4522_v59 }
 0x230   : > { %1334 = vst [vmem:[%s4536_s29 + $0x68] sm:$0xff] %v4603_v40  ;;  %1336 = vst [vmem:[%s4536_s29 + $0x78] sm:$0xff] %v4606_v11  ;;  %v1088_v12 = vpop.f32.mrf.mxu0  ;;  %v1249_v28 = vpop.f32.mrf.mxu1 }
 0x231   : > { %7015 = vst [vmem:[#allocation36_spill] sm:$0xff] %v4613_v43  ;;  %7016 = vst [vmem:[#allocation37_spill] sm:$0xff] %v4616_v44  ;;  %v4623_v48 = vadd.f32 %v1088_v12, %v4525_v4  ;;  %v4626_v51 = vadd.f32 %v1249_v28, %v4528_v23 }
 0x232   : > { %1337 = vst [vmem:[%s4536_s29 + $0x80] sm:$0xff] %v4613_v43  ;;  %1339 = vst [vmem:[%s4536_s29 + $0x90] sm:$0xff] %v4616_v44  ;;  %v1092_v53 = vpop.f32.mrf.mxu0  ;;  %v1253_v55 = vpop.f32.mrf.mxu1 }
 0x233   : > { %7017 = vst [vmem:[#allocation38_spill] sm:$0xff] %v4623_v48  ;;  %7018 = vst [vmem:[#allocation39_spill] sm:$0xff] %v4626_v51  ;;  %v4633_v13 = vadd.f32 %v1092_v53, %v4518_v58  ;;  %v4636_v34 = vadd.f32 %v1253_v55, %v4522_v59 }
 0x234   : > { %1338 = vst [vmem:[%s4536_s29 + $0x88] sm:$0xff] %v4623_v48  ;;  %1340 = vst [vmem:[%s4536_s29 + $0x98] sm:$0xff] %v4626_v51  ;;  %v1094_v60 = vpop.f32.mrf.mxu0  ;;  %v1255_v14 = vpop.f32.mrf.mxu1 }
 0x235   : > { %7019 = vst [vmem:[#allocation40_spill] sm:$0xff] %v4633_v13  ;;  %7020 = vst [vmem:[#allocation41_spill] sm:$0xff] %v4636_v34  ;;  %v4643_v39 = vadd.f32 %v1094_v60, %v4525_v4  ;;  %v4646_v61 = vadd.f32 %v1255_v14, %v4528_v23 }
 0x236   : > { %1341 = vst [vmem:[%s4536_s29 + $0xa0] sm:$0xff] %v4633_v13  ;;  %1343 = vst [vmem:[%s4536_s29 + $0xb0] sm:$0xff] %v4636_v34  ;;  %v1098_v0 = vpop.f32.mrf.mxu0  ;;  %v1259_v42 = vpop.f32.mrf.mxu1 }
 0x237   : > { %7021 = vst [vmem:[#allocation42_spill] sm:$0xff] %v4643_v39  ;;  %7022 = vst [vmem:[#allocation43_spill] sm:$0xff] %v4646_v61  ;;  %v4653_v17 = vadd.f32 %v1098_v0, %v4518_v58  ;;  %v4656_v21 = vadd.f32 %v1259_v42, %v4522_v59 }
 0x238   : > { %1342 = vst [vmem:[%s4536_s29 + $0xa8] sm:$0xff] %v4643_v39  ;;  %1344 = vst [vmem:[%s4536_s29 + $0xb8] sm:$0xff] %v4646_v61  ;;  %v1100_v20 = vpop.f32.mrf.mxu0  ;;  %v1261_v22 = vpop.f32.mrf.mxu1 }
 0x239   : > { %7023 = vst [vmem:[#allocation44_spill] sm:$0xff] %v4653_v17  ;;  %7024 = vst [vmem:[#allocation45_spill] sm:$0xff] %v4656_v21  ;;  %v4663_v63 = vadd.f32 %v1100_v20, %v4525_v4  ;;  %v4666_v5 = vadd.f32 %v1261_v22, %v4528_v23 }
 0x23a   : > { %1345 = vst [vmem:[%s4536_s29 + $0xc0] sm:$0xff] %v4653_v17  ;;  %1347 = vst [vmem:[%s4536_s29 + $0xd0] sm:$0xff] %v4656_v21  ;;  %v1104_v50 = vpop.f32.mrf.mxu0  ;;  %v1265_v56 = vpop.f32.mrf.mxu1 }
 0x23b   : > { %7025 = vst [vmem:[#allocation46_spill] sm:$0xff] %v4663_v63  ;;  %7026 = vst [vmem:[#allocation47_spill] sm:$0xff] %v4666_v5  ;;  %v4673_v19 = vadd.f32 %v1104_v50, %v4518_v58  ;;  %v4676_v45 = vadd.f32 %v1265_v56, %v4522_v59 }
 0x23c   : > { %1346 = vst [vmem:[%s4536_s29 + $0xc8] sm:$0xff] %v4663_v63  ;;  %1348 = vst [vmem:[%s4536_s29 + $0xd8] sm:$0xff] %v4666_v5  ;;  %v1106_v54 = vpop.f32.mrf.mxu0  ;;  %v1267_v26 = vpop.f32.mrf.mxu1 }
 0x23d   : > { %7027 = vst [vmem:[#allocation48_spill] sm:$0xff] %v4673_v19  ;;  %7028 = vst [vmem:[#allocation49_spill] sm:$0xff] %v4676_v45  ;;  %v4683_v57 = vadd.f32 %v1106_v54, %v4525_v4  ;;  %v4686_v29 = vadd.f32 %v1267_v26, %v4528_v23 }
 0x23e   : > { %1349 = vst [vmem:[%s4536_s29 + $0xe0] sm:$0xff] %v4673_v19  ;;  %1351 = vst [vmem:[%s4536_s29 + $0xf0] sm:$0xff] %v4676_v45  ;;  %v1110_v32 = vpop.f32.mrf.mxu0  ;;  %v1271_v9 = vpop.f32.mrf.mxu1 }
 0x23f   : > { %7029 = vst [vmem:[#allocation50_spill] sm:$0xff] %v4683_v57  ;;  %7030 = vst [vmem:[#allocation51_spill] sm:$0xff] %v4686_v29  ;;  %v4693_v35 = vadd.f32 %v1110_v32, %v4518_v58  ;;  %v4696_v36 = vadd.f32 %v1271_v9, %v4522_v59 }
 0x240   : > { %1350 = vst [vmem:[%s4536_s29 + $0xe8] sm:$0xff] %v4683_v57  ;;  %1352 = vst [vmem:[%s4536_s29 + $0xf8] sm:$0xff] %v4686_v29  ;;  %v1112_v37 = vpop.f32.mrf.mxu0  ;;  %v1273_v38 = vpop.f32.mrf.mxu1 }
 0x241   : > { %7031 = vst [vmem:[#allocation52_spill] sm:$0xff] %v4693_v35  ;;  %7032 = vst [vmem:[#allocation53_spill] sm:$0xff] %v4696_v36  ;;  %v4703_v24 = vadd.f32 %v1112_v37, %v4525_v4  ;;  %v4706_v41 = vadd.f32 %v1273_v38, %v4528_v23 }
 0x242   : > { %1353 = vst [vmem:[%s4536_s29 + $0x100] sm:$0xff] %v4693_v35  ;;  %1355 = vst [vmem:[%s4536_s29 + $0x110] sm:$0xff] %v4696_v36  ;;  %v1116_v12 = vpop.f32.mrf.mxu0  ;;  %v1277_v28 = vpop.f32.mrf.mxu1 }
 0x243   : > { %7033 = vst [vmem:[#allocation54_spill] sm:$0xff] %v4703_v24  ;;  %7034 = vst [vmem:[#allocation55_spill] sm:$0xff] %v4706_v41  ;;  %v4713_v53 = vadd.f32 %v1116_v12, %v4518_v58  ;;  %v4716_v55 = vadd.f32 %v1277_v28, %v4522_v59 }
 0x244   : > { %1354 = vst [vmem:[%s4536_s29 + $0x108] sm:$0xff] %v4703_v24  ;;  %1356 = vst [vmem:[%s4536_s29 + $0x118] sm:$0xff] %v4706_v41  ;;  %v1118_v60 = vpop.f32.mrf.mxu0  ;;  %v1279_v14 = vpop.f32.mrf.mxu1 }
 0x245   : > { %7035 = vst [vmem:[#allocation56_spill] sm:$0xff] %v4713_v53  ;;  %7036 = vst [vmem:[#allocation57_spill] sm:$0xff] %v4716_v55  ;;  %v4723_v0 = vadd.f32 %v1118_v60, %v4525_v4  ;;  %v4726_v42 = vadd.f32 %v1279_v14, %v4528_v23 }
 0x246   : > { %1357 = vst [vmem:[%s4536_s29 + $0x120] sm:$0xff] %v4713_v53  ;;  %1359 = vst [vmem:[%s4536_s29 + $0x130] sm:$0xff] %v4716_v55  ;;  %v1122_v20 = vpop.f32.mrf.mxu0  ;;  %v1283_v22 = vpop.f32.mrf.mxu1 }
 0x247   : > { %7037 = vst [vmem:[#allocation58_spill] sm:$0xff] %v4723_v0  ;;  %7038 = vst [vmem:[#allocation59_spill] sm:$0xff] %v4726_v42  ;;  %v4733_v50 = vadd.f32 %v1122_v20, %v4518_v58  ;;  %v4736_v56 = vadd.f32 %v1283_v22, %v4522_v59 }
 0x248   : > { %1358 = vst [vmem:[%s4536_s29 + $0x128] sm:$0xff] %v4723_v0  ;;  %1360 = vst [vmem:[%s4536_s29 + $0x138] sm:$0xff] %v4726_v42  ;;  %v1124_v54 = vpop.f32.mrf.mxu0  ;;  %v1285_v26 = vpop.f32.mrf.mxu1 }
 0x249   : > { %7039 = vst [vmem:[#allocation60_spill] sm:$0xff] %v4733_v50  ;;  %7040 = vst [vmem:[#allocation61_spill] sm:$0xff] %v4736_v56  ;;  %v4743_v32 = vadd.f32 %v1124_v54, %v4525_v4  ;;  %v4746_v9 = vadd.f32 %v1285_v26, %v4528_v23 }
 0x24a   : > { %1361 = vst [vmem:[%s4536_s29 + $0x140] sm:$0xff] %v4733_v50  ;;  %1363 = vst [vmem:[%s4536_s29 + $0x150] sm:$0xff] %v4736_v56  ;;  %v1128_v37 = vpop.f32.mrf.mxu0  ;;  %v1289_v38 = vpop.f32.mrf.mxu1 }
 0x24b   : > { %7041 = vst [vmem:[#allocation62_spill] sm:$0xff] %v4743_v32  ;;  %7042 = vst [vmem:[#allocation63_spill] sm:$0xff] %v4746_v9  ;;  %v4753_v12 = vadd.f32 %v1128_v37, %v4518_v58  ;;  %v4756_v28 = vadd.f32 %v1289_v38, %v4522_v59 }
 0x24c   : > { %1362 = vst [vmem:[%s4536_s29 + $0x148] sm:$0xff] %v4743_v32  ;;  %1364 = vst [vmem:[%s4536_s29 + $0x158] sm:$0xff] %v4746_v9  ;;  %v1130_v60 = vpop.f32.mrf.mxu0  ;;  %v1291_v14 = vpop.f32.mrf.mxu1 }
 0x24d   : > { %7043 = vst [vmem:[#allocation64_spill] sm:$0xff] %v4753_v12  ;;  %7044 = vst [vmem:[#allocation65_spill] sm:$0xff] %v4756_v28  ;;  %v4763_v20 = vadd.f32 %v1130_v60, %v4525_v4  ;;  %v4766_v22 = vadd.f32 %v1291_v14, %v4528_v23 }
 0x24e   : > { %1365 = vst [vmem:[%s4536_s29 + $0x160] sm:$0xff] %v4753_v12  ;;  %1367 = vst [vmem:[%s4536_s29 + $0x170] sm:$0xff] %v4756_v28  ;;  %v1134_v54 = vpop.f32.mrf.mxu0  ;;  %v1295_v26 = vpop.f32.mrf.mxu1 }
 0x24f   : > { %7045 = vst [vmem:[#allocation66_spill] sm:$0xff] %v4763_v20  ;;  %7046 = vst [vmem:[#allocation67_spill] sm:$0xff] %v4766_v22  ;;  %v4773_v37 = vadd.f32 %v1134_v54, %v4518_v58  ;;  %v4776_v38 = vadd.f32 %v1295_v26, %v4522_v59 }
 0x250   : > { %1366 = vst [vmem:[%s4536_s29 + $0x168] sm:$0xff] %v4763_v20  ;;  %1368 = vst [vmem:[%s4536_s29 + $0x178] sm:$0xff] %v4766_v22  ;;  %v1136_v60 = vpop.f32.mrf.mxu0  ;;  %v1297_v46 = vpop.f32.mrf.mxu1 }
 0x251   : > { %7047 = vst [vmem:[#allocation68_spill] sm:$0xff] %v4773_v37  ;;  %7048 = vst [vmem:[#allocation69_spill] sm:$0xff] %v4776_v38  ;;  %v4783_v14 = vadd.f32 %v1136_v60, %v4525_v4  ;;  %v4786_v15 = vadd.f32 %v1297_v46, %v4528_v23 }
 0x252   : > { %1369 = vst [vmem:[%s4536_s29 + $0x180] sm:$0xff] %v4773_v37  ;;  %1371 = vst [vmem:[%s4536_s29 + $0x190] sm:$0xff] %v4776_v38  ;;  %v1140_v54 = vpop.f32.mrf.mxu0  ;;  %v1301_v16 = vpop.f32.mrf.mxu1 }
 0x253   : > { %7049 = vst [vmem:[#allocation70_spill] sm:$0xff] %v4783_v14  ;;  %7050 = vst [vmem:[#allocation71_spill] sm:$0xff] %v4786_v15  ;;  %v4793_v26 = vadd.f32 %v1140_v54, %v4518_v58  ;;  %v4796_v2 = vadd.f32 %v1301_v16, %v4522_v59 }
 0x254   : > { %1370 = vst [vmem:[%s4536_s29 + $0x188] sm:$0xff] %v4783_v14  ;;  %1372 = vst [vmem:[%s4536_s29 + $0x198] sm:$0xff] %v4786_v15  ;;  %v1142_v60 = vpop.f32.mrf.mxu0  ;;  %v1303_v3 = vpop.f32.mrf.mxu1 }
 0x255   : > { %7051 = vst [vmem:[#allocation72_spill] sm:$0xff] %v4793_v26  ;;  %7052 = vst [vmem:[#allocation73_spill] sm:$0xff] %v4796_v2  ;;  %v4803_v46 = vadd.f32 %v1142_v60, %v4525_v4  ;;  %v4806_v1 = vadd.f32 %v1303_v3, %v4528_v23 }
 0x256   : > { %1373 = vst [vmem:[%s4536_s29 + $0x1a0] sm:$0xff] %v4793_v26  ;;  %1375 = vst [vmem:[%s4536_s29 + $0x1b0] sm:$0xff] %v4796_v2  ;;  %v1146_v54 = vpop.f32.mrf.mxu0  ;;  %v1307_v15 = vpop.f32.mrf.mxu1 }
 0x257   : > { %7053 = vst [vmem:[#allocation74_spill] sm:$0xff] %v4803_v46  ;;  %7054 = vst [vmem:[#allocation75_spill] sm:$0xff] %v4806_v1  ;;  %v4813_v16 = vadd.f32 %v1146_v54, %v4518_v58  ;;  %v4816_v2 = vadd.f32 %v1307_v15, %v4522_v59 }
 0x258   : > { %1374 = vst [vmem:[%s4536_s29 + $0x1a8] sm:$0xff] %v4803_v46  ;;  %1376 = vst [vmem:[%s4536_s29 + $0x1b8] sm:$0xff] %v4806_v1  ;;  %v1148_v60 = vpop.f32.mrf.mxu0  ;;  %v1309_v26 = vpop.f32.mrf.mxu1 }
 0x259   : > { %7055 = vst [vmem:[#allocation76_spill] sm:$0xff] %v4813_v16  ;;  %7056 = vst [vmem:[#allocation77_spill] sm:$0xff] %v4816_v2  ;;  %v4823_v3 = vadd.f32 %v1148_v60, %v4525_v4  ;;  %v4826_v1 = vadd.f32 %v1309_v26, %v4528_v23 }
 0x25a   : > { %1377 = vst [vmem:[%s4536_s29 + $0x1c0] sm:$0xff] %v4813_v16  ;;  %1379 = vst [vmem:[%s4536_s29 + $0x1d0] sm:$0xff] %v4816_v2  ;;  %v1152_v54 = vpop.f32.mrf.mxu0  ;;  %v1313_v46 = vpop.f32.mrf.mxu1 }
 0x25b   : > { %7057 = vst [vmem:[#allocation78_spill] sm:$0xff] %v4823_v3  ;;  %7058 = vst [vmem:[#allocation79_spill] sm:$0xff] %v4826_v1  ;;  %v4833_v15 = vadd.f32 %v1152_v54, %v4518_v58  ;;  %v4836_v16 = vadd.f32 %v1313_v46, %v4522_v59 }
 0x25c   : > { %1378 = vst [vmem:[%s4536_s29 + $0x1c8] sm:$0xff] %v4823_v3  ;;  %1380 = vst [vmem:[%s4536_s29 + $0x1d8] sm:$0xff] %v4826_v1  ;;  %v1154_v2 = vpop.f32.mrf.mxu0  ;;  %v1315_v38 = vpop.f32.mrf.mxu1  ;;  %1388 = sbr.rel (%p3363_p6) target bundleno = 738 (0x2e2), region = 88 }
 0x25d   : > { %7059 = vst [vmem:[#allocation80_spill] sm:$0xff] %v4833_v15  ;;  %7060 = vst [vmem:[#allocation81_spill] sm:$0xff] %v4836_v16  ;;  %v4843_v26 = vadd.f32 %v1154_v2, %v4525_v4  ;;  %v4846_v60 = vadd.f32 %v1315_v38, %v4528_v23 }
 0x25e   : > { %1381 = vst [vmem:[%s4536_s29 + $0x1e0] sm:$0xff] %v4833_v15  ;;  %1383 = vst [vmem:[%s4536_s29 + $0x1f0] sm:$0xff] %v4836_v16 }
 0x25f   : > { %7061 = vst [vmem:[#allocation82_spill] sm:$0xff] %v4843_v26  ;;  %7062 = vst [vmem:[#allocation83_spill] sm:$0xff] %v4846_v60 }
 0x260   : > { %1382 = vst [vmem:[%s4536_s29 + $0x1e8] sm:$0xff] %v4843_v26  ;;  %1384 = vst [vmem:[%s4536_s29 + $0x1f8] sm:$0xff] %v4846_v60 }
 0x261   : > { %v1389_v58 = vadd.f32 %v4553_v25, %v4531_v47  ;;  %v1410_v59 = vadd.f32 %v4563_v27, %v4543_v6  ;;  %v1431_v2 = vadd.f32 %v4556_v7, %v4534_v49  ;;  %v1452_v4 = vadd.f32 %v4566_v8, %v4546_v52  ;;  %s3364_s18 = sshll.u32 %s3760_s12, 7 }
 0x262   : > { %s4862_s19 = scvt.s32.f32 %s3364_s18 }
 0x263   : > { %v1390_v23 = vadd.f32 %v1389_v58, %v4573_v30  ;;  %v1411_v38 = vadd.f32 %v1410_v59, %v4583_v62  ;;  %v1432_v46 = vadd.f32 %v1431_v2, %v4576_v31  ;;  %v1453_v54 = vadd.f32 %v1452_v4, %v4586_v33 }
 0x264   : > { %s1691_s17 = sadd.f32 128.0, %s4862_s19  ;;  %s1797_s22 = smul.f32 128.0, %s4862_s19 }
 0x265   : > { %v1391_v27 = vadd.f32 %v1390_v23, %v4593_v10  ;;  %v1412_v7 = vadd.f32 %v1411_v38, %v4603_v40  ;;  %v1433_v25 = vadd.f32 %v1432_v46, %v4596_v18  ;;  %v1454_v8 = vadd.f32 %v1453_v54, %v4606_v11 }
 0x266   : > { %v1718_v52 = vstv %s1691_s17 }
 0x267   : > { %v1392_v49 = vadd.f32 %v1391_v27, %v4613_v43  ;;  %v1413_v58 = vadd.f32 %v1412_v7, %v4623_v48  ;;  %v1434_v59 = vadd.f32 %v1433_v25, %v4616_v44  ;;  %v1455_v2 = vadd.f32 %v1454_v8, %v4626_v51 }
 0x268   : > { %3646 = vrcp.f32 %v1718_v52 }
 0x269   : > { %v1393_v4 = vadd.f32 %v1392_v49, %v4633_v13  ;;  %v1414_v23 = vadd.f32 %v1413_v58, %v4643_v39  ;;  %v1435_v38 = vadd.f32 %v1434_v59, %v4636_v34  ;;  %v1456_v46 = vadd.f32 %v1455_v2, %v4646_v61 }
 0x26b   : > { %v1394_v54 = vadd.f32 %v1393_v4, %v4653_v17  ;;  %v1415_v11 = vadd.f32 %v1414_v23, %v4663_v63  ;;  %v1436_v27 = vadd.f32 %v1435_v38, %v4656_v21  ;;  %v1457_v7 = vadd.f32 %v1456_v46, %v4666_v5 }
 0x26d   : > { %v1395_v25 = vadd.f32 %v1394_v54, %v4673_v19  ;;  %v1416_v52 = vadd.f32 %v1415_v11, %v4683_v57  ;;  %v1437_v49 = vadd.f32 %v1436_v27, %v4676_v45  ;;  %v1458_v8 = vadd.f32 %v1457_v7, %v4686_v29 }
 0x26f   : > { %v1396_v58 = vadd.f32 %v1395_v25, %v4693_v35  ;;  %v1417_v59 = vadd.f32 %v1416_v52, %v4703_v24  ;;  %v1438_v2 = vadd.f32 %v1437_v49, %v4696_v36  ;;  %v1459_v4 = vadd.f32 %v1458_v8, %v4706_v41 }
 0x271   : > { %v1397_v23 = vadd.f32 %v1396_v58, %v4713_v53  ;;  %v1418_v38 = vadd.f32 %v1417_v59, %v4723_v0  ;;  %v1439_v46 = vadd.f32 %v1438_v2, %v4716_v55  ;;  %v1460_v11 = vadd.f32 %v1459_v4, %v4726_v42 }
 0x273   : > { %v1398_v54 = vadd.f32 %v1397_v23, %v4733_v50  ;;  %v1419_v27 = vadd.f32 %v1418_v38, %v4743_v32  ;;  %v1440_v7 = vadd.f32 %v1439_v46, %v4736_v56  ;;  %v1461_v25 = vadd.f32 %v1460_v11, %v4746_v9  ;;  %v7063_v23 = vld [vmem:[#allocation69_spill] sm:$0xff]  ;;  %v7064_v32 = vld [vmem:[#allocation71_spill] sm:$0xff]  ;;  %v7065_v56 = vld [vmem:[#allocation72_spill] sm:$0xff] }
 0x274   : > { %v7066_v9 = vld [vmem:[#allocation74_spill] sm:$0xff] }
 0x275   : > { %v3647_v52 = vpop.eup %3646  ;;  %v1399_v49 = vadd.f32 %v1398_v54, %v4753_v12  ;;  %v1420_v8 = vadd.f32 %v1419_v27, %v4763_v20  ;;  %v1441_v58 = vadd.f32 %v1440_v7, %v4756_v28  ;;  %v1462_v59 = vadd.f32 %v1461_v25, %v4766_v22  ;;  %v7067_v54 = vld [vmem:[#allocation73_spill] sm:$0xff]  ;;  %v7068_v27 = vld [vmem:[#allocation75_spill] sm:$0xff]  ;;  %v7069_v7 = vld [vmem:[#allocation76_spill] sm:$0xff] }
 0x276   : > { %3543 = vpush %v3647_v52  ;;  %v7070_v52 = vld [vmem:[#allocation77_spill] sm:$0xff] }
 0x277   : > { %v1400_v2 = vadd.f32 %v1399_v49, %v4773_v37  ;;  %v1421_v4 = vadd.f32 %v1420_v8, %v4783_v14  ;;  %v1442_v38 = vadd.f32 %v1441_v58, %v7063_v23  ;;  %v1463_v46 = vadd.f32 %v1462_v59, %v7064_v32 }
 0x279   : > { %v1401_v11 = vadd.f32 %v1400_v2, %v7065_v56  ;;  %v1422_v50 = vadd.f32 %v1421_v4, %v7066_v9  ;;  %v1443_v12 = vadd.f32 %v1442_v38, %v7067_v54  ;;  %v1464_v20 = vadd.f32 %v1463_v46, %v7068_v27 }
 0x27b   : > { %v1402_v28 = vadd.f32 %v1401_v11, %v7069_v7  ;;  %v1423_v25 = vadd.f32 %v1422_v50, %v4823_v3  ;;  %v1444_v49 = vadd.f32 %v1443_v12, %v7070_v52  ;;  %v1465_v8 = vadd.f32 %v1464_v20, %v4826_v1 }
 0x27d   : > { %v1403_v58 = vadd.f32 %v1402_v28, %v4833_v15  ;;  %v1424_v59 = vadd.f32 %v1423_v25, %v4843_v26  ;;  %v1445_v2 = vadd.f32 %v1444_v49, %v4836_v16  ;;  %v1466_v4 = vadd.f32 %v1465_v8, %v4846_v60 }
 0x27e   : > { %v3784_v60 = vmov 1966171168  }
 0x27f   : > { %v1404_v9 = vrot.slane %v1403_v58, 4  ;;  %v1425_v38 = vrot.slane %v1424_v59, 4  ;;  %v1446_v54 = vrot.slane %v1445_v2, 4  ;;  %v1467_v46 = vrot.slane %v1466_v4, 4 }
 0x280   : > { %v1734_v56 = vunpack.c.l.s4 %v3784_v60 }
 0x281   : > { %v1405_v27 = vadd.f32 %v1404_v9, %v1403_v58  ;;  %v1426_v11 = vadd.f32 %v1425_v38, %v1424_v59  ;;  %v1447_v7 = vadd.f32 %v1446_v54, %v1445_v2  ;;  %v1468_v50 = vadd.f32 %v1467_v46, %v1466_v4  ;;  %v4921_v54 = vld [vmem:[#allocation4] sm:$0xf] }
 0x282   : > { %v1735_v59 = vunpack.c.0.s8 %v1734_v56  ;;  %v7072_v38 = vld [vmem:[#allocation18_spill] sm:$0xff] }
 0x283   : > { %v1406_v3 = vrot.slane %v1405_v27, 2  ;;  %v1427_v12 = vrot.slane %v1426_v11, 2  ;;  %v1448_v52 = vrot.slane %v1447_v7, 2  ;;  %v1469_v20 = vrot.slane %v1468_v50, 2 }
 0x285   : > { %v1407_v1 = vadd.f32 %v1406_v3, %v1405_v27  ;;  %v1428_v28 = vadd.f32 %v1427_v12, %v1426_v11  ;;  %v1449_v15 = vadd.f32 %v1448_v52, %v1447_v7  ;;  %v1470_v25 = vadd.f32 %v1469_v20, %v1468_v50  ;;  %v7071_v7 = vld [vmem:[#allocation16_spill] sm:$0xff]  ;;  %v7076_v11 = vld [vmem:[#allocation21_spill] sm:$0xff]  ;;  %v7077_v12 = vld [vmem:[#allocation23_spill] sm:$0xff] }
 0x287   : > { %v1408_v26 = vrot.slane %v1407_v1, 1  ;;  %v1429_v49 = vrot.slane %v1428_v28, 1  ;;  %v1450_v16 = vrot.slane %v1449_v15, 1  ;;  %v1471_v8 = vrot.slane %v1470_v25, 1 }
 0x289   : > { %v1409_v32 = vadd.f32 %v1408_v26, %v1407_v1  ;;  %v1430_v23 = vadd.f32 %v1429_v49, %v1428_v28  ;;  %v1451_v9 = vadd.f32 %v1450_v16, %v1449_v15  ;;  %v1472_v58 = vadd.f32 %v1471_v8, %v1470_v25  ;;  %v7073_v26 = vld [vmem:[#allocation17_spill] sm:$0xff]  ;;  %v7074_v15 = vld [vmem:[#allocation19_spill] sm:$0xff]  ;;  %v7078_v28 = vld [vmem:[#allocation24_spill] sm:$0xff] }
 0x28a   : > { %v7079_v49 = vld [vmem:[#allocation26_spill] sm:$0xff]  ;;  %v7082_v16 = vld [vmem:[#allocation35_spill] sm:$0xff] }
 0x28b   : > { %v4923_v2 = vmul.f32 0.0078125, %v1409_v32  ;;  %v4925_v4 = vmul.f32 0.0078125, %v1430_v23  ;;  %v4927_v3 = vmul.f32 0.0078125, %v1451_v9  ;;  %v4929_v27 = vmul.f32 0.0078125, %v1472_v58  ;;  %v7075_v32 = vld [vmem:[#allocation15_spill] sm:$0xff]  ;;  %v7080_v9 = vld [vmem:[#allocation25_spill] sm:$0xff] }
 0x28c   : > { %v4940_v60 = vsub.s32 %v1735_v59, %v7075_v32  ;;  %v7081_v59 = vld [vmem:[#allocation27_spill] sm:$0xff] }
 0x28d   : > { %v4944_v23 = vsub.f32 %v4531_v47, %v4923_v2  ;;  %v4948_v46 = vsub.f32 %v4543_v6, %v4925_v4  ;;  %v4952_v50 = vsub.f32 %v7076_v11, %v4927_v3  ;;  %v4956_v20 = vsub.f32 %v7077_v12, %v4929_v27  ;;  %v7088_v6 = vld [vmem:[#allocation64_spill] sm:$0xff]  ;;  %v7090_v47 = vld [vmem:[#allocation66_spill] sm:$0xff] }
 0x28e   : > { %v4960_v25 = vsub.f32 %v7078_v28, %v4923_v2  ;;  %v4964_v8 = vsub.f32 %v7079_v49, %v4925_v4  ;;  %v4968_v58 = vsub.f32 %v7080_v9, %v4927_v3  ;;  %v4972_v32 = vsub.f32 %v7081_v59, %v4929_v27 }
 0x28f   : > { %v4976_v11 = vsub.f32 %v4573_v30, %v4923_v2  ;;  %v4980_v12 = vsub.f32 %v4583_v62, %v4925_v4  ;;  %v4984_v28 = vsub.f32 %v4576_v31, %v4927_v3  ;;  %v4988_v49 = vsub.f32 %v4586_v33, %v4929_v27  ;;  %v7083_v33 = vld [vmem:[#allocation60_spill] sm:$0xff]  ;;  %v7085_v31 = vld [vmem:[#allocation62_spill] sm:$0xff]  ;;  %v7086_v62 = vld [vmem:[#allocation61_spill] sm:$0xff] }
 0x290   : > { %v4992_v9 = vsub.f32 %v4593_v10, %v4923_v2  ;;  %v4996_v59 = vsub.f32 %v4603_v40, %v4925_v4  ;;  %v5000_v56 = vsub.f32 %v4596_v18, %v4927_v3  ;;  %v5004_v1 = vsub.f32 %v7082_v16, %v4929_v27  ;;  %v7087_v30 = vld [vmem:[#allocation63_spill] sm:$0xff] }
 0x291   : > { %v5008_v52 = vsub.f32 %v4613_v43, %v4923_v2  ;;  %v5012_v10 = vsub.f32 %v4623_v48, %v4925_v4  ;;  %v5016_v40 = vsub.f32 %v4616_v44, %v4927_v3  ;;  %v5020_v18 = vsub.f32 %v4626_v51, %v4929_v27 }
 0x292   : > { %v5024_v16 = vsub.f32 %v4633_v13, %v4923_v2  ;;  %v5028_v43 = vsub.f32 %v4643_v39, %v4925_v4  ;;  %v5032_v48 = vsub.f32 %v4636_v34, %v4927_v3  ;;  %v5036_v44 = vsub.f32 %v4646_v61, %v4929_v27 }
 0x293   : > { %v5040_v51 = vsub.f32 %v4653_v17, %v4923_v2  ;;  %v5044_v13 = vsub.f32 %v4663_v63, %v4925_v4  ;;  %v5048_v39 = vsub.f32 %v4656_v21, %v4927_v3  ;;  %v5052_v34 = vsub.f32 %v4666_v5, %v4929_v27 }
 0x294   : > { %v5056_v61 = vsub.f32 %v4673_v19, %v4923_v2  ;;  %v5060_v17 = vsub.f32 %v4683_v57, %v4925_v4  ;;  %v5064_v63 = vsub.f32 %v4676_v45, %v4927_v3  ;;  %v5068_v21 = vsub.f32 %v4686_v29, %v4929_v27 }
 0x295   : > { %v5072_v5 = vsub.f32 %v4693_v35, %v4923_v2  ;;  %v5076_v19 = vsub.f32 %v4703_v24, %v4925_v4  ;;  %v5080_v57 = vsub.f32 %v4696_v36, %v4927_v3  ;;  %v5084_v45 = vsub.f32 %v4706_v41, %v4929_v27 }
 0x296   : > { %v5088_v29 = vsub.f32 %v4713_v53, %v4923_v2  ;;  %v5092_v35 = vsub.f32 %v4723_v0, %v4925_v4  ;;  %v5096_v24 = vsub.f32 %v4716_v55, %v4927_v3  ;;  %v5100_v36 = vsub.f32 %v4726_v42, %v4929_v27 }
 0x297   : > { %v5104_v41 = vsub.f32 %v7083_v33, %v4923_v2  ;;  %v5108_v53 = vsub.f32 %v7085_v31, %v4925_v4  ;;  %v5112_v0 = vsub.f32 %v7086_v62, %v4927_v3  ;;  %v5116_v55 = vsub.f32 %v7087_v30, %v4929_v27 }
 0x298   : > { %v5120_v42 = vsub.f32 %v7088_v6, %v4923_v2  ;;  %v5124_v33 = vsub.f32 %v7090_v47, %v4925_v4  ;;  %v5132_v62 = vsub.f32 %v4766_v22, %v4929_v27  ;;  %v5136_v30 = vsub.f32 %v4773_v37, %v4923_v2 }
 0x299   : > { %7084 = vst [vmem:[#allocation84_spill] sm:$0xff] %v5104_v41  ;;  %v7092_v41 = vld [vmem:[#allocation65_spill] sm:$0xff]  ;;  %v5140_v6 = vsub.f32 %v4783_v14, %v4925_v4 }
 0x29a   : > { %7089 = vst [vmem:[#allocation85_spill] sm:$0xff] %v5120_v42  ;;  %7091 = vst [vmem:[#allocation86_spill] sm:$0xff] %v5124_v33  ;;  %v5128_v31 = vsub.f32 %v7092_v41, %v4927_v3  ;;  %v7097_v42 = vld [vmem:[#allocation69_spill] sm:$0xff]  ;;  %v7099_v33 = vld [vmem:[#allocation71_spill] sm:$0xff] }
 0x29b   : > { %7094 = vst [vmem:[#allocation88_spill] sm:$0xff] %v5132_v62  ;;  %7095 = vst [vmem:[#allocation89_spill] sm:$0xff] %v5136_v30  ;;  %v5144_v47 = vsub.f32 %v7097_v42, %v4927_v3  ;;  %v5148_v41 = vsub.f32 %v7099_v33, %v4929_v27  ;;  %v7103_v62 = vld [vmem:[#allocation74_spill] sm:$0xff]  ;;  %v7105_v30 = vld [vmem:[#allocation73_spill] sm:$0xff] }
 0x29c   : > { %7093 = vst [vmem:[#allocation87_spill] sm:$0xff] %v5128_v31  ;;  %7096 = vst [vmem:[#allocation90_spill] sm:$0xff] %v5140_v6  ;;  %v7101_v31 = vld [vmem:[#allocation72_spill] sm:$0xff]  ;;  %v5156_v37 = vsub.f32 %v7103_v62, %v4925_v4  ;;  %v5160_v14 = vsub.f32 %v7105_v30, %v4927_v3  ;;  %v7107_v6 = vld [vmem:[#allocation75_spill] sm:$0xff] }
 0x29d   : > { %7098 = vst [vmem:[#allocation91_spill] sm:$0xff] %v5144_v47  ;;  %7100 = vst [vmem:[#allocation92_spill] sm:$0xff] %v5148_v41  ;;  %v5152_v22 = vsub.f32 %v7101_v31, %v4923_v2  ;;  %v5164_v42 = vsub.f32 %v7107_v6, %v4929_v27  ;;  %v7109_v47 = vld [vmem:[#allocation76_spill] sm:$0xff]  ;;  %v7111_v41 = vld [vmem:[#allocation78_spill] sm:$0xff] }
 0x29e   : > { %7104 = vst [vmem:[#allocation94_spill] sm:$0xff] %v5156_v37  ;;  %7106 = vst [vmem:[#allocation95_spill] sm:$0xff] %v5160_v14  ;;  %v5168_v33 = vsub.f32 %v7109_v47, %v4923_v2  ;;  %v5172_v31 = vsub.f32 %v7111_v41, %v4925_v4  ;;  %v7114_v37 = vld [vmem:[#allocation79_spill] sm:$0xff]  ;;  %v7116_v14 = vld [vmem:[#allocation80_spill] sm:$0xff] }
 0x29f   : > { %7102 = vst [vmem:[#allocation93_spill] sm:$0xff] %v5152_v22  ;;  %7108 = vst [vmem:[#allocation96_spill] sm:$0xff] %v5164_v42  ;;  %v7113_v22 = vld [vmem:[#allocation77_spill] sm:$0xff]  ;;  %v5180_v30 = vsub.f32 %v7114_v37, %v4929_v27  ;;  %v5184_v6 = vsub.f32 %v7116_v14, %v4923_v2  ;;  %v7118_v42 = vld [vmem:[#allocation82_spill] sm:$0xff]  ;;  %v1541_v37 = vmul.f32 %v4944_v23, %v4944_v23 }
 0x2a0   : > { %7110 = vst [vmem:[#allocation97_spill] sm:$0xff] %v5168_v33  ;;  %7112 = vst [vmem:[#allocation98_spill] sm:$0xff] %v5172_v31  ;;  %v5176_v62 = vsub.f32 %v7113_v22, %v4927_v3  ;;  %v5188_v47 = vsub.f32 %v7118_v42, %v4925_v4  ;;  %v7120_v33 = vld [vmem:[#allocation81_spill] sm:$0xff]  ;;  %v7122_v31 = vld [vmem:[#allocation83_spill] sm:$0xff]  ;;  %v1543_v14 = vmul.f32 %v4952_v50, %v4952_v50 }
 0x2a1   : > { %7115 = vst [vmem:[#allocation99_spill] sm:$0xff] %v5180_v30  ;;  %7117 = vst [vmem:[#allocation100_spill] sm:$0xff] %v5184_v6  ;;  %v5192_v41 = vsub.f32 %v7120_v33, %v4927_v3  ;;  %v5196_v22 = vsub.f32 %v7122_v31, %v4929_v27  ;;  %v1542_v30 = vmul.f32 %v4948_v46, %v4948_v46 }
 0x2a2   : > { %7119 = vst [vmem:[#allocation101_spill] sm:$0xff] %v5188_v47  ;;  %v1544_v42 = vmul.f32 %v4956_v20, %v4956_v20  ;;  %v1545_v33 = vmul.f32 %v4960_v25, %v4960_v25  ;;  %v1547_v31 = vmul.f32 %v4968_v58, %v4968_v58  ;;  %v1548_v23 = vmul.f32 %v4972_v32, %v4972_v32 }
 0x2a3   : > { %7121 = vst [vmem:[#allocation102_spill] sm:$0xff] %v5192_v41  ;;  %7123 = vst [vmem:[#allocation103_spill] sm:$0xff] %v5196_v22  ;;  %v1546_v41 = vmul.f32 %v4964_v8, %v4964_v8  ;;  %v1549_v46 = vmul.f32 %v4976_v11, %v4976_v11  ;;  %v1550_v50 = vmul.f32 %v4980_v12, %v4980_v12 }
 0x2a4   : > { %v1551_v20 = vmul.f32 %v4984_v28, %v4984_v28  ;;  %v1552_v25 = vmul.f32 %v4988_v49, %v4988_v49  ;;  %v1553_v8 = vmul.f32 %v4992_v9, %v4992_v9  ;;  %v1554_v58 = vmul.f32 %v4996_v59, %v4996_v59 }
 0x2a5   : > { %v1555_v32 = vmul.f32 %v5000_v56, %v5000_v56  ;;  %v1556_v11 = vmul.f32 %v5004_v1, %v5004_v1  ;;  %v1557_v12 = vmul.f32 %v5008_v52, %v5008_v52  ;;  %v1558_v28 = vmul.f32 %v5012_v10, %v5012_v10 }
 0x2a6   : > { %v1559_v49 = vmul.f32 %v5016_v40, %v5016_v40  ;;  %v1560_v9 = vmul.f32 %v5020_v18, %v5020_v18  ;;  %v1561_v56 = vmul.f32 %v5024_v16, %v5024_v16  ;;  %v1562_v1 = vmul.f32 %v5028_v43, %v5028_v43 }
 0x2a7   : > { %s5238_s0 = spop %3543  ;;  %v1563_v52 = vmul.f32 %v5032_v48, %v5032_v48  ;;  %v1564_v10 = vmul.f32 %v5036_v44, %v5036_v44  ;;  %v1565_v40 = vmul.f32 %v5040_v51, %v5040_v51  ;;  %v1566_v18 = vmul.f32 %v5044_v13, %v5044_v13 }
 0x2a8   : > { %v1567_v59 = vmul.f32 %v5048_v39, %v5048_v39  ;;  %v1568_v16 = vmul.f32 %v5052_v34, %v5052_v34  ;;  %v1569_v43 = vmul.f32 %v5056_v61, %v5056_v61  ;;  %v1570_v48 = vmul.f32 %v5060_v17, %v5060_v17  ;;  %s1721_s1 = smul.f32 128.0, %s5238_s0 }
 0x2a9   : > { %v1571_v44 = vmul.f32 %v5064_v63, %v5064_v63  ;;  %v1572_v51 = vmul.f32 %v5068_v21, %v5068_v21  ;;  %v1605_v13 = vadd.f32 %v1545_v33, %v1541_v37  ;;  %v1626_v22 = vadd.f32 %v1546_v41, %v1542_v30  ;;  %s1801_s21 = smul.f32 %s5238_s0, %s1797_s22 }
 0x2aa   : > { %v1647_v47 = vadd.f32 %v1547_v31, %v1543_v14  ;;  %v1668_v39 = vadd.f32 %v1548_v23, %v1544_v42  ;;  %v1573_v34 = vmul.f32 %v5072_v5, %v5072_v5  ;;  %v1574_v61 = vmul.f32 %v5076_v19, %v5076_v19 }
 0x2ab   : > { %v1575_v17 = vmul.f32 %v5080_v57, %v5080_v57  ;;  %v7124_v63 = vrot.slane %v4921_v54, %v7071_v7  ;;  %v1606_v21 = vadd.f32 %v1605_v13, %v1549_v46  ;;  %v1627_v37 = vadd.f32 %v1626_v22, %v1550_v50 }
 0x2ac   : > { %v1648_v30 = vadd.f32 %v1647_v47, %v1551_v20  ;;  %v1669_v41 = vadd.f32 %v1668_v39, %v1552_v25  ;;  %v7125_v14 = vrot.slane %v4921_v54, %v7072_v38  ;;  %v7126_v19 = vrot.slane %v4921_v54, %v7073_v26 }
 0x2ad   : > { %v5275_v6 = vsub.f32 %v4923_v2, %v7124_v63  ;;  %v7127_v2 = vrot.slane %v4921_v54, %v7074_v15  ;;  %v1722_v47 = vstv %s1721_s1  ;;  %v1607_v22 = vadd.f32 %v1606_v21, %v1553_v8 }
 0x2ae   : > { %v5281_v5 = vsub.f32 %v4925_v4, %v7125_v14  ;;  %v5287_v57 = vsub.f32 %v4927_v3, %v7126_v19  ;;  %v1628_v42 = vadd.f32 %v1627_v37, %v1554_v58  ;;  %v1649_v33 = vadd.f32 %v1648_v30, %v1555_v32 }
 0x2af   : > { %v5293_v7 = vsub.f32 %v4929_v27, %v7127_v2  ;;  %v1670_v38 = vadd.f32 %v1669_v41, %v1556_v11  ;;  %v1723_v4 = vmul.f32 %v1722_v47, %v5275_v6  ;;  %v1608_v23 = vadd.f32 %v1607_v22, %v1557_v12  ;;  %v7133_v22 = vld [vmem:[#allocation86_spill] sm:$0xff] }
 0x2b0   : > { %v1724_v31 = vmul.f32 %v1722_v47, %v5281_v5  ;;  %v1725_v26 = vmul.f32 %v1722_v47, %v5287_v57  ;;  %v1629_v46 = vadd.f32 %v1628_v42, %v1558_v28  ;;  %v1650_v50 = vadd.f32 %v1649_v33, %v1559_v49 }
 0x2b1   : > { %v1726_v3 = vmul.f32 %v1722_v47, %v5293_v7  ;;  %v1671_v15 = vadd.f32 %v1670_v38, %v1560_v9  ;;  %v7128_v20 = vlaneseq  ;;  %v1576_v25 = vmul.f32 %v5084_v45, %v5084_v45 }
 0x2b2   : > { %v1577_v8 = vmul.f32 %v5088_v29, %v5088_v29  ;;  %v1731_v58 = vcombine.low %v1723_v4, %v1724_v31  ;;  %v1609_v11 = vadd.f32 %v1608_v23, %v1561_v56  ;;  %v1630_v13 = vadd.f32 %v1629_v46, %v1562_v1  ;;  %v7131_v1 = vld [vmem:[#allocation84_spill] sm:$0xff] }
 0x2b3   : > { %vm5300_vm7 = vcmp.lt.s32.totalorder %v7128_v20, 512  ;;  %v1732_v32 = vcombine.low %v1725_v26, %v1726_v3  ;;  %v1651_v39 = vadd.f32 %v1650_v50, %v1563_v52  ;;  %v1672_v12 = vadd.f32 %v1671_v15, %v1564_v10  ;;  %v7138_v26 = vld [vmem:[#allocation91_spill] sm:$0xff]  ;;  %v7139_v23 = vld [vmem:[#allocation92_spill] sm:$0xff] }
 0x2b4   : > { %v1578_v28 = vmul.f32 %v5092_v35, %v5092_v35  ;;  %v1579_v49 = vmul.f32 %v5096_v24, %v5096_v24  ;;  %v1739_v9 = vrot.slane %v1731_v58, %v4940_v60  ;;  %v1610_v45 = vadd.f32 %v1609_v11, %v1565_v40  ;;  %v7141_v58 = vld [vmem:[#allocation94_spill] sm:$0xff]  ;;  %v7142_v11 = vld [vmem:[#allocation95_spill] sm:$0xff] }
 0x2b5   : > { %v1746_v63 = vrot.slane %v1732_v32, %v4940_v60  ;;  %v1631_v21 = vadd.f32 %v1630_v13, %v1566_v18  ;;  %v1652_v37 = vadd.f32 %v1651_v39, %v1567_v59  ;;  %v1673_v29 = vadd.f32 %v1672_v12, %v1568_v16  ;;  %v7132_v59 = vld [vmem:[#allocation85_spill] sm:$0xff]  ;;  %v7143_v39 = vld [vmem:[#allocation96_spill] sm:$0xff] }
 0x2b6   : > { %v1580_v56 = vmul.f32 %v5100_v36, %v5100_v36  ;;  %v1581_v52 = vmul.f32 %v7131_v1, %v7131_v1  ;;  %v1582_v35 = vmul.f32 %v5108_v53, %v5108_v53  ;;  %v1611_v30 = vadd.f32 %v1610_v45, %v1569_v43  ;;  %v7144_v45 = vld [vmem:[#allocation97_spill] sm:$0xff]  ;;  %v7146_v1 = vld [vmem:[#allocation99_spill] sm:$0xff] }
 0x2b7   : > { %v1747_v10 = vcombine.low %v1739_v9, %v1746_v63  ;;  %v1632_v24 = vadd.f32 %v1631_v21, %v1570_v48  ;;  %v1653_v41 = vadd.f32 %v1652_v37, %v1571_v44  ;;  %v1674_v14 = vadd.f32 %v1673_v29, %v1572_v51  ;;  %v7134_v48 = vld [vmem:[#allocation87_spill] sm:$0xff]  ;;  %v7135_v51 = vld [vmem:[#allocation88_spill] sm:$0xff]  ;;  %v7145_v37 = vld [vmem:[#allocation98_spill] sm:$0xff] }
 0x2b8   : > { %v1583_v40 = vmul.f32 %v5112_v0, %v5112_v0  ;;  %v1584_v18 = vmul.f32 %v5116_v55, %v5116_v55  ;;  %v1585_v36 = vmul.f32 %v7132_v59, %v7132_v59  ;;  %v1612_v19 = vadd.f32 %v1611_v30, %v1573_v34  ;;  %v7136_v34 = vld [vmem:[#allocation89_spill] sm:$0xff]  ;;  %v7149_v59 = vld [vmem:[#allocation102_spill] sm:$0xff] }
 0x2b9   : > { %v1754_v16 = vrot.slane %v1747_v10, %v4940_v60  ;;  %v1633_v2 = vadd.f32 %v1632_v24, %v1574_v61  ;;  %v1654_v47 = vadd.f32 %v1653_v41, %v1575_v17  ;;  %v1675_v53 = vadd.f32 %v1674_v14, %v1576_v25  ;;  %v7137_v17 = vld [vmem:[#allocation90_spill] sm:$0xff]  ;;  %v7140_v25 = vld [vmem:[#allocation93_spill] sm:$0xff]  ;;  %v7147_v41 = vld [vmem:[#allocation100_spill] sm:$0xff] }
 0x2ba   : > { %v1586_v43 = vmul.f32 %v7133_v22, %v7133_v22  ;;  %v1587_v44 = vmul.f32 %v7134_v48, %v7134_v48  ;;  %v1588_v0 = vmul.f32 %v7135_v51, %v7135_v51  ;;  %v1613_v42 = vadd.f32 %v1612_v19, %v1577_v8 }
 0x2bb   : > { %v1756_v55 = vadd.f32 %v1754_v16, %v4921_v54  ;;  %v1634_v33 = vadd.f32 %v1633_v2, %v1578_v28  ;;  %v1655_v38 = vadd.f32 %v1654_v47, %v1579_v49  ;;  %v1676_v4 = vadd.f32 %v1675_v53, %v1580_v56  ;;  %v7150_v16 = vld [vmem:[#allocation103_spill] sm:$0xff] }
 0x2bc   : > { %v1589_v61 = vmul.f32 %v7136_v34, %v7136_v34  ;;  %v1590_v31 = vmul.f32 %v7137_v17, %v7137_v17  ;;  %v1591_v3 = vmul.f32 %v7138_v26, %v7138_v26  ;;  %v1592_v46 = vmul.f32 %v7139_v23, %v7139_v23 }
 0x2bd   : > { %1761 = vst.msk [vmem:[#allocation4] sm:$0xf] %vm5300_vm7, %v1756_v55  ;;  %v1614_v54 = vadd.f32 %v1613_v42, %v1581_v52  ;;  %v1635_v50 = vadd.f32 %v1634_v33, %v1582_v35  ;;  %v1656_v15 = vadd.f32 %v1655_v38, %v1583_v40  ;;  %v1677_v20 = vadd.f32 %v1676_v4, %v1584_v18  ;;  %v7148_v40 = vld [vmem:[#allocation101_spill] sm:$0xff] }
 0x2be   : > { %v1593_v8 = vmul.f32 %v7140_v25, %v7140_v25  ;;  %v1594_v32 = vmul.f32 %v7141_v58, %v7141_v58  ;;  %v1595_v13 = vmul.f32 %v7142_v11, %v7142_v11  ;;  %v1596_v12 = vmul.f32 %v7143_v39, %v7143_v39 }
 0x2bf   : > { %v1615_v28 = vadd.f32 %v1614_v54, %v1585_v36  ;;  %v1636_v49 = vadd.f32 %v1635_v50, %v1586_v43  ;;  %v1657_v9 = vadd.f32 %v1656_v15, %v1587_v44  ;;  %v1678_v63 = vadd.f32 %v1677_v20, %v1588_v0 }
 0x2c0   : > { %v1597_v21 = vmul.f32 %v7144_v45, %v7144_v45  ;;  %v1598_v29 = vmul.f32 %v7145_v37, %v7145_v37  ;;  %v1599_v56 = vmul.f32 %v5176_v62, %v5176_v62  ;;  %v1600_v52 = vmul.f32 %v7146_v1, %v7146_v1 }
 0x2c1   : > { %v1616_v35 = vadd.f32 %v1615_v28, %v1589_v61  ;;  %v1637_v10 = vadd.f32 %v1636_v49, %v1590_v31  ;;  %v1658_v30 = vadd.f32 %v1657_v9, %v1591_v3  ;;  %v1679_v24 = vadd.f32 %v1678_v63, %v1592_v46 }
 0x2c2   : > { %v1601_v14 = vmul.f32 %v7147_v41, %v7147_v41  ;;  %v1602_v18 = vmul.f32 %v7148_v40, %v7148_v40  ;;  %v1603_v36 = vmul.f32 %v7149_v59, %v7149_v59  ;;  %v1604_v19 = vmul.f32 %v7150_v16, %v7150_v16 }
 0x2c3   : > { %v1617_v62 = vadd.f32 %v1616_v35, %v1593_v8  ;;  %v1638_v2 = vadd.f32 %v1637_v10, %v1594_v32  ;;  %v1659_v47 = vadd.f32 %v1658_v30, %v1595_v13  ;;  %v1680_v53 = vadd.f32 %v1679_v24, %v1596_v12 }
 0x2c4   : > { %v1793_v22 = vmul.f32 %v5275_v6, %v5275_v6  ;;  %v1794_v0 = vmul.f32 %v5281_v5, %v5281_v5  ;;  %v1795_v55 = vmul.f32 %v5287_v57, %v5287_v57  ;;  %v1796_v42 = vmul.f32 %v5293_v7, %v5293_v7 }
 0x2c5   : > { %v1618_v43 = vadd.f32 %v1617_v62, %v1597_v21  ;;  %v1639_v48 = vadd.f32 %v1638_v2, %v1598_v29  ;;  %v1660_v44 = vadd.f32 %v1659_v47, %v1599_v56  ;;  %v1681_v51 = vadd.f32 %v1680_v53, %v1600_v52 }
 0x2c6   : > { %v1802_v33 = vstv %s1801_s21 }
 0x2c7   : > { %v1619_v38 = vadd.f32 %v1618_v43, %v1601_v14  ;;  %v1640_v4 = vadd.f32 %v1639_v48, %v1602_v18  ;;  %v1661_v34 = vadd.f32 %v1660_v44, %v1603_v36  ;;  %v1682_v61 = vadd.f32 %v1681_v51, %v1604_v19  ;;  %v1762_v14 = vld [vmem:[#allocation5] sm:$0xf] }
 0x2c8   : > { %v1803_v3 = vmul.f32 %v1802_v33, %v1793_v22  ;;  %v1804_v23 = vmul.f32 %v1802_v33, %v1794_v0  ;;  %v1805_v46 = vmul.f32 %v1802_v33, %v1795_v55  ;;  %v1806_v54 = vmul.f32 %v1802_v33, %v1796_v42 }
 0x2c9   : > { %v1620_v17 = vrot.slane %v1619_v38, 4  ;;  %v1641_v6 = vrot.slane %v1640_v4, 4  ;;  %v1662_v31 = vrot.slane %v1661_v34, 4  ;;  %v1683_v26 = vrot.slane %v1682_v61, 4 }
 0x2ca   : > { %v1811_v58 = vcombine.low %v1803_v3, %v1804_v23  ;;  %v1812_v32 = vcombine.low %v1805_v46, %v1806_v54 }
 0x2cb   : > { %v1621_v5 = vadd.f32 %v1620_v17, %v1619_v38  ;;  %v1642_v50 = vadd.f32 %v1641_v6, %v1640_v4  ;;  %v1663_v15 = vadd.f32 %v1662_v31, %v1661_v34  ;;  %v1684_v57 = vadd.f32 %v1683_v26, %v1682_v61 }
 0x2cc   : > { %v1819_v45 = vrot.slane %v1811_v58, %v4940_v60  ;;  %v1826_v21 = vrot.slane %v1812_v32, %v4940_v60 }
 0x2cd   : > { %v1622_v20 = vrot.slane %v1621_v5, 2  ;;  %v1643_v25 = vrot.slane %v1642_v50, 2  ;;  %v1664_v7 = vrot.slane %v1663_v15, 2  ;;  %v1685_v8 = vrot.slane %v1684_v57, 2 }
 0x2ce   : > { %v1827_v24 = vcombine.low %v1819_v45, %v1826_v21 }
 0x2cf   : > { %v1623_v11 = vadd.f32 %v1622_v20, %v1621_v5  ;;  %v1644_v13 = vadd.f32 %v1643_v25, %v1642_v50  ;;  %v1665_v39 = vadd.f32 %v1664_v7, %v1663_v15  ;;  %v1686_v12 = vadd.f32 %v1685_v8, %v1684_v57 }
 0x2d0   : > { %v1834_v18 = vrot.slane %v1827_v24, %v4940_v60 }
 0x2d1   : > { %v1624_v28 = vrot.slane %v1623_v11, 1  ;;  %v1645_v49 = vrot.slane %v1644_v13, 1  ;;  %v1666_v9 = vrot.slane %v1665_v39, 1  ;;  %v1687_v63 = vrot.slane %v1686_v12, 1 }
 0x2d3   : > { %v1625_v37 = vadd.f32 %v1624_v28, %v1623_v11  ;;  %v1646_v29 = vadd.f32 %v1645_v49, %v1644_v13  ;;  %v1667_v56 = vadd.f32 %v1666_v9, %v1665_v39  ;;  %v1688_v1 = vadd.f32 %v1687_v63, %v1686_v12 }
 0x2d5   : > { %v1767_v52 = vcombine.low %v1625_v37, %v1646_v29  ;;  %v1768_v35 = vcombine.low %v1667_v56, %v1688_v1 }
 0x2d7   : > { %v1775_v10 = vrot.slane %v1767_v52, %v4940_v60  ;;  %v1782_v30 = vrot.slane %v1768_v35, %v4940_v60 }
 0x2d9   : > { %v1783_v41 = vcombine.low %v1775_v10, %v1782_v30 }
 0x2db   : > { %v1790_v40 = vrot.slane %v1783_v41, %v4940_v60 }
 0x2dd   : > { %v1792_v59 = vadd.f32 %v1790_v40, %v1762_v14 }
 0x2df   : > { %v1836_v36 = vadd.f32 %v1834_v18, %v1792_v59 }
 0x2e1   : > { %1837 = vst.msk [vmem:[#allocation5] sm:$0xf] %vm5300_vm7, %v1836_v36 }
 0x2e2 PF: > { %p3365_p9 = scmp.ne.s32.totalorder %s3760_s12, 1 }
 0x2e4   : > { %1841 = sbr.rel (%p3365_p9) target bundleno = 940 (0x3ac), region = 92 }
 0x2e9   : > { %s5388_s27 = sshll.u32 %s3760_s12, 7  ;;  %v7151_v16 = vld [vmem:[#allocation15_spill] sm:$0xff]  ;;  %v7169_v20 = vld [vmem:[#allocation20_spill] sm:$0xff]  ;;  %v7170_v7 = vld [vmem:[#allocation22_spill] sm:$0xff] }
 0x2ea   : > { %s1893_s26 = ssub.s32 200, %s5388_s27  ;;  %v1845_v19 = vadd.s32 8, %v7151_v16  ;;  %v1860_v62 = vstv %s5388_s27  ;;  %v1846_v60 = vadd.s32 16, %v7151_v16  ;;  %v1847_v2 = vadd.s32 24, %v7151_v16  ;;  %s2359_s18 = scvt.s32.f32 %s5388_s27  ;;  %v7171_v58 = vld [vmem:[#allocation21_spill] sm:$0xff]  ;;  %v7172_v11 = vld [vmem:[#allocation23_spill] sm:$0xff] }
 0x2eb   : > { %v1848_v27 = vadd.s32 32, %v7151_v16  ;;  %v1849_v47 = vadd.s32 40, %v7151_v16  ;;  %p5397_p10 = scmp.lt.s32.totalorder %s1893_s26, 128  ;;  %v1850_v53 = vadd.s32 48, %v7151_v16  ;;  %v1851_v22 = vadd.s32 56, %v7151_v16  ;;  %v7173_v39 = vld [vmem:[#allocation24_spill] sm:$0xff] }
 0x2ec   : > { %v1852_v43 = vadd.s32 64, %v7151_v16  ;;  %v1853_v48 = vadd.s32 72, %v7151_v16  ;;  %v1854_v44 = vadd.s32 80, %v7151_v16  ;;  %v1855_v51 = vadd.s32 88, %v7151_v16  ;;  %v7174_v28 = vld [vmem:[#allocation26_spill] sm:$0xff]  ;;  %v7175_v9 = vld [vmem:[#allocation25_spill] sm:$0xff] }
 0x2ed   : > { %v1856_v0 = vadd.s32 96, %v7151_v16  ;;  %v5409_v55 = vadd.s32 %v1860_v62, %v7151_v16  ;;  %v1857_v42 = vadd.s32 104, %v7151_v16  ;;  %v1858_v33 = vadd.s32 112, %v7151_v16  ;;  %s7430_s26 = smov (!%p5397_p10, %s1893_s26), 128  ;;  %v7176_v45 = vld [vmem:[#allocation27_spill] sm:$0xff]  ;;  %v7177_v37 = vld [vmem:[#allocation28_spill] sm:$0xff] }
 0x2ee   : > { %v1859_v38 = vadd.s32 120, %v7151_v16  ;;  %v5414_v4 = vadd.s32 %v1860_v62, %v1845_v19  ;;  %v5416_v34 = vadd.s32 %v1860_v62, %v1846_v60  ;;  %v5418_v61 = vadd.s32 %v1860_v62, %v1847_v2  ;;  %s5452_s29 = scvt.s32.f32 %s7430_s26  ;;  %v7178_v56 = vld [vmem:[#allocation30_spill] sm:$0xff]  ;;  %v7179_v52 = vld [vmem:[#allocation29_spill] sm:$0xff]  ;;  %v7180_v10 = vld [vmem:[#allocation31_spill] sm:$0xff] }
 0x2ef   : > { %7153 = vst [vmem:[#allocation104_spill] sm:$0xff] %v5409_v55  ;;  %v5420_v17 = vadd.s32 %v1860_v62, %v1848_v27  ;;  %v5422_v6 = vadd.s32 %v1860_v62, %v1849_v47  ;;  %v5426_v31 = vadd.s32 %v1860_v62, %v1850_v53  ;;  %v5428_v26 = vadd.s32 %v1860_v62, %v1851_v22  ;;  %v7181_v24 = vld [vmem:[#allocation32_spill] sm:$0xff]  ;;  %v7182_v14 = vld [vmem:[#allocation34_spill] sm:$0xff]  ;;  %v7184_v2 = vld [vmem:[#allocation35_spill] sm:$0xff] }
 0x2f0   : > { %7154 = vst [vmem:[#allocation105_spill] sm:$0xff] %v5414_v4  ;;  %7155 = vst [vmem:[#allocation106_spill] sm:$0xff] %v5416_v34  ;;  %v5430_v3 = vadd.s32 %v1860_v62, %v1852_v43  ;;  %v5432_v23 = vadd.s32 %v1860_v62, %v1853_v48  ;;  %v5434_v46 = vadd.s32 %v1860_v62, %v1854_v44  ;;  %vm1877_vm8 = vcmp.lt.s32.totalorder %v5409_v55, 200  ;;  %s2360_s19 = sadd.f32 %s2359_s18, %s5452_s29  ;;  %v7185_v47 = vld [vmem:[#allocation36_spill] sm:$0xff]  ;;  %v7186_v22 = vld [vmem:[#allocation38_spill] sm:$0xff]  ;;  %s6416_s1 = smul.f32 %s2359_s18, %s5452_s29 }
 0x2f1   : > { %7156 = vst [vmem:[#allocation107_spill] sm:$0xff] %v5418_v61  ;;  %7157 = vst [vmem:[#allocation108_spill] sm:$0xff] %v5420_v17  ;;  %v5436_v54 = vadd.s32 %v1860_v62, %v1855_v51  ;;  %v5438_v5 = vadd.s32 %v1860_v62, %v1856_v0  ;;  %v5441_v50 = vadd.s32 %v1860_v62, %v1857_v42  ;;  %vm1878_vm9 = vcmp.lt.s32.totalorder %v5414_v4, 200  ;;  %v7187_v42 = vld [vmem:[#allocation37_spill] sm:$0xff] }
 0x2f2   : > { %7158 = vst [vmem:[#allocation109_spill] sm:$0xff] %v5422_v6  ;;  %7159 = vst [vmem:[#allocation110_spill] sm:$0xff] %v5426_v31  ;;  %v5443_v15 = vadd.s32 %v1860_v62, %v1858_v33  ;;  %v5445_v57 = vadd.s32 %v1860_v62, %v1859_v38  ;;  %vm1879_vm10 = vcmp.lt.s32.totalorder %v5416_v34, 200  ;;  %vm1880_vm11 = vcmp.lt.s32.totalorder %v5418_v61, 200  ;;  %v7183_v62 = vld [vmem:[#allocation33_spill] sm:$0xff]  ;;  %v7188_v38 = vld [vmem:[#allocation39_spill] sm:$0xff] }
 0x2f3   : > { %7160 = vst [vmem:[#allocation111_spill] sm:$0xff] %v5428_v26  ;;  %7161 = vst [vmem:[#allocation112_spill] sm:$0xff] %v5430_v3  ;;  %vm1881_vm12 = vcmp.lt.s32.totalorder %v5420_v17, 200  ;;  %vm1882_vm13 = vcmp.lt.s32.totalorder %v5422_v6, 200  ;;  %v1929_v25 = vsel %vm1877_vm8, %v7169_v20, 0.0  ;;  %v1930_v8 = vsel %vm1877_vm8, %v7170_v7, 0.0 }
 0x2f4   : > { %7162 = vst [vmem:[#allocation113_spill] sm:$0xff] %v5432_v23  ;;  %7163 = vst [vmem:[#allocation114_spill] sm:$0xff] %v5434_v46  ;;  %v1931_v32 = vsel %vm1877_vm8, %v7171_v58, 0.0  ;;  %v1932_v13 = vsel %vm1877_vm8, %v7172_v11, 0.0  ;;  %v1933_v12 = vsel %vm1878_vm9, %v7173_v39, 0.0  ;;  %v1934_v49 = vsel %vm1878_vm9, %v7174_v28, 0.0 }
 0x2f5   : > { %7164 = vst [vmem:[#allocation115_spill] sm:$0xff] %v5436_v54  ;;  %7165 = vst [vmem:[#allocation116_spill] sm:$0xff] %v5438_v5  ;;  %v1935_v63 = vsel %vm1878_vm9, %v7175_v9, 0.0  ;;  %v1936_v21 = vsel %vm1878_vm9, %v7176_v45, 0.0  ;;  %vm1883_vm14 = vcmp.lt.s32.totalorder %v5426_v31, 200  ;;  %vm1884_vm15 = vcmp.lt.s32.totalorder %v5428_v26, 200 }
 0x2f6   : > { %7166 = vst [vmem:[#allocation117_spill] sm:$0xff] %v5441_v50  ;;  %7167 = vst [vmem:[#allocation118_spill] sm:$0xff] %v5443_v15  ;;  %v1937_v29 = vsel %vm1879_vm10, %v7177_v37, 0.0  ;;  %v1938_v1 = vsel %vm1879_vm10, %v7178_v56, 0.0  ;;  %v1939_v35 = vsel %vm1879_vm10, %v7179_v52, 0.0  ;;  %v1940_v30 = vsel %vm1879_vm10, %v7180_v10, 0.0 }
 0x2f7   : > { %7168 = vst [vmem:[#allocation119_spill] sm:$0xff] %v5445_v57  ;;  %v1941_v41 = vsel %vm1880_vm11, %v7181_v24, 0.0  ;;  %v1942_v40 = vsel %vm1880_vm11, %v7182_v14, 0.0  ;;  %vm1885_vm0 = vcmp.lt.s32.totalorder %v5430_v3, 200  ;;  %v1993_v18 = vadd.f32 %v1933_v12, %v1929_v25  ;;  %v7196_v6 = vld [vmem:[#allocation47_spill] sm:$0xff]  ;;  %v7199_v17 = vld [vmem:[#allocation49_spill] sm:$0xff] }
 0x2f8   : > { %v2014_v59 = vadd.f32 %v1934_v49, %v1930_v8  ;;  %v2035_v36 = vadd.f32 %v1935_v63, %v1931_v32  ;;  %v2056_v19 = vadd.f32 %v1936_v21, %v1932_v13  ;;  %v1943_v60 = vsel %vm1880_vm11, %v7183_v62, 0.0  ;;  %v7189_v8 = vld [vmem:[#allocation40_spill] sm:$0xff]  ;;  %v7200_v31 = vld [vmem:[#allocation51_spill] sm:$0xff]  ;;  %v7203_v4 = vld [vmem:[#allocation53_spill] sm:$0xff] }
 0x2f9   : > { %v1944_v27 = vsel %vm1880_vm11, %v7184_v2, 0.0  ;;  %v1945_v53 = vsel %vm1881_vm12, %v7185_v47, 0.0  ;;  %v1946_v43 = vsel %vm1881_vm12, %v7186_v22, 0.0  ;;  %vm1886_vm1 = vcmp.lt.s32.totalorder %v5432_v23, 200  ;;  %v7204_v26 = vld [vmem:[#allocation55_spill] sm:$0xff] }
 0x2fa   : > { %v1994_v48 = vadd.f32 %v1993_v18, %v1937_v29  ;;  %v2015_v44 = vadd.f32 %v2014_v59, %v1938_v1  ;;  %v2036_v51 = vadd.f32 %v2035_v36, %v1939_v35  ;;  %v2057_v0 = vadd.f32 %v2056_v19, %v1940_v30  ;;  %v7190_v29 = vld [vmem:[#allocation42_spill] sm:$0xff]  ;;  %v7191_v35 = vld [vmem:[#allocation41_spill] sm:$0xff]  ;;  %v7192_v18 = vld [vmem:[#allocation43_spill] sm:$0xff] }
 0x2fb   : > { %v1947_v33 = vsel %vm1881_vm12, %v7187_v42, 0.0  ;;  %v1948_v25 = vsel %vm1881_vm12, %v7188_v38, 0.0  ;;  %v1949_v32 = vsel %vm1882_vm13, %v7189_v8, 0.0  ;;  %v2387_v13 = vstv %s2360_s19  ;;  %v7208_v3 = vld [vmem:[#allocation59_spill] sm:$0xff] }
 0x2fc   : > { %vm1887_vm2 = vcmp.lt.s32.totalorder %v5434_v46, 200  ;;  %v1995_v12 = vadd.f32 %v1994_v48, %v1941_v41  ;;  %v2016_v49 = vadd.f32 %v2015_v44, %v1942_v40  ;;  %v2037_v63 = vadd.f32 %v2036_v51, %v1943_v60  ;;  %v7193_v60 = vld [vmem:[#allocation44_spill] sm:$0xff]  ;;  %v7194_v48 = vld [vmem:[#allocation46_spill] sm:$0xff]  ;;  %v7195_v51 = vld [vmem:[#allocation45_spill] sm:$0xff] }
 0x2fd   : > { %v2058_v21 = vadd.f32 %v2057_v0, %v1944_v27  ;;  %v1950_v1 = vsel %vm1882_vm13, %v7190_v29, 0.0  ;;  %v1951_v30 = vsel %vm1882_vm13, %v7191_v35, 0.0  ;;  %v1952_v59 = vsel %vm1882_vm13, %v7192_v18, 0.0  ;;  %v7212_v23 = vld [vmem:[#allocation63_spill] sm:$0xff] }
 0x2fe   : > { %3648 = vrcp.f32 %v2387_v13  ;;  %vm1888_vm3 = vcmp.lt.s32.totalorder %v5436_v54, 200  ;;  %v1996_v36 = vadd.f32 %v1995_v12, %v1945_v53  ;;  %v2017_v41 = vadd.f32 %v2016_v49, %v1946_v43  ;;  %v7197_v12 = vld [vmem:[#allocation48_spill] sm:$0xff] }
 0x2ff   : > { %v2038_v40 = vadd.f32 %v2037_v63, %v1947_v33  ;;  %v2059_v19 = vadd.f32 %v2058_v21, %v1948_v25  ;;  %v1953_v27 = vsel %vm1883_vm14, %v7193_v60, 0.0  ;;  %v1954_v44 = vsel %vm1883_vm14, %v7194_v48, 0.0  ;;  %v7198_v63 = vld [vmem:[#allocation50_spill] sm:$0xff] }
 0x300   : > { %v1955_v0 = vsel %vm1883_vm14, %v7195_v51, 0.0  ;;  %v1956_v13 = vsel %vm1883_vm14, %v7196_v6, 0.0  ;;  %vm1889_vm4 = vcmp.lt.s32.totalorder %v5438_v5, 200  ;;  %v1997_v53 = vadd.f32 %v1996_v36, %v1949_v32  ;;  %v7201_v36 = vld [vmem:[#allocation52_spill] sm:$0xff]  ;;  %v7227_v5 = vld [vmem:[#allocation77_spill] sm:$0xff] }
 0x301   : > { %v2018_v43 = vadd.f32 %v2017_v41, %v1950_v1  ;;  %v2039_v33 = vadd.f32 %v2038_v40, %v1951_v30  ;;  %v2060_v25 = vadd.f32 %v2059_v19, %v1952_v59  ;;  %v1957_v49 = vsel %vm1884_vm15, %v7197_v12, 0.0  ;;  %v7202_v40 = vld [vmem:[#allocation54_spill] sm:$0xff] }
 0x302   : > { %v1958_v21 = vsel %vm1884_vm15, %v7198_v63, 0.0  ;;  %v1959_v61 = vsel %vm1884_vm15, %v7199_v17, 0.0  ;;  %v1960_v34 = vsel %vm1884_vm15, %v7200_v31, 0.0  ;;  %vm1890_vm5 = vcmp.lt.s32.totalorder %v5441_v50, 200 }
 0x303   : > { %v1998_v32 = vadd.f32 %v1997_v53, %v1953_v27  ;;  %v2019_v1 = vadd.f32 %v2018_v43, %v1954_v44  ;;  %v2040_v30 = vadd.f32 %v2039_v33, %v1955_v0  ;;  %v2061_v59 = vadd.f32 %v2060_v25, %v1956_v13  ;;  %v7205_v53 = vld [vmem:[#allocation56_spill] sm:$0xff]  ;;  %v7206_v33 = vld [vmem:[#allocation58_spill] sm:$0xff] }
 0x304   : > { %v1961_v41 = vsel %vm1885_vm0, %v7201_v36, 0.0  ;;  %v1962_v19 = vsel %vm1885_vm0, %v7202_v40, 0.0  ;;  %v1963_v55 = vsel %vm1885_vm0, %v7203_v4, 0.0  ;;  %v1964_v31 = vsel %vm1885_vm0, %v7204_v26, 0.0  ;;  %v7207_v40 = vld [vmem:[#allocation57_spill] sm:$0xff] }
 0x305   : > { %vm1891_vm6 = vcmp.lt.s32.totalorder %v5443_v15, 200  ;;  %v1999_v27 = vadd.f32 %v1998_v32, %v1957_v49  ;;  %v2020_v44 = vadd.f32 %v2019_v1, %v1958_v21  ;;  %v2041_v0 = vadd.f32 %v2040_v30, %v1959_v61  ;;  %v7209_v32 = vld [vmem:[#allocation60_spill] sm:$0xff]  ;;  %v7210_v30 = vld [vmem:[#allocation62_spill] sm:$0xff] }
 0x306   : > { %v2062_v13 = vadd.f32 %v2061_v59, %v1960_v34  ;;  %v1965_v43 = vsel %vm1886_vm1, %v7205_v53, 0.0  ;;  %v1966_v25 = vsel %vm1886_vm1, %v7206_v33, 0.0  ;;  %v1967_v4 = vsel %vm1886_vm1, %v7207_v40, 0.0  ;;  %v7211_v33 = vld [vmem:[#allocation61_spill] sm:$0xff] }
 0x307   : > { %v1968_v26 = vsel %vm1886_vm1, %v7208_v3, 0.0  ;;  %vm1892_vm7 = vcmp.lt.s32.totalorder %v5445_v57, 200  ;;  %v2000_v61 = vadd.f32 %v1999_v27, %v1961_v41  ;;  %v2021_v34 = vadd.f32 %v2020_v44, %v1962_v19  ;;  %v7213_v27 = vld [vmem:[#allocation64_spill] sm:$0xff] }
 0x308   : > { %v2042_v49 = vadd.f32 %v2041_v0, %v1963_v55  ;;  %v2063_v21 = vadd.f32 %v2062_v13, %v1964_v31  ;;  %v1969_v1 = vsel %vm1887_vm2, %v7209_v32, 0.0  ;;  %v1970_v59 = vsel %vm1887_vm2, %v7210_v30, 0.0  ;;  %v7214_v0 = vld [vmem:[#allocation66_spill] sm:$0xff]  ;;  %v7215_v30 = vld [vmem:[#allocation65_spill] sm:$0xff]  ;;  %v7216_v32 = vld [vmem:[#allocation67_spill] sm:$0xff] }
 0x309   : > { %v1971_v40 = vsel %vm1887_vm2, %v7211_v33, 0.0  ;;  %v1972_v3 = vsel %vm1887_vm2, %v7212_v23, 0.0  ;;  %v2001_v41 = vadd.f32 %v2000_v61, %v1965_v43  ;;  %v2022_v19 = vadd.f32 %v2021_v34, %v1966_v25  ;;  %v7217_v34 = vld [vmem:[#allocation68_spill] sm:$0xff]  ;;  %v7220_v23 = vld [vmem:[#allocation71_spill] sm:$0xff] }
 0x30a   : > { %v2043_v55 = vadd.f32 %v2042_v49, %v1967_v4  ;;  %v2064_v31 = vadd.f32 %v2063_v21, %v1968_v26  ;;  %v1973_v44 = vsel %vm1888_vm3, %v7213_v27, 0.0  ;;  %v1974_v13 = vsel %vm1888_vm3, %v7214_v0, 0.0  ;;  %v7218_v21 = vld [vmem:[#allocation70_spill] sm:$0xff]  ;;  %v7219_v27 = vld [vmem:[#allocation69_spill] sm:$0xff] }
 0x30b   : > { %v1975_v33 = vsel %vm1888_vm3, %v7215_v30, 0.0  ;;  %v1976_v46 = vsel %vm1888_vm3, %v7216_v32, 0.0  ;;  %v3649_v43 = vpop.eup %3648  ;;  %v2002_v25 = vadd.f32 %v2001_v41, %v1969_v1  ;;  %v2023_v4 = vadd.f32 %v2022_v19, %v1970_v59  ;;  %v7221_v41 = vld [vmem:[#allocation72_spill] sm:$0xff] }
 0x30c   : > { %v2044_v26 = vadd.f32 %v2043_v55, %v1971_v40  ;;  %v2065_v61 = vadd.f32 %v2064_v31, %v1972_v3  ;;  %v1977_v49 = vsel %vm1889_vm4, %v7217_v34, 0.0  ;;  %v1978_v0 = vsel %vm1889_vm4, %v7218_v21, 0.0  ;;  %3545 = vpush %v3649_v43  ;;  %v7222_v55 = vld [vmem:[#allocation74_spill] sm:$0xff]  ;;  %v7223_v21 = vld [vmem:[#allocation73_spill] sm:$0xff]  ;;  %v7224_v34 = vld [vmem:[#allocation75_spill] sm:$0xff] }
 0x30d   : > { %v1979_v30 = vsel %vm1889_vm4, %v7219_v27, 0.0  ;;  %v1980_v54 = vsel %vm1889_vm4, %v7220_v23, 0.0  ;;  %v2003_v1 = vadd.f32 %v2002_v25, %v1973_v44  ;;  %v2024_v40 = vadd.f32 %v2023_v4, %v1974_v13  ;;  %v7225_v25 = vld [vmem:[#allocation76_spill] sm:$0xff] }
 0x30e   : > { %v2045_v3 = vadd.f32 %v2044_v26, %v1975_v33  ;;  %v2066_v59 = vadd.f32 %v2065_v61, %v1976_v46  ;;  %v1981_v19 = vsel %vm1890_vm5, %v7221_v41, 0.0  ;;  %v1982_v31 = vsel %vm1890_vm5, %v7222_v55, 0.0  ;;  %v7226_v26 = vld [vmem:[#allocation78_spill] sm:$0xff]  ;;  %v7228_v55 = vld [vmem:[#allocation79_spill] sm:$0xff] }
 0x30f   : > { %v1983_v27 = vsel %vm1890_vm5, %v7223_v21, 0.0  ;;  %v1984_v43 = vsel %vm1890_vm5, %v7224_v34, 0.0  ;;  %v2004_v44 = vadd.f32 %v2003_v1, %v1977_v49  ;;  %v2025_v13 = vadd.f32 %v2024_v40, %v1978_v0  ;;  %v7229_v40 = vld [vmem:[#allocation80_spill] sm:$0xff] }
 0x310   : > { %v2046_v33 = vadd.f32 %v2045_v3, %v1979_v30  ;;  %v2067_v46 = vadd.f32 %v2066_v59, %v1980_v54  ;;  %v1985_v4 = vsel %vm1891_vm6, %v7225_v25, 0.0  ;;  %v1986_v61 = vsel %vm1891_vm6, %v7226_v26, 0.0  ;;  %v7230_v59 = vld [vmem:[#allocation82_spill] sm:$0xff]  ;;  %v7231_v26 = vld [vmem:[#allocation81_spill] sm:$0xff]  ;;  %v7232_v25 = vld [vmem:[#allocation83_spill] sm:$0xff] }
 0x311   : > { %v1987_v21 = vsel %vm1891_vm6, %v7227_v5, 0.0  ;;  %v1988_v49 = vsel %vm1891_vm6, %v7228_v55, 0.0  ;;  %v2005_v0 = vadd.f32 %v2004_v44, %v1981_v19  ;;  %v2026_v30 = vadd.f32 %v2025_v13, %v1982_v31 }
 0x312   : > { %v2047_v54 = vadd.f32 %v2046_v33, %v1983_v27  ;;  %v2068_v1 = vadd.f32 %v2067_v46, %v1984_v43  ;;  %v1989_v3 = vsel %vm1892_vm7, %v7229_v40, 0.0  ;;  %v1990_v50 = vsel %vm1892_vm7, %v7230_v59, 0.0 }
 0x313   : > { %v1991_v5 = vsel %vm1892_vm7, %v7231_v26, 0.0  ;;  %v1992_v15 = vsel %vm1892_vm7, %v7232_v25, 0.0  ;;  %v2006_v19 = vadd.f32 %v2005_v0, %v1985_v4  ;;  %v2027_v31 = vadd.f32 %v2026_v30, %v1986_v61 }
 0x314   : > { %v2048_v27 = vadd.f32 %v2047_v54, %v1987_v21  ;;  %v2069_v43 = vadd.f32 %v2068_v1, %v1988_v49  ;;  %v2077_v44 = vstv %s5452_s29  ;;  %v3785_v1 = vmov 1966171168  }
 0x315   : > { %v2007_v13 = vadd.f32 %v2006_v19, %v1989_v3  ;;  %v2028_v33 = vadd.f32 %v2027_v31, %v1990_v50  ;;  %3650 = vrcp.f32 %v2077_v44  ;;  %v2403_v3 = vunpack.c.l.s4 %v3785_v1  ;;  %v7250_v1 = vld [vmem:[#allocation63_spill] sm:$0xff] }
 0x316   : > { %v2049_v46 = vadd.f32 %v2048_v27, %v1991_v5  ;;  %v2070_v40 = vadd.f32 %v2069_v43, %v1992_v15  ;;  %v7241_v43 = vld [vmem:[#allocation53_spill] sm:$0xff] }
 0x317   : > { %v2008_v55 = vrot.slane %v2007_v13, 4  ;;  %v2029_v34 = vrot.slane %v2028_v33, 4 }
 0x318   : > { %v2050_v59 = vrot.slane %v2049_v46, 4  ;;  %v2071_v41 = vrot.slane %v2070_v40, 4 }
 0x319   : > { %v2009_v23 = vadd.f32 %v2008_v55, %v2007_v13  ;;  %v2030_v26 = vadd.f32 %v2029_v34, %v2028_v33  ;;  %v7240_v13 = vld [vmem:[#allocation54_spill] sm:$0xff] }
 0x31a   : > { %v2051_v32 = vadd.f32 %v2050_v59, %v2049_v46  ;;  %v2072_v53 = vadd.f32 %v2071_v41, %v2070_v40  ;;  %v5661_v41 = vld [vmem:[#allocation4] sm:$0xf]  ;;  %v2404_v40 = vunpack.c.0.s8 %v2403_v3  ;;  %v7246_v46 = vld [vmem:[#allocation59_spill] sm:$0xff]  ;;  %v7249_v3 = vld [vmem:[#allocation61_spill] sm:$0xff] }
 0x31b   : > { %v2010_v57 = vrot.slane %v2009_v23, 2  ;;  %v2031_v25 = vrot.slane %v2030_v26, 2  ;;  %7233 = vst [vmem:[#allocation120_spill] sm:$0xff] %v5661_v41  ;;  %v7266_v41 = vld [vmem:[#allocation79_spill] sm:$0xff] }
 0x31c   : > { %v2052_v4 = vrot.slane %v2051_v32, 2  ;;  %v2073_v61 = vrot.slane %v2072_v53, 2 }
 0x31d   : > { %v2011_v21 = vadd.f32 %v2010_v57, %v2009_v23  ;;  %v2032_v49 = vadd.f32 %v2031_v25, %v2030_v26  ;;  %v7242_v25 = vld [vmem:[#allocation55_spill] sm:$0xff] }
 0x31e   : > { %v2053_v0 = vadd.f32 %v2052_v4, %v2051_v32  ;;  %v2074_v30 = vadd.f32 %v2073_v61, %v2072_v53  ;;  %v5680_v4 = vsub.s32 %v2404_v40, %v7151_v16  ;;  %v7239_v40 = vld [vmem:[#allocation51_spill] sm:$0xff]  ;;  %v7265_v32 = vld [vmem:[#allocation77_spill] sm:$0xff]  ;;  %v7268_v16 = vld [vmem:[#allocation82_spill] sm:$0xff] }
 0x31f   : > { %v2012_v50 = vrot.slane %v2011_v21, 1  ;;  %v2033_v5 = vrot.slane %v2032_v49, 1 }
 0x320   : > { %v2054_v15 = vrot.slane %v2053_v0, 1  ;;  %v2075_v54 = vrot.slane %v2074_v30, 1  ;;  %7238 = vst [vmem:[#allocation121_spill] sm:$0xff] %v5680_v4 }
 0x321   : > { %v2013_v31 = vadd.f32 %v2012_v50, %v2011_v21  ;;  %v2034_v55 = vadd.f32 %v2033_v5, %v2032_v49  ;;  %v7267_v5 = vld [vmem:[#allocation80_spill] sm:$0xff]  ;;  %v7269_v50 = vld [vmem:[#allocation81_spill] sm:$0xff] }
 0x322   : > { %v3651_v19 = vpop.eup %3650  ;;  %v2055_v34 = vadd.f32 %v2054_v15, %v2053_v0  ;;  %v2076_v59 = vadd.f32 %v2075_v54, %v2074_v30  ;;  %v7251_v54 = vld [vmem:[#allocation64_spill] sm:$0xff]  ;;  %v7252_v15 = vld [vmem:[#allocation66_spill] sm:$0xff]  ;;  %v7270_v30 = vld [vmem:[#allocation83_spill] sm:$0xff] }
 0x323   : > { %v5663_v27 = vmul.f32 %v3651_v19, %v2013_v31  ;;  %v5665_v23 = vmul.f32 %v3651_v19, %v2034_v55  ;;  %v7245_v55 = vld [vmem:[#allocation57_spill] sm:$0xff]  ;;  %v7247_v31 = vld [vmem:[#allocation60_spill] sm:$0xff] }
 0x324   : > { %v5667_v57 = vmul.f32 %v3651_v19, %v2055_v34  ;;  %v5669_v53 = vmul.f32 %v3651_v19, %v2076_v59  ;;  %v7243_v34 = vld [vmem:[#allocation56_spill] sm:$0xff]  ;;  %v7244_v59 = vld [vmem:[#allocation58_spill] sm:$0xff] }
 0x325   : > { %v7248_v19 = vld [vmem:[#allocation62_spill] sm:$0xff]  ;;  %v7271_v0 = vsub.f32 %v7169_v20, %v5663_v27  ;;  %v7273_v21 = vsub.f32 %v7170_v7, %v5665_v23  ;;  %v7276_v7 = vsub.f32 %v7173_v39, %v5663_v27 }
 0x326   : > { %v7274_v33 = vsub.f32 %v7171_v58, %v5667_v57  ;;  %v7275_v20 = vsub.f32 %v7172_v11, %v5669_v53  ;;  %v7278_v58 = vsub.f32 %v7174_v28, %v5665_v23  ;;  %v7279_v11 = vsub.f32 %v7175_v9, %v5667_v57 }
 0x327   : > { %v5815_v49 = vsel %vm1877_vm8, %v7271_v0, 0.0  ;;  %v5822_v61 = vsel %vm1877_vm8, %v7273_v21, 0.0  ;;  %v5843_v21 = vsel %vm1878_vm9, %v7276_v7, 0.0  ;;  %v7280_v39 = vsub.f32 %v7176_v45, %v5669_v53 }
 0x328   : > { %v5829_v44 = vsel %vm1877_vm8, %v7274_v33, 0.0  ;;  %v5836_v0 = vsel %vm1877_vm8, %v7275_v20, 0.0  ;;  %v5850_v33 = vsel %vm1878_vm9, %v7278_v58, 0.0  ;;  %v5857_v26 = vsel %vm1878_vm9, %v7279_v11, 0.0 }
 0x329   : > { %v5864_v20 = vsel %vm1878_vm9, %v7280_v39, 0.0  ;;  %v7281_v28 = vsub.f32 %v7177_v37, %v5663_v27  ;;  %v7283_v9 = vsub.f32 %v7178_v56, %v5665_v23  ;;  %v7284_v45 = vsub.f32 %v7179_v52, %v5667_v57 }
 0x32a   : > { %v7285_v37 = vsub.f32 %v7180_v10, %v5669_v53  ;;  %v7286_v56 = vsub.f32 %v7181_v24, %v5663_v27  ;;  %v7288_v52 = vsub.f32 %v7182_v14, %v5665_v23  ;;  %v7289_v10 = vsub.f32 %v7183_v62, %v5667_v57 }
 0x32b   : > { %v5871_v58 = vsel %vm1879_vm10, %v7281_v28, 0.0  ;;  %v5878_v11 = vsel %vm1879_vm10, %v7283_v9, 0.0  ;;  %v5885_v4 = vsel %vm1879_vm10, %v7284_v45, 0.0  ;;  %v7290_v24 = vsub.f32 %v7184_v2, %v5669_v53 }
 0x32c   : > { %v5892_v39 = vsel %vm1879_vm10, %v7285_v37, 0.0  ;;  %v5899_v9 = vsel %vm1880_vm11, %v7286_v56, 0.0  ;;  %v5906_v45 = vsel %vm1880_vm11, %v7288_v52, 0.0  ;;  %v5913_v7 = vsel %vm1880_vm11, %v7289_v10, 0.0 }
 0x32d   : > { %v5920_v37 = vsel %vm1880_vm11, %v7290_v24, 0.0  ;;  %v7291_v14 = vsub.f32 %v7185_v47, %v5663_v27  ;;  %v7293_v62 = vsub.f32 %v7186_v22, %v5665_v23  ;;  %v7294_v2 = vsub.f32 %v7187_v42, %v5667_v57 }
 0x32e   : > { %v7295_v47 = vsub.f32 %v7188_v38, %v5669_v53  ;;  %v7296_v22 = vsub.f32 %v7189_v8, %v5663_v27  ;;  %v7298_v42 = vsub.f32 %v7190_v29, %v5665_v23  ;;  %v7299_v38 = vsub.f32 %v7191_v35, %v5667_v57 }
 0x32f   : > { %v5927_v52 = vsel %vm1881_vm12, %v7291_v14, 0.0  ;;  %v5934_v10 = vsel %vm1881_vm12, %v7293_v62, 0.0  ;;  %v5941_v28 = vsel %vm1881_vm12, %v7294_v2, 0.0  ;;  %v7300_v8 = vsub.f32 %v7192_v18, %v5669_v53 }
 0x330   : > { %v5948_v24 = vsel %vm1881_vm12, %v7295_v47, 0.0  ;;  %v5955_v62 = vsel %vm1882_vm13, %v7296_v22, 0.0  ;;  %v5962_v2 = vsel %vm1882_vm13, %v7298_v42, 0.0  ;;  %v5969_v56 = vsel %vm1882_vm13, %v7299_v38, 0.0 }
 0x331   : > { %v5976_v47 = vsel %vm1882_vm13, %v7300_v8, 0.0  ;;  %v7301_v29 = vsub.f32 %v7193_v60, %v5663_v27  ;;  %v7303_v35 = vsub.f32 %v7194_v48, %v5665_v23  ;;  %v7304_v18 = vsub.f32 %v7195_v51, %v5667_v57 }
 0x332   : > { %v7305_v60 = vsub.f32 %v7196_v6, %v5669_v53  ;;  %v7306_v48 = vsub.f32 %v7197_v12, %v5663_v27  ;;  %v7308_v51 = vsub.f32 %v7198_v63, %v5665_v23  ;;  %v7309_v6 = vsub.f32 %v7199_v17, %v5667_v57 }
 0x333   : > { %v5983_v42 = vsel %vm1883_vm14, %v7301_v29, 0.0  ;;  %v5990_v38 = vsel %vm1883_vm14, %v7303_v35, 0.0  ;;  %v5997_v14 = vsel %vm1883_vm14, %v7304_v18, 0.0  ;;  %v7310_v12 = vsub.f32 %v7239_v40, %v5669_v53 }
 0x334   : > { %v6004_v8 = vsel %vm1883_vm14, %v7305_v60, 0.0  ;;  %v6011_v35 = vsel %vm1884_vm15, %v7306_v48, 0.0  ;;  %v6018_v18 = vsel %vm1884_vm15, %v7308_v51, 0.0  ;;  %v6025_v22 = vsel %vm1884_vm15, %v7309_v6, 0.0 }
 0x335   : > { %v6032_v60 = vsel %vm1884_vm15, %v7310_v12, 0.0  ;;  %v7311_v63 = vsub.f32 %v7201_v36, %v5663_v27  ;;  %v7313_v17 = vsub.f32 %v7240_v13, %v5665_v23  ;;  %v7314_v40 = vsub.f32 %v7241_v43, %v5667_v57 }
 0x336   : > { %v7315_v36 = vsub.f32 %v7242_v25, %v5669_v53  ;;  %v7316_v13 = vsub.f32 %v7243_v34, %v5663_v27  ;;  %v7318_v43 = vsub.f32 %v7244_v59, %v5665_v23  ;;  %v7319_v25 = vsub.f32 %v7245_v55, %v5667_v57 }
 0x337   : > { %v6039_v51 = vsel %vm1885_vm0, %v7311_v63, 0.0  ;;  %v6046_v6 = vsel %vm1885_vm0, %v7313_v17, 0.0  ;;  %v6053_v29 = vsel %vm1885_vm0, %v7314_v40, 0.0  ;;  %v7320_v34 = vsub.f32 %v7246_v46, %v5669_v53 }
 0x338   : > { %v6060_v12 = vsel %vm1885_vm0, %v7315_v36, 0.0  ;;  %v6067_v17 = vsel %vm1886_vm1, %v7316_v13, 0.0  ;;  %v6074_v40 = vsel %vm1886_vm1, %v7318_v43, 0.0  ;;  %v6081_v48 = vsel %vm1886_vm1, %v7319_v25, 0.0 }
 0x339   : > { %v6088_v36 = vsel %vm1886_vm1, %v7320_v34, 0.0  ;;  %v7321_v59 = vsub.f32 %v7247_v31, %v5663_v27  ;;  %v7323_v55 = vsub.f32 %v7248_v19, %v5665_v23  ;;  %v7324_v46 = vsub.f32 %v7249_v3, %v5667_v57 }
 0x33a   : > { %v7326_v31 = vsub.f32 %v7250_v1, %v5669_v53  ;;  %v7328_v19 = vsub.f32 %v7251_v54, %v5663_v27  ;;  %v7331_v3 = vsub.f32 %v7252_v15, %v5665_v23 }
 0x33b   : > { %v6095_v43 = vsel %vm1887_vm2, %v7321_v59, 0.0  ;;  %v6102_v25 = vsel %vm1887_vm2, %v7323_v55, 0.0  ;;  %v6109_v63 = vsel %vm1887_vm2, %v7324_v46, 0.0 }
 0x33c   : > { %7325 = vst [vmem:[#allocation104_spill] sm:$0xff] %v6109_v63  ;;  %v6116_v34 = vsel %vm1887_vm2, %v7326_v31, 0.0  ;;  %v6123_v55 = vsel %vm1888_vm3, %v7328_v19, 0.0  ;;  %v6130_v46 = vsel %vm1888_vm3, %v7331_v3, 0.0  ;;  %v7333_v63 = vld [vmem:[#allocation65_spill] sm:$0xff]  ;;  %v7336_v31 = vld [vmem:[#allocation67_spill] sm:$0xff] }
 0x33d   : > { %7327 = vst [vmem:[#allocation105_spill] sm:$0xff] %v6116_v34  ;;  %7330 = vst [vmem:[#allocation106_spill] sm:$0xff] %v6123_v55  ;;  %v7334_v1 = vsub.f32 %v7333_v63, %v5667_v57  ;;  %v7337_v54 = vsub.f32 %v7336_v31, %v5669_v53  ;;  %v7339_v55 = vld [vmem:[#allocation68_spill] sm:$0xff]  ;;  %s6298_s17 = spop %3545 }
 0x33e   : > { %7332 = vst [vmem:[#allocation107_spill] sm:$0xff] %v6130_v46  ;;  %v7340_v15 = vsub.f32 %v7339_v55, %v5663_v27  ;;  %v7343_v46 = vld [vmem:[#allocation70_spill] sm:$0xff]  ;;  %s2390_s0 = smul.f32 %s6298_s17, %s5452_s29 }
 0x33f   : > { %v6137_v13 = vsel %vm1888_vm3, %v7334_v1, 0.0  ;;  %v6144_v19 = vsel %vm1888_vm3, %v7337_v54, 0.0  ;;  %v7344_v63 = vsub.f32 %v7343_v46, %v5665_v23  ;;  %v7349_v54 = vld [vmem:[#allocation71_spill] sm:$0xff]  ;;  %s2470_s22 = smul.f32 %s6298_s17, %s6416_s1 }
 0x340   : > { %7335 = vst [vmem:[#allocation108_spill] sm:$0xff] %v6137_v13  ;;  %7338 = vst [vmem:[#allocation109_spill] sm:$0xff] %v6144_v19  ;;  %v6151_v3 = vsel %vm1889_vm4, %v7340_v15, 0.0  ;;  %v7346_v13 = vld [vmem:[#allocation69_spill] sm:$0xff]  ;;  %v7350_v55 = vsub.f32 %v7349_v54, %v5669_v53 }
 0x341   : > { %7342 = vst [vmem:[#allocation110_spill] sm:$0xff] %v6151_v3  ;;  %v6158_v1 = vsel %vm1889_vm4, %v7344_v63, 0.0  ;;  %v7347_v31 = vsub.f32 %v7346_v13, %v5667_v57  ;;  %v7352_v3 = vld [vmem:[#allocation72_spill] sm:$0xff] }
 0x342   : > { %7345 = vst [vmem:[#allocation111_spill] sm:$0xff] %v6158_v1  ;;  %v6172_v15 = vsel %vm1889_vm4, %v7350_v55, 0.0  ;;  %v7353_v46 = vsub.f32 %v7352_v3, %v5663_v27  ;;  %v7356_v1 = vld [vmem:[#allocation74_spill] sm:$0xff]  ;;  %v7361_v55 = vld [vmem:[#allocation75_spill] sm:$0xff] }
 0x343   : > { %v6165_v59 = vsel %vm1889_vm4, %v7347_v31, 0.0  ;;  %7351 = vst [vmem:[#allocation113_spill] sm:$0xff] %v6172_v15  ;;  %v7357_v13 = vsub.f32 %v7356_v1, %v5665_v23  ;;  %v7362_v3 = vsub.f32 %v7361_v55, %v5669_v53  ;;  %v7368_v55 = vsub.f32 %v7265_v32, %v5667_v57 }
 0x344   : > { %7348 = vst [vmem:[#allocation112_spill] sm:$0xff] %v6165_v59  ;;  %v6179_v63 = vsel %vm1890_vm5, %v7353_v46, 0.0  ;;  %v7359_v59 = vld [vmem:[#allocation73_spill] sm:$0xff]  ;;  %v7373_v32 = vsub.f32 %v7268_v16, %v5665_v23  ;;  %v2211_v16 = vmul.f32 %v5815_v49, %v5815_v49  ;;  %v2218_v49 = vmul.f32 %v5864_v20, %v5864_v20 }
 0x345   : > { %7355 = vst [vmem:[#allocation114_spill] sm:$0xff] %v6179_v63  ;;  %v6186_v31 = vsel %vm1890_vm5, %v7357_v13, 0.0  ;;  %v7360_v54 = vsub.f32 %v7359_v59, %v5667_v57  ;;  %v6200_v46 = vsel %vm1890_vm5, %v7362_v3, 0.0  ;;  %v7363_v63 = vld [vmem:[#allocation76_spill] sm:$0xff]  ;;  %v6221_v19 = vsel %vm1891_vm6, %v7368_v55, 0.0 }
 0x346   : > { %7358 = vst [vmem:[#allocation115_spill] sm:$0xff] %v6186_v31  ;;  %v7364_v1 = vsub.f32 %v7363_v63, %v5663_v27  ;;  %v7366_v31 = vld [vmem:[#allocation78_spill] sm:$0xff]  ;;  %v7369_v63 = vsub.f32 %v7266_v41, %v5669_v53  ;;  %v6242_v55 = vsel %vm1892_vm7, %v7373_v32, 0.0  ;;  %v7375_v41 = vsub.f32 %v7269_v50, %v5667_v57 }
 0x347   : > { %v6193_v34 = vsel %vm1890_vm5, %v7360_v54, 0.0  ;;  %v7367_v59 = vsub.f32 %v7366_v31, %v5665_v23  ;;  %v7370_v31 = vsub.f32 %v7267_v5, %v5663_v27  ;;  %7374 = vst [vmem:[#allocation117_spill] sm:$0xff] %v6242_v55  ;;  %v7377_v5 = vsub.f32 %v7270_v30, %v5669_v53  ;;  %v7380_v55 = vld [vmem:[#allocation16_spill] sm:$0xff] }
 0x348   : > { %v6207_v13 = vsel %vm1891_vm6, %v7364_v1, 0.0  ;;  %v6228_v3 = vsel %vm1891_vm6, %v7369_v63, 0.0  ;;  %v6249_v15 = vsel %vm1892_vm7, %v7375_v41, 0.0  ;;  %v2213_v50 = vmul.f32 %v5829_v44, %v5829_v44 }
 0x349   : > { %v6214_v54 = vsel %vm1891_vm6, %v7367_v59, 0.0  ;;  %v6235_v59 = vsel %vm1892_vm7, %v7370_v31, 0.0  ;;  %7376 = vst [vmem:[#allocation118_spill] sm:$0xff] %v6249_v15  ;;  %v6256_v63 = vsel %vm1892_vm7, %v7377_v5, 0.0  ;;  %v2212_v31 = vmul.f32 %v5822_v61, %v5822_v61  ;;  %v7379_v15 = vld [vmem:[#allocation120_spill] sm:$0xff] }
 0x34a   : > { %7372 = vst [vmem:[#allocation116_spill] sm:$0xff] %v6235_v59  ;;  %7378 = vst [vmem:[#allocation119_spill] sm:$0xff] %v6256_v63  ;;  %v2214_v32 = vmul.f32 %v5836_v0, %v5836_v0  ;;  %v2215_v41 = vmul.f32 %v5843_v21, %v5843_v21  ;;  %v2216_v30 = vmul.f32 %v5850_v33, %v5850_v33 }
 0x34b   : > { %v2217_v1 = vmul.f32 %v5857_v26, %v5857_v26  ;;  %v2219_v61 = vmul.f32 %v5871_v58, %v5871_v58  ;;  %v2220_v44 = vmul.f32 %v5878_v11, %v5878_v11  ;;  %v2221_v0 = vmul.f32 %v5885_v4, %v5885_v4 }
 0x34c   : > { %v2222_v21 = vmul.f32 %v5892_v39, %v5892_v39  ;;  %v2223_v33 = vmul.f32 %v5899_v9, %v5899_v9  ;;  %v2224_v26 = vmul.f32 %v5906_v45, %v5906_v45  ;;  %v2225_v20 = vmul.f32 %v5913_v7, %v5913_v7 }
 0x34d   : > { %v2226_v58 = vmul.f32 %v5920_v37, %v5920_v37  ;;  %v2227_v11 = vmul.f32 %v5927_v52, %v5927_v52  ;;  %v2228_v4 = vmul.f32 %v5934_v10, %v5934_v10  ;;  %v2229_v39 = vmul.f32 %v5941_v28, %v5941_v28 }
 0x34e   : > { %v2230_v9 = vmul.f32 %v5948_v24, %v5948_v24  ;;  %v2231_v45 = vmul.f32 %v5955_v62, %v5955_v62  ;;  %v2232_v7 = vmul.f32 %v5962_v2, %v5962_v2  ;;  %v2233_v37 = vmul.f32 %v5969_v56, %v5969_v56 }
 0x34f   : > { %v2234_v52 = vmul.f32 %v5976_v47, %v5976_v47  ;;  %v2235_v10 = vmul.f32 %v5983_v42, %v5983_v42  ;;  %v2236_v28 = vmul.f32 %v5990_v38, %v5990_v38  ;;  %v2237_v24 = vmul.f32 %v5997_v14, %v5997_v14 }
 0x350   : > { %v2238_v62 = vmul.f32 %v6004_v8, %v6004_v8  ;;  %v2239_v2 = vmul.f32 %v6011_v35, %v6011_v35  ;;  %v2240_v56 = vmul.f32 %v6018_v18, %v6018_v18  ;;  %v2241_v47 = vmul.f32 %v6025_v22, %v6025_v22 }
 0x351   : > { %v2242_v42 = vmul.f32 %v6032_v60, %v6032_v60  ;;  %v2275_v38 = vadd.f32 %v2215_v41, %v2211_v16  ;;  %v2296_v5 = vadd.f32 %v2216_v30, %v2212_v31  ;;  %v2317_v63 = vadd.f32 %v2217_v1, %v2213_v50 }
 0x352   : > { %v2338_v14 = vadd.f32 %v2218_v49, %v2214_v32  ;;  %v2243_v8 = vmul.f32 %v6039_v51, %v6039_v51  ;;  %v2244_v35 = vmul.f32 %v6046_v6, %v6046_v6  ;;  %v2245_v18 = vmul.f32 %v6053_v29, %v6053_v29  ;;  %v7382_v32 = vld [vmem:[#allocation18_spill] sm:$0xff]  ;;  %v7384_v6 = vld [vmem:[#allocation17_spill] sm:$0xff] }
 0x353   : > { %v7381_v22 = vrot.slane %v7379_v15, %v7380_v55  ;;  %v2276_v60 = vadd.f32 %v2275_v38, %v2219_v61  ;;  %v2297_v16 = vadd.f32 %v2296_v5, %v2220_v44  ;;  %v2318_v31 = vadd.f32 %v2317_v63, %v2221_v0  ;;  %v7386_v55 = vld [vmem:[#allocation19_spill] sm:$0xff] }
 0x354   : > { %v2339_v50 = vadd.f32 %v2338_v14, %v2222_v21  ;;  %v7383_v41 = vrot.slane %v7379_v15, %v7382_v32  ;;  %v7385_v30 = vrot.slane %v7379_v15, %v7384_v6  ;;  %v2391_v63 = vstv %s2390_s0 }
 0x355   : > { %v6336_v59 = vsub.f32 %v5663_v27, %v7381_v22  ;;  %v7387_v27 = vrot.slane %v7379_v15, %v7386_v55  ;;  %v2277_v49 = vadd.f32 %v2276_v60, %v2223_v33  ;;  %v2298_v61 = vadd.f32 %v2297_v16, %v2224_v26 }
 0x356   : > { %v6342_v51 = vsub.f32 %v5665_v23, %v7383_v41  ;;  %v6348_v29 = vsub.f32 %v5667_v57, %v7385_v30  ;;  %v2319_v44 = vadd.f32 %v2318_v31, %v2225_v20  ;;  %v2340_v0 = vadd.f32 %v2339_v50, %v2226_v58 }
 0x357   : > { %v6354_v1 = vsub.f32 %v5669_v53, %v7387_v27  ;;  %v2392_v23 = vmul.f32 %v2391_v63, %v6336_v59  ;;  %v2278_v5 = vadd.f32 %v2277_v49, %v2227_v11  ;;  %v2299_v14 = vadd.f32 %v2298_v61, %v2228_v4  ;;  %v7392_v49 = vld [vmem:[#allocation104_spill] sm:$0xff] }
 0x358   : > { %v2393_v21 = vmul.f32 %v2391_v63, %v6342_v51  ;;  %v2394_v38 = vmul.f32 %v2391_v63, %v6348_v29  ;;  %v2320_v22 = vadd.f32 %v2319_v44, %v2229_v39  ;;  %v2341_v32 = vadd.f32 %v2340_v0, %v2230_v9  ;;  %v7391_v9 = vld [vmem:[#allocation121_spill] sm:$0xff] }
 0x359   : > { %v2395_v57 = vmul.f32 %v2391_v63, %v6354_v1  ;;  %v7388_v41 = vlaneseq  ;;  %v2246_v33 = vmul.f32 %v6060_v12, %v6060_v12  ;;  %v2247_v26 = vmul.f32 %v6067_v17, %v6067_v17 }
 0x35a   : > { %v2400_v20 = vcombine.low %v2392_v23, %v2393_v21  ;;  %v2279_v60 = vadd.f32 %v2278_v5, %v2231_v45  ;;  %v2300_v16 = vadd.f32 %v2299_v14, %v2232_v7  ;;  %v2321_v31 = vadd.f32 %v2320_v22, %v2233_v37  ;;  %v7395_v23 = vld [vmem:[#allocation107_spill] sm:$0xff] }
 0x35b   : > { %vm6361_vm8 = vcmp.lt.s32.totalorder %v7388_v41, 512  ;;  %v2401_v58 = vcombine.low %v2394_v38, %v2395_v57  ;;  %v2342_v11 = vadd.f32 %v2341_v32, %v2234_v52  ;;  %v2248_v4 = vmul.f32 %v6074_v40, %v6074_v40  ;;  %v7399_v22 = vld [vmem:[#allocation111_spill] sm:$0xff]  ;;  %v7400_v41 = vld [vmem:[#allocation112_spill] sm:$0xff] }
 0x35c   : > { %v2249_v39 = vmul.f32 %v6081_v48, %v6081_v48  ;;  %v2408_v50 = vrot.slane %v2400_v20, %v7391_v9  ;;  %v2280_v12 = vadd.f32 %v2279_v60, %v2235_v10  ;;  %v2301_v30 = vadd.f32 %v2300_v16, %v2236_v28  ;;  %v7393_v28 = vld [vmem:[#allocation105_spill] sm:$0xff] }
 0x35d   : > { %v2415_v6 = vrot.slane %v2401_v58, %v7391_v9  ;;  %v2322_v55 = vadd.f32 %v2321_v31, %v2237_v24  ;;  %v2343_v17 = vadd.f32 %v2342_v11, %v2238_v62  ;;  %v2250_v45 = vmul.f32 %v6088_v36, %v6088_v36  ;;  %v7394_v62 = vld [vmem:[#allocation106_spill] sm:$0xff]  ;;  %v7401_v20 = vld [vmem:[#allocation113_spill] sm:$0xff] }
 0x35e   : > { %v2251_v7 = vmul.f32 %v6095_v43, %v6095_v43  ;;  %v2252_v40 = vmul.f32 %v6102_v25, %v6102_v25  ;;  %v2281_v52 = vadd.f32 %v2280_v12, %v2239_v2  ;;  %v2302_v48 = vadd.f32 %v2301_v30, %v2240_v56  ;;  %v7396_v56 = vld [vmem:[#allocation108_spill] sm:$0xff]  ;;  %v7402_v31 = vld [vmem:[#allocation114_spill] sm:$0xff] }
 0x35f   : > { %v2416_v37 = vcombine.low %v2408_v50, %v2415_v6  ;;  %v2323_v27 = vadd.f32 %v2322_v55, %v2241_v47  ;;  %v2344_v63 = vadd.f32 %v2343_v17, %v2242_v42  ;;  %v2253_v10 = vmul.f32 %v7392_v49, %v7392_v49  ;;  %v7397_v42 = vld [vmem:[#allocation109_spill] sm:$0xff] }
 0x360   : > { %v2254_v24 = vmul.f32 %v7393_v28, %v7393_v28  ;;  %v2255_v36 = vmul.f32 %v7394_v62, %v7394_v62  ;;  %v2282_v43 = vadd.f32 %v2281_v52, %v2243_v8  ;;  %v2303_v44 = vadd.f32 %v2302_v48, %v2244_v35  ;;  %v7398_v35 = vld [vmem:[#allocation110_spill] sm:$0xff]  ;;  %v7405_v49 = vld [vmem:[#allocation117_spill] sm:$0xff] }
 0x361   : > { %v2423_v61 = vrot.slane %v2416_v37, %v7391_v9  ;;  %v2324_v0 = vadd.f32 %v2323_v27, %v2245_v18  ;;  %v2345_v25 = vadd.f32 %v2344_v63, %v2246_v33  ;;  %v2256_v2 = vmul.f32 %v7395_v23, %v7395_v23  ;;  %v7404_v27 = vld [vmem:[#allocation116_spill] sm:$0xff] }
 0x362   : > { %v2257_v47 = vmul.f32 %v7396_v56, %v7396_v56  ;;  %v2258_v21 = vmul.f32 %v7397_v42, %v7397_v42  ;;  %v2283_v57 = vadd.f32 %v2282_v43, %v2247_v26  ;;  %v2304_v5 = vadd.f32 %v2303_v44, %v2248_v4  ;;  %v7403_v4 = vld [vmem:[#allocation115_spill] sm:$0xff] }
 0x363   : > { %v2425_v38 = vadd.f32 %v2423_v61, %v7379_v15  ;;  %v2325_v14 = vadd.f32 %v2324_v0, %v2249_v39  ;;  %v2346_v8 = vadd.f32 %v2345_v25, %v2250_v45  ;;  %v2259_v18 = vmul.f32 %v7398_v35, %v7398_v35 }
 0x364   : > { %v2260_v32 = vmul.f32 %v7399_v22, %v7399_v22  ;;  %v2261_v33 = vmul.f32 %v7400_v41, %v7400_v41  ;;  %v2262_v58 = vmul.f32 %v7401_v20, %v7401_v20  ;;  %v2284_v15 = vadd.f32 %v2283_v57, %v2251_v7 }
 0x365   : > { %2430 = vst.msk [vmem:[#allocation4] sm:$0xf] %vm6361_vm8, %v2425_v38  ;;  %v2305_v26 = vadd.f32 %v2304_v5, %v2252_v40  ;;  %v2326_v60 = vadd.f32 %v2325_v14, %v2253_v10  ;;  %v2347_v16 = vadd.f32 %v2346_v8, %v2254_v24  ;;  %v2263_v11 = vmul.f32 %v7402_v31, %v7402_v31 }
 0x366   : > { %v2264_v39 = vmul.f32 %v7403_v4, %v7403_v4  ;;  %v2265_v50 = vmul.f32 %v6193_v34, %v6193_v34  ;;  %v2266_v6 = vmul.f32 %v6200_v46, %v6200_v46  ;;  %v2285_v12 = vadd.f32 %v2284_v15, %v2255_v36 }
 0x367   : > { %v2306_v30 = vadd.f32 %v2305_v26, %v2256_v2  ;;  %v2327_v55 = vadd.f32 %v2326_v60, %v2257_v47  ;;  %v2348_v17 = vadd.f32 %v2347_v16, %v2258_v21  ;;  %v2267_v45 = vmul.f32 %v6207_v13, %v6207_v13  ;;  %v7406_v13 = vld [vmem:[#allocation118_spill] sm:$0xff] }
 0x368   : > { %v2268_v7 = vmul.f32 %v6214_v54, %v6214_v54  ;;  %v2269_v34 = vmul.f32 %v6221_v19, %v6221_v19  ;;  %v2270_v46 = vmul.f32 %v6228_v3, %v6228_v3  ;;  %v2286_v40 = vadd.f32 %v2285_v12, %v2259_v18  ;;  %v7407_v54 = vld [vmem:[#allocation119_spill] sm:$0xff] }
 0x369   : > { %v2307_v37 = vadd.f32 %v2306_v30, %v2260_v32  ;;  %v2328_v52 = vadd.f32 %v2327_v55, %v2261_v33  ;;  %v2349_v48 = vadd.f32 %v2348_v17, %v2262_v58  ;;  %v2271_v63 = vmul.f32 %v7404_v27, %v7404_v27 }
 0x36a   : > { %v2272_v10 = vmul.f32 %v7405_v49, %v7405_v49  ;;  %v2273_v28 = vmul.f32 %v7406_v13, %v7406_v13  ;;  %v2274_v24 = vmul.f32 %v7407_v54, %v7407_v54  ;;  %v2287_v19 = vadd.f32 %v2286_v40, %v2263_v11 }
 0x36b   : > { %v2308_v62 = vadd.f32 %v2307_v37, %v2264_v39  ;;  %v2329_v3 = vadd.f32 %v2328_v52, %v2265_v50  ;;  %v2350_v36 = vadd.f32 %v2349_v48, %v2266_v6  ;;  %v2462_v61 = vmul.f32 %v6336_v59, %v6336_v59 }
 0x36c   : > { %v2288_v43 = vadd.f32 %v2287_v19, %v2267_v45  ;;  %v2463_v23 = vmul.f32 %v6342_v51, %v6342_v51  ;;  %v2464_v2 = vmul.f32 %v6348_v29, %v6348_v29  ;;  %v2465_v56 = vmul.f32 %v6354_v1, %v6354_v1 }
 0x36d   : > { %v2309_v44 = vadd.f32 %v2308_v62, %v2268_v7  ;;  %v2330_v0 = vadd.f32 %v2329_v3, %v2269_v34  ;;  %v2351_v25 = vadd.f32 %v2350_v36, %v2270_v46  ;;  %v2471_v47 = vstv %s2470_s22  ;;  %v2507_v3 = vld [vmem:[%s6788_s5] sm:$0xf] }
 0x36e   : > { %v2289_v42 = vadd.f32 %v2288_v43, %v2271_v63  ;;  %v2472_v35 = vmul.f32 %v2471_v47, %v2462_v61  ;;  %v2473_v18 = vmul.f32 %v2471_v47, %v2463_v23  ;;  %v2474_v22 = vmul.f32 %v2471_v47, %v2464_v2  ;;  %v2431_v63 = vld [vmem:[#allocation5] sm:$0xf]  ;;  %v2515_v43 = vld [vmem:[#allocation4] sm:$0xf] }
 0x36f   : > { %v2310_v21 = vadd.f32 %v2309_v44, %v2272_v10  ;;  %v2331_v38 = vadd.f32 %v2330_v0, %v2273_v28  ;;  %v2352_v57 = vadd.f32 %v2351_v25, %v2274_v24  ;;  %v2475_v32 = vmul.f32 %v2471_v47, %v2465_v56 }
 0x370   : > { %v2290_v5 = vrot.slane %v2289_v42, 4  ;;  %v2480_v26 = vcombine.low %v2472_v35, %v2473_v18 }
 0x371   : > { %v2311_v59 = vrot.slane %v2310_v21, 4  ;;  %v2332_v14 = vrot.slane %v2331_v38, 4  ;;  %v2353_v8 = vrot.slane %v2352_v57, 4  ;;  %v2481_v60 = vcombine.low %v2474_v22, %v2475_v32 }
 0x372   : > { %v2291_v51 = vadd.f32 %v2290_v5, %v2289_v42  ;;  %v2488_v30 = vrot.slane %v2480_v26, %v7391_v9 }
 0x373   : > { %v2312_v41 = vadd.f32 %v2311_v59, %v2310_v21  ;;  %v2333_v33 = vadd.f32 %v2332_v14, %v2331_v38  ;;  %v2354_v29 = vadd.f32 %v2353_v8, %v2352_v57  ;;  %v2495_v55 = vrot.slane %v2481_v60, %v7391_v9 }
 0x374   : > { %v2292_v20 = vrot.slane %v2291_v51, 2 }
 0x375   : > { %v2313_v58 = vrot.slane %v2312_v41, 2  ;;  %v2334_v1 = vrot.slane %v2333_v33, 2  ;;  %v2355_v15 = vrot.slane %v2354_v29, 2  ;;  %v2496_v48 = vcombine.low %v2488_v30, %v2495_v55 }
 0x376   : > { %v2293_v16 = vadd.f32 %v2292_v20, %v2291_v51 }
 0x377   : > { %v2314_v31 = vadd.f32 %v2313_v58, %v2312_v41  ;;  %v2335_v11 = vadd.f32 %v2334_v1, %v2333_v33  ;;  %v2356_v4 = vadd.f32 %v2355_v15, %v2354_v29  ;;  %v2503_v10 = vrot.slane %v2496_v48, %v7391_v9 }
 0x378   : > { %v2294_v39 = vrot.slane %v2293_v16, 1 }
 0x379   : > { %v2315_v50 = vrot.slane %v2314_v31, 1  ;;  %v2336_v6 = vrot.slane %v2335_v11, 1  ;;  %v2357_v12 = vrot.slane %v2356_v4, 1 }
 0x37a   : > { %v2295_v17 = vadd.f32 %v2294_v39, %v2293_v16 }
 0x37b   : > { %v2316_v45 = vadd.f32 %v2315_v50, %v2314_v31  ;;  %v2337_v7 = vadd.f32 %v2336_v6, %v2335_v11  ;;  %v2358_v34 = vadd.f32 %v2357_v12, %v2356_v4 }
 0x37d   : > { %v2436_v46 = vcombine.low %v2295_v17, %v2316_v45  ;;  %v2437_v40 = vcombine.low %v2337_v7, %v2358_v34 }
 0x37f   : > { %v2444_v37 = vrot.slane %v2436_v46, %v7391_v9  ;;  %v2451_v52 = vrot.slane %v2437_v40, %v7391_v9 }
 0x381   : > { %v2452_v27 = vcombine.low %v2444_v37, %v2451_v52 }
 0x383   : > { %v2459_v49 = vrot.slane %v2452_v27, %v7391_v9  ;;  %v2508_v9 = vld [vmem:[%s6789_s6] sm:$0xf] }
 0x385   : > { %v2461_v13 = vadd.f32 %v2459_v49, %v2431_v63 }
 0x387   : > { %v2505_v28 = vadd.f32 %v2503_v10, %v2461_v13 }
 0x389   : > { %2506 = vst.msk [vmem:[#allocation5] sm:$0xf] %vm6361_vm8, %v2505_v28 }
 0x390   : > { %v2509_v54 = vld [vmem:[#allocation5] sm:$0xf] }
 0x391   : > { %v2510_v24 = vmul.f32 0.005, %v2509_v54 }
 0x393   : > { %v2511_v19 = vmax.f32 %v2510_v24, 0.0 }
 0x395   : > { %v2512_v62 = vadd.f32 1e-05, %v2511_v19 }
 0x397   : > { %3652 = vrsqrt.f32 %v2512_v62 }
 0x3a4   : > { %v3653_v36 = vpop.eup %3652 }
 0x3a5   : > { %v2514_v61 = vmul.f32 %v3653_v36, %v2507_v3 }
 0x3a7   : > { %v2516_v44 = vmul.f32 %v2515_v43, %v2514_v61  ;;  %2518 = vst.msk [vmem:[#allocation4] sm:$0xf] %vm6361_vm8, %v2514_v61 }
 0x3a9   : > { %v2517_v0 = vsub.f32 %v2508_v9, %v2516_v44 }
 0x3ab   : > { %2519 = vst.msk [vmem:[#allocation5] sm:$0xf] %vm6361_vm8, %v2517_v0 }
 0x3ac PF: > { %p3367_p11 = scmp.ne.s32.totalorder %s3764_s13, 2 }
 0x3ad   : > { %s3377_s29 = sshll.u32 (!%p3367_p11), %s3760_s12, 9 }
 0x3ae   : > { %2523 = sbr.rel (%p3367_p11) target bundleno = 1244 (0x4dc), region = 96  ;;  %s6472_s18 = scalar_lea.vmem (!%p3367_p11), [#allocation6], %s3377_s29 }
 0x3b3   : > { %v2858_v25 = vld [vmem:[#allocation7 + $0xf8] sm:$0xff]  ;;  %v2857_v47 = vld [vmem:[#allocation7 + $0xf0] sm:$0xff]  ;;  %v2856_v57 = vld [vmem:[#allocation7 + $0xe8] sm:$0xff]  ;;  %v2593_v26 = vlaneseq }
 0x3b4   : > { %v2890_v23 = vld [vmem:[#allocation7 + $0x1f8] sm:$0xff]  ;;  %3379 = vmatprep.subr.mxu0 %v2858_v25  ;;  %v2889_v42 = vld [vmem:[#allocation7 + $0x1f0] sm:$0xff]  ;;  %v2888_v53 = vld [vmem:[#allocation7 + $0x1e8] sm:$0xff] }
 0x3b5   : > { %v2842_v2 = vld [vmem:[#allocation7 + $0x78] sm:$0xff]  ;;  %3459 = vmatprep.subr.mxu1 %v2890_v23  ;;  %v2841_v21 = vld [vmem:[#allocation7 + $0x70] sm:$0xff]  ;;  %v2840_v5 = vld [vmem:[#allocation7 + $0x68] sm:$0xff]  ;;  %v6463_v12 = vshrl.u32 %v2593_v26, 7 }
 0x3b6   : > { %v2874_v56 = vld [vmem:[#allocation7 + $0x178] sm:$0xff]  ;;  %3380 = vmatpush3.msra.mxu0 %v2842_v2  ;;  %v2873_v38 = vld [vmem:[#allocation7 + $0x170] sm:$0xff]  ;;  %v2872_v59 = vld [vmem:[#allocation7 + $0x168] sm:$0xff] }
 0x3b7   : > { %3460 = vmatpush3.msra.mxu1 %v2874_v56  ;;  %3381 = vmatprep.subr.mxu0 %v2857_v47  ;;  %v2855_v14 = vld [vmem:[#allocation7 + $0xe0] sm:$0xff]  ;;  %v2854_v22 = vld [vmem:[#allocation7 + $0xd8] sm:$0xff]  ;;  %v2853_v33 = vld [vmem:[#allocation7 + $0xd0] sm:$0xff]  ;;  %v2599_v48 = vsub.s32 1, %v6463_v12  ;;  %v2607_v27 = vsub.s32 3, %v6463_v12  ;;  %v2595_v13 = vsub.s32 0, %v6463_v12 }
 0x3b8   : > { %3461 = vmatprep.subr.mxu1 %v2889_v42  ;;  %3382 = vmatpush3.msra.mxu0 %v2841_v21  ;;  %v2887_v8 = vld [vmem:[#allocation7 + $0x1e0] sm:$0xff]  ;;  %v2886_v32 = vld [vmem:[#allocation7 + $0x1d8] sm:$0xff]  ;;  %v2885_v29 = vld [vmem:[#allocation7 + $0x1d0] sm:$0xff]  ;;  %v2603_v19 = vsub.s32 2, %v6463_v12 }
 0x3b9   : > { %3462 = vmatpush3.msra.mxu1 %v2873_v38  ;;  %3383 = vmatprep.subr.mxu0 %v2856_v57  ;;  %v2839_v35 = vld [vmem:[#allocation7 + $0x60] sm:$0xff]  ;;  %v2838_v51 = vld [vmem:[#allocation7 + $0x58] sm:$0xff]  ;;  %v2837_v20 = vld [vmem:[#allocation7 + $0x50] sm:$0xff] }
 0x3ba   : > { %3463 = vmatprep.subr.mxu1 %v2888_v53  ;;  %v2871_v18 = vld [vmem:[#allocation7 + $0x160] sm:$0xff]  ;;  %3384 = vmatpush3.msra.mxu0 %v2840_v5  ;;  %v2870_v41 = vld [vmem:[#allocation7 + $0x158] sm:$0xff]  ;;  %v2869_v58 = vld [vmem:[#allocation7 + $0x150] sm:$0xff] }
 0x3bb   : > { %3464 = vmatpush3.msra.mxu1 %v2872_v59  ;;  %3385 = vmatprep.subr.mxu0 %v2855_v14  ;;  %v2852_v1 = vld [vmem:[#allocation7 + $0xc8] sm:$0xff]  ;;  %v2851_v31 = vld [vmem:[#allocation7 + $0xc0] sm:$0xff]  ;;  %v2850_v50 = vld [vmem:[#allocation7 + $0xb8] sm:$0xff] }
 0x3bc   : > { %3465 = vmatprep.subr.mxu1 %v2887_v8  ;;  %3386 = vmatpush3.msra.mxu0 %v2839_v35  ;;  %v2884_v15 = vld [vmem:[#allocation7 + $0x1c8] sm:$0xff]  ;;  %v2883_v11 = vld [vmem:[#allocation7 + $0x1c0] sm:$0xff]  ;;  %v2882_v6 = vld [vmem:[#allocation7 + $0x1b8] sm:$0xff] }
 0x3bd   : > { %3466 = vmatpush3.msra.mxu1 %v2871_v18  ;;  %3387 = vmatprep.subr.mxu0 %v2854_v22  ;;  %v2836_v60 = vld [vmem:[#allocation7 + $0x48] sm:$0xff]  ;;  %v2835_v4 = vld [vmem:[#allocation7 + $0x40] sm:$0xff]  ;;  %v2834_v30 = vld [vmem:[#allocation7 + $0x38] sm:$0xff] }
 0x3be   : > { %3467 = vmatprep.subr.mxu1 %v2886_v32  ;;  %3388 = vmatpush3.msra.mxu0 %v2838_v51  ;;  %v2868_v16 = vld [vmem:[#allocation7 + $0x148] sm:$0xff]  ;;  %v2867_v39 = vld [vmem:[#allocation7 + $0x140] sm:$0xff]  ;;  %v2866_v55 = vld [vmem:[#allocation7 + $0x138] sm:$0xff] }
 0x3bf   : > { %3468 = vmatpush3.msra.mxu1 %v2870_v41  ;;  %3389 = vmatprep.subr.mxu0 %v2853_v33  ;;  %v2849_v17 = vld [vmem:[#allocation7 + $0xb0] sm:$0xff]  ;;  %v2848_v46 = vld [vmem:[#allocation7 + $0xa8] sm:$0xff]  ;;  %v2847_v63 = vld [vmem:[#allocation7 + $0xa0] sm:$0xff] }
 0x3c0   : > { %3469 = vmatprep.subr.mxu1 %v2885_v29  ;;  %3390 = vmatpush3.msra.mxu0 %v2837_v20  ;;  %v2881_v45 = vld [vmem:[#allocation7 + $0x1b0] sm:$0xff]  ;;  %v2880_v40 = vld [vmem:[#allocation7 + $0x1a8] sm:$0xff]  ;;  %v2879_v49 = vld [vmem:[#allocation7 + $0x1a0] sm:$0xff] }
 0x3c1   : > { %3470 = vmatpush3.msra.mxu1 %v2869_v58  ;;  %3391 = vmatprep.subr.mxu0 %v2852_v1  ;;  %v2833_v7 = vld [vmem:[#allocation7 + $0x30] sm:$0xff]  ;;  %v2832_v37 = vld [vmem:[#allocation7 + $0x28] sm:$0xff]  ;;  %v2831_v10 = vld [vmem:[#allocation7 + $0x20] sm:$0xff] }
 0x3c2   : > { %3471 = vmatprep.subr.mxu1 %v2884_v15  ;;  %3392 = vmatpush3.msra.mxu0 %v2836_v60  ;;  %v2865_v34 = vld [vmem:[#allocation7 + $0x130] sm:$0xff]  ;;  %v2864_v52 = vld [vmem:[#allocation7 + $0x128] sm:$0xff]  ;;  %v2863_v28 = vld [vmem:[#allocation7 + $0x120] sm:$0xff] }
 0x3c3   : > { %3472 = vmatpush3.msra.mxu1 %v2868_v16  ;;  %3393 = vmatprep.subr.mxu0 %v2851_v31  ;;  %v2846_v54 = vld [vmem:[#allocation7 + $0x98] sm:$0xff]  ;;  %v2845_v43 = vld [vmem:[#allocation7 + $0x90] sm:$0xff]  ;;  %v2529_v38 = vld [vmem:[%s6472_s18 + $0x10] sm:$0xff] }
 0x3c4   : > { %3473 = vmatprep.subr.mxu1 %v2883_v11  ;;  %3394 = vmatpush3.msra.mxu0 %v2835_v4  ;;  %v2878_v24 = vld [vmem:[#allocation7 + $0x198] sm:$0xff]  ;;  %v2530_v25 = vld [vmem:[%s6472_s18 + $0x18] sm:$0xff]  ;;  %v2533_v26 = vld [vmem:[%s6472_s18 + $0x30] sm:$0xff] }
 0x3c5   : > { %3474 = vmatpush3.msra.mxu1 %v2867_v39  ;;  %3395 = vmatprep.subr.mxu0 %v2850_v50  ;;  %v2830_v62 = vld [vmem:[#allocation7 + $0x18] sm:$0xff]  ;;  %v2877_v56 = vld [vmem:[#allocation7 + $0x190] sm:$0xff]  ;;  %v2844_v18 = vld [vmem:[#allocation7 + $0x88] sm:$0xff] }
 0x3c6   : > { %3475 = vmatprep.subr.mxu1 %v2882_v6  ;;  %3396 = vmatpush3.msra.mxu0 %v2834_v30  ;;  %v2862_v3 = vld [vmem:[#allocation7 + $0x118] sm:$0xff]  ;;  %v2829_v53 = vld [vmem:[#allocation7 + $0x10] sm:$0xff]  ;;  %v2876_v22 = vld [vmem:[#allocation7 + $0x188] sm:$0xff] }
 0x3c7   : > { %3476 = vmatpush3.msra.mxu1 %v2866_v55  ;;  %3397 = vmatprep.subr.mxu0 %v2849_v17  ;;  %v2528_v36 = vld [vmem:[%s6472_s18 + $0x8] sm:$0xff]  ;;  %v2591_v61 = vld [vmem:[#allocation4] sm:$0xf]  ;;  %v2861_v5 = vld [vmem:[#allocation7 + $0x110] sm:$0xff] }
 0x3c8   : > { %3477 = vmatprep.subr.mxu1 %v2881_v45  ;;  %3398 = vmatpush3.msra.mxu0 %v2833_v7  ;;  %v2677_v9 = vld [vmem:[#allocation5] sm:$0xf]  ;;  %v6475_v44 = vrot.slane %v2591_v61, %v2599_v48  ;;  %v6480_v23 = vrot.slane %v2591_v61, %v2607_v27  ;;  %v6485_v42 = vrot.slane %v2591_v61, %v2595_v13  ;;  %v2534_v35 = vld [vmem:[%s6472_s18 + $0x38] sm:$0xff]  ;;  %v2843_v60 = vld [vmem:[#allocation7 + $0x80] sm:$0xff] }
 0x3c9   : > { %3478 = vmatpush3.msra.mxu1 %v2865_v34  ;;  %3399 = vmatprep.subr.mxu0 %v2848_v46  ;;  %v6477_v0 = vrot.slane %v2677_v9, %v2599_v48  ;;  %v2527_v2 = vld [vmem:[%s6472_s18] sm:$0xff]  ;;  %v6483_v47 = vrot.slane %v2677_v9, %v2607_v27  ;;  %v6487_v21 = vrot.slane %v2677_v9, %v2595_v13  ;;  %v2532_v57 = vld [vmem:[%s6472_s18 + $0x28] sm:$0xff]  ;;  %v2828_v29 = vld [vmem:[#allocation7 + $0x8] sm:$0xff] }
 0x3ca   : > { %3479 = vmatprep.subr.mxu1 %v2880_v40  ;;  %3400 = vmatpush3.msra.mxu0 %v2832_v37  ;;  %v2614_v59 = vmul.f32 %v6475_v44, %v2528_v36  ;;  %v2616_v14 = vmul.f32 %v6480_v23, %v2530_v25  ;;  %v6493_v8 = vrot.slane %v2591_v61, %v2603_v19  ;;  %v2531_v33 = vld [vmem:[%s6472_s18 + $0x20] sm:$0xff]  ;;  %v2860_v20 = vld [vmem:[#allocation7 + $0x108] sm:$0xff]  ;;  %v2536_v4 = vld [vmem:[%s6472_s18 + $0x48] sm:$0xff] }
 0x3cb   : > { %3480 = vmatpush3.msra.mxu1 %v2864_v52  ;;  %3401 = vmatprep.subr.mxu0 %v2847_v63  ;;  %v2613_v32 = vmul.f32 %v6485_v42, %v2527_v2  ;;  %v6497_v51 = vrot.slane %v2677_v9, %v2603_v19  ;;  %v2618_v41 = vmul.f32 %v6475_v44, %v2532_v57  ;;  %v2538_v39 = vld [vmem:[%s6472_s18 + $0x58] sm:$0xff]  ;;  %v2875_v50 = vld [vmem:[#allocation7 + $0x180] sm:$0xff]  ;;  %v2535_v17 = vld [vmem:[%s6472_s18 + $0x40] sm:$0xff] }
 0x3cc   : > { %3481 = vmatprep.subr.mxu1 %v2879_v49  ;;  %3402 = vmatpush3.msra.mxu0 %v2831_v10  ;;  %v2700_v58 = vadd.f32 %v6477_v0, %v2614_v59  ;;  %v2702_v1 = vadd.f32 %v6483_v47, %v2616_v14  ;;  %v2615_v15 = vmul.f32 %v6493_v8, %v2529_v38  ;;  %v2537_v45 = vld [vmem:[%s6472_s18 + $0x50] sm:$0xff]  ;;  %v2540_v52 = vld [vmem:[%s6472_s18 + $0x68] sm:$0xff]  ;;  %v2542_v13 = vld [vmem:[%s6472_s18 + $0x78] sm:$0xff] }
 0x3cd   : > { %3482 = vmatpush3.msra.mxu1 %v2863_v28  ;;  %3403 = vmatprep.subr.mxu0 %v2846_v54  ;;  %v2699_v16 = vadd.f32 %v6487_v21, %v2613_v32  ;;  %v2704_v31 = vadd.f32 %v6477_v0, %v2618_v41  ;;  %v2620_v11 = vmul.f32 %v6480_v23, %v2534_v35  ;;  %v2827_v7 = vld [vmem:[#allocation7] sm:$0xff]  ;;  %v2546_v38 = vld [vmem:[%s6472_s18 + $0x98] sm:$0xff]  ;;  %v2543_v14 = vld [vmem:[%s6472_s18 + $0x80] sm:$0xff] }
 0x3ce   : > { %3483 = vmatprep.subr.mxu1 %v2878_v24  ;;  %3404 = vmatpush3.msra.mxu0 %v2830_v62  ;;  %v2764_v6 = vmax.f32 %v2700_v58, 0.0  ;;  %v2766_v12 = vmax.f32 %v2702_v1, 0.0  ;;  %v2701_v30 = vadd.f32 %v6497_v51, %v2615_v15  ;;  %v2617_v55 = vmul.f32 %v6485_v42, %v2531_v33  ;;  %v2859_v48 = vld [vmem:[#allocation7 + $0x100] sm:$0xff]  ;;  %v2539_v62 = vld [vmem:[%s6472_s18 + $0x60] sm:$0xff]  ;;  %v2550_v58 = vld [vmem:[%s6472_s18 + $0xb8] sm:$0xff] }
 0x3cf   : > { %3484 = vmatpush3.msra.mxu1 %v2862_v3  ;;  %3405 = vmatprep.subr.mxu0 %v2845_v43  ;;  %v2763_v34 = vmax.f32 %v2699_v16, 0.0  ;;  %v2768_v46 = vmax.f32 %v2704_v31, 0.0  ;;  %v2706_v40 = vadd.f32 %v6483_v47, %v2620_v11  ;;  %v2619_v37 = vmul.f32 %v6493_v8, %v2533_v26  ;;  %v2541_v9 = vld [vmem:[%s6472_s18 + $0x70] sm:$0xff]  ;;  %v2548_v33 = vld [vmem:[%s6472_s18 + $0xa8] sm:$0xff] }
 0x3d0   : > { %3485 = vmatprep.subr.mxu1 %v2877_v56  ;;  %3406 = vmatpush3.msra.mxu0 %v2829_v53  ;;  %v2765_v27 = vmax.f32 %v2701_v30, 0.0  ;;  %v2703_v63 = vadd.f32 %v6487_v21, %v2617_v55  ;;  %v2622_v49 = vmul.f32 %v6475_v44, %v2536_v4  ;;  %v2624_v10 = vmul.f32 %v6480_v23, %v2538_v39  ;;  %v2544_v56 = vld [vmem:[%s6472_s18 + $0x88] sm:$0xff]  ;;  %v2545_v41 = vld [vmem:[%s6472_s18 + $0x90] sm:$0xff]  ;;  %v2547_v39 = vld [vmem:[%s6472_s18 + $0xa0] sm:$0xff] }
 0x3d1   : > { %3486 = vmatpush3.msra.mxu1 %v2861_v5  ;;  %3407 = vmatprep.subr.mxu0 %v2844_v18  ;;  %v2770_v28 = vmax.f32 %v2706_v40, 0.0  ;;  %v2705_v54 = vadd.f32 %v6497_v51, %v2619_v37  ;;  %v2621_v24 = vmul.f32 %v6485_v42, %v2535_v17  ;;  %v2623_v19 = vmul.f32 %v6493_v8, %v2537_v45  ;;  %v2549_v55 = vld [vmem:[%s6472_s18 + $0xb0] sm:$0xff]  ;;  %v2552_v17 = vld [vmem:[%s6472_s18 + $0xc8] sm:$0xff]  ;;  %v2554_v45 = vld [vmem:[%s6472_s18 + $0xd8] sm:$0xff] }
 0x3d2   : > { %3487 = vmatprep.subr.mxu1 %v2876_v22  ;;  %3408 = vmatpush3.msra.mxu0 %v2828_v29  ;;  %v2708_v3 = vadd.f32 %v6477_v0, %v2622_v49  ;;  %v2710_v36 = vadd.f32 %v6483_v47, %v2624_v10  ;;  %v2626_v61 = vmul.f32 %v6475_v44, %v2540_v52  ;;  %v2767_v43 = vmax.f32 %v2703_v63, 0.0  ;;  %v2551_v63 = vld [vmem:[%s6472_s18 + $0xc0] sm:$0xff]  ;;  %v2553_v49 = vld [vmem:[%s6472_s18 + $0xd0] sm:$0xff] }
 0x3d3   : > { %3488 = vmatpush3.msra.mxu1 %v2860_v20  ;;  %3409 = vmatprep.subr.mxu0 %v2843_v60  ;;  %v2707_v25 = vadd.f32 %v6487_v21, %v2621_v24  ;;  %v2628_v2 = vmul.f32 %v6480_v23, %v2542_v13  ;;  %v2769_v57 = vmax.f32 %v2705_v54, 0.0  ;;  %v2709_v5 = vadd.f32 %v6497_v51, %v2623_v19  ;;  %v2556_v24 = vld [vmem:[%s6472_s18 + $0xe8] sm:$0xff]  ;;  %v2558_v19 = vld [vmem:[%s6472_s18 + $0xf8] sm:$0xff] }
 0x3d4   : > { %3489 = vmatprep.subr.mxu1 %v2875_v50  ;;  %3410 = vmatpush3.msra.mxu0 %v2827_v7  ;;  %v2772_v53 = vmax.f32 %v2708_v3, 0.0  ;;  %v2625_v59 = vmul.f32 %v6485_v42, %v2539_v62  ;;  %v2774_v35 = vmax.f32 %v2710_v36, 0.0  ;;  %v2712_v18 = vadd.f32 %v6477_v0, %v2626_v61 }
 0x3d5   : > { %2962 = vmatprep.mubr.f32.mxu0 %v2764_v6  ;;  %3490 = vmatpush3.msra.mxu1 %v2859_v48  ;;  %v2714_v22 = vadd.f32 %v6483_v47, %v2628_v2  ;;  %v2627_v32 = vmul.f32 %v6493_v8, %v2541_v9  ;;  %v2630_v29 = vmul.f32 %v6475_v44, %v2544_v56  ;;  %v2771_v1 = vmax.f32 %v2707_v25, 0.0  ;;  %v2555_v56 = vld [vmem:[%s6472_s18 + $0xe0] sm:$0xff] }
 0x3d6   : > { %3107 = vmatprep.mubr.f32.mxu1 %v2766_v12  ;;  %2963 = vmatmul.mubr.f32.vlgmr.msra.gmra.mxu0 %v2763_v34  ;;  %v2632_v20 = vmul.f32 %v6480_v23, %v2546_v38  ;;  %v2711_v15 = vadd.f32 %v6487_v21, %v2625_v59  ;;  %v2629_v60 = vmul.f32 %v6485_v42, %v2543_v14  ;;  %v2773_v16 = vmax.f32 %v2709_v5, 0.0  ;;  %v2557_v59 = vld [vmem:[%s6472_s18 + $0xf0] sm:$0xff]  ;;  %v2560_v14 = vld [vmem:[%s6472_s18 + $0x108] sm:$0xff] }
 0x3d7   : > { %3108 = vmatmul.mubr.f32.vlgmr.msra.gmra.mxu1 %v2765_v27  ;;  %2967 = vmatprep.mubr.f32.mxu0 %v2768_v46  ;;  %v2713_v26 = vadd.f32 %v6497_v51, %v2627_v32  ;;  %v2716_v31 = vadd.f32 %v6477_v0, %v2630_v29  ;;  %v2631_v11 = vmul.f32 %v6493_v8, %v2545_v41  ;;  %v2776_v50 = vmax.f32 %v2712_v18, 0.0 }
 0x3d8   : > { %3112 = vmatprep.mubr.f32.mxu1 %v2770_v28  ;;  %v2634_v4 = vmul.f32 %v6475_v44, %v2548_v33  ;;  %v2778_v6 = vmax.f32 %v2714_v22, 0.0  ;;  %v2718_v12 = vadd.f32 %v6483_v47, %v2632_v20  ;;  %v2636_v30 = vmul.f32 %v6480_v23, %v2550_v58 }
 0x3d9   : > { %v2775_v7 = vmax.f32 %v2711_v15, 0.0  ;;  %v2777_v34 = vmax.f32 %v2713_v26, 0.0  ;;  %v2715_v46 = vadd.f32 %v6487_v21, %v2629_v60  ;;  %v2633_v40 = vmul.f32 %v6485_v42, %v2547_v39 }
 0x3da   : > { %2968 = vmatmul.mubr.f32.gmra.mxu0 %v2767_v43  ;;  %v2780_v37 = vmax.f32 %v2716_v31, 0.0  ;;  %v2717_v52 = vadd.f32 %v6497_v51, %v2631_v11  ;;  %v2720_v48 = vadd.f32 %v6477_v0, %v2634_v4  ;;  %v2635_v27 = vmul.f32 %v6493_v8, %v2549_v55  ;;  %v2561_v31 = vld [vmem:[%s6472_s18 + $0x110] sm:$0xff]  ;;  %v2564_v11 = vld [vmem:[%s6472_s18 + $0x128] sm:$0xff]  ;;  %v2566_v4 = vld [vmem:[%s6472_s18 + $0x138] sm:$0xff] }
 0x3db   : > { %3113 = vmatmul.mubr.f32.gmra.mxu1 %v2769_v57  ;;  %2972 = vmatprep.mubr.f32.mxu0 %v2772_v53  ;;  %v2782_v10 = vmax.f32 %v2718_v12, 0.0  ;;  %v2722_v13 = vadd.f32 %v6483_v47, %v2636_v30  ;;  %v2638_v28 = vmul.f32 %v6475_v44, %v2552_v17  ;;  %v2640_v54 = vmul.f32 %v6480_v23, %v2554_v45 }
 0x3dc   : > { %3117 = vmatprep.mubr.f32.mxu1 %v2774_v35  ;;  %v2779_v62 = vmax.f32 %v2715_v46, 0.0  ;;  %v2719_v3 = vadd.f32 %v6487_v21, %v2633_v40  ;;  %v2637_v36 = vmul.f32 %v6485_v42, %v2551_v63  ;;  %v2639_v61 = vmul.f32 %v6493_v8, %v2553_v49  ;;  %v2562_v35 = vld [vmem:[%s6472_s18 + $0x118] sm:$0xff] }
 0x3dd   : > { %v2781_v9 = vmax.f32 %v2717_v52, 0.0  ;;  %v2784_v43 = vmax.f32 %v2720_v48, 0.0  ;;  %v2721_v25 = vadd.f32 %v6497_v51, %v2635_v27  ;;  %v2642_v2 = vmul.f32 %v6475_v44, %v2556_v24  ;;  %v2568_v48 = vld [vmem:[%s6472_s18 + $0x148] sm:$0xff]  ;;  %v2570_v27 = vld [vmem:[%s6472_s18 + $0x158] sm:$0xff] }
 0x3de   : > { %2973 = vmatmul.mubr.f32.gmra.mxu0 %v2771_v1  ;;  %v2786_v38 = vmax.f32 %v2722_v13, 0.0  ;;  %v2724_v57 = vadd.f32 %v6477_v0, %v2638_v28  ;;  %v2726_v53 = vadd.f32 %v6483_v47, %v2640_v54  ;;  %v2644_v5 = vmul.f32 %v6480_v23, %v2558_v19  ;;  %v2559_v1 = vld [vmem:[%s6472_s18 + $0x100] sm:$0xff] }
 0x3df   : > { %3118 = vmatmul.mubr.f32.gmra.mxu1 %v2773_v16  ;;  %2977 = vmatprep.mubr.f32.mxu0 %v2776_v50  ;;  %v2783_v18 = vmax.f32 %v2719_v3, 0.0  ;;  %v2723_v22 = vadd.f32 %v6487_v21, %v2637_v36  ;;  %v2725_v32 = vadd.f32 %v6497_v51, %v2639_v61  ;;  %v2641_v41 = vmul.f32 %v6485_v42, %v2555_v56 }
 0x3e0   : > { %3122 = vmatprep.mubr.f32.mxu1 %v2778_v6  ;;  %v2785_v33 = vmax.f32 %v2721_v25, 0.0  ;;  %v2728_v29 = vadd.f32 %v6477_v0, %v2642_v2  ;;  %v2643_v20 = vmul.f32 %v6493_v8, %v2557_v59  ;;  %v2646_v58 = vmul.f32 %v6475_v44, %v2560_v14  ;;  %v2572_v25 = vld [vmem:[%s6472_s18 + $0x168] sm:$0xff]  ;;  %v2574_v2 = vld [vmem:[%s6472_s18 + $0x178] sm:$0xff] }
 0x3e1   : > { %v2788_v15 = vmax.f32 %v2724_v57, 0.0  ;;  %v2790_v26 = vmax.f32 %v2726_v53, 0.0  ;;  %v2730_v60 = vadd.f32 %v6483_v47, %v2644_v5  ;;  %v2648_v16 = vmul.f32 %v6480_v23, %v2562_v35 }
 0x3e2   : > { %2978 = vmatmul.mubr.f32.gmra.mxu0 %v2775_v7  ;;  %v2787_v39 = vmax.f32 %v2723_v22, 0.0  ;;  %v2789_v50 = vmax.f32 %v2725_v32, 0.0  ;;  %v2727_v6 = vadd.f32 %v6487_v21, %v2641_v41  ;;  %v2645_v12 = vmul.f32 %v6485_v42, %v2559_v1  ;;  %v2563_v7 = vld [vmem:[%s6472_s18 + $0x120] sm:$0xff] }
 0x3e3   : > { %3123 = vmatmul.mubr.f32.gmra.mxu1 %v2777_v34  ;;  %2982 = vmatprep.mubr.f32.mxu0 %v2780_v37  ;;  %v2792_v30 = vmax.f32 %v2728_v29, 0.0  ;;  %v2729_v55 = vadd.f32 %v6497_v51, %v2643_v20  ;;  %v2732_v17 = vadd.f32 %v6477_v0, %v2646_v58  ;;  %v2647_v45 = vmul.f32 %v6493_v8, %v2561_v31  ;;  %v2565_v34 = vld [vmem:[%s6472_s18 + $0x130] sm:$0xff]  ;;  %v2576_v20 = vld [vmem:[%s6472_s18 + $0x188] sm:$0xff]  ;;  %v2578_v58 = vld [vmem:[%s6472_s18 + $0x198] sm:$0xff] }
 0x3e4   : > { %3127 = vmatprep.mubr.f32.mxu1 %v2782_v10  ;;  %v2794_v46 = vmax.f32 %v2730_v60, 0.0  ;;  %v2734_v40 = vadd.f32 %v6483_v47, %v2648_v16  ;;  %v2650_v37 = vmul.f32 %v6475_v44, %v2564_v11  ;;  %v2652_v52 = vmul.f32 %v6480_v23, %v2566_v4  ;;  %v2573_v29 = vld [vmem:[%s6472_s18 + $0x170] sm:$0xff] }
 0x3e5   : > { %v2791_v63 = vmax.f32 %v2727_v6, 0.0  ;;  %v2731_v49 = vadd.f32 %v6487_v21, %v2645_v12  ;;  %v2649_v10 = vmul.f32 %v6485_v42, %v2563_v7  ;;  %v2651_v13 = vmul.f32 %v6493_v8, %v2565_v34 }
 0x3e6   : > { %2983 = vmatmul.mubr.f32.gmra.mxu0 %v2779_v62  ;;  %v2793_v28 = vmax.f32 %v2729_v55, 0.0  ;;  %v2796_v54 = vmax.f32 %v2732_v17, 0.0  ;;  %v2733_v24 = vadd.f32 %v6497_v51, %v2647_v45  ;;  %v2654_v19 = vmul.f32 %v6475_v44, %v2568_v48  ;;  %v2567_v62 = vld [vmem:[%s6472_s18 + $0x140] sm:$0xff]  ;;  %v2580_v17 = vld [vmem:[%s6472_s18 + $0x1a8] sm:$0xff]  ;;  %v2582_v45 = vld [vmem:[%s6472_s18 + $0x1b8] sm:$0xff] }
 0x3e7   : > { %3128 = vmatmul.mubr.f32.gmra.mxu1 %v2781_v9  ;;  %2987 = vmatprep.mubr.f32.mxu0 %v2784_v43  ;;  %v2798_v3 = vmax.f32 %v2734_v40, 0.0  ;;  %v2736_v36 = vadd.f32 %v6477_v0, %v2650_v37  ;;  %v2738_v61 = vadd.f32 %v6483_v47, %v2652_v52  ;;  %v2656_v9 = vmul.f32 %v6480_v23, %v2570_v27  ;;  %v2569_v43 = vld [vmem:[%s6472_s18 + $0x150] sm:$0xff] }
 0x3e8   : > { %3132 = vmatprep.mubr.f32.mxu1 %v2786_v38  ;;  %v2795_v56 = vmax.f32 %v2731_v49, 0.0  ;;  %v2735_v38 = vadd.f32 %v6487_v21, %v2649_v10  ;;  %v2737_v57 = vadd.f32 %v6497_v51, %v2651_v13  ;;  %v2653_v53 = vmul.f32 %v6485_v42, %v2567_v62 }
 0x3e9   : > { %v2797_v5 = vmax.f32 %v2733_v24, 0.0  ;;  %v2740_v59 = vadd.f32 %v6477_v0, %v2654_v19  ;;  %v2655_v14 = vmul.f32 %v6493_v8, %v2569_v43  ;;  %v2658_v35 = vmul.f32 %v6475_v44, %v2572_v25  ;;  %v2584_v24 = vld [vmem:[%s6472_s18 + $0x1c8] sm:$0xff]  ;;  %v2586_v19 = vld [vmem:[%s6472_s18 + $0x1d8] sm:$0xff] }
 0x3ea   : > { %2988 = vmatmul.mubr.f32.gmra.mxu0 %v2783_v18  ;;  %v2571_v18 = vld [vmem:[%s6472_s18 + $0x160] sm:$0xff]  ;;  %v2800_v22 = vmax.f32 %v2736_v36, 0.0  ;;  %v2802_v32 = vmax.f32 %v2738_v61, 0.0  ;;  %v2742_v41 = vadd.f32 %v6483_v47, %v2656_v9  ;;  %v2799_v1 = vmax.f32 %v2735_v38, 0.0 }
 0x3eb   : > { %3133 = vmatmul.mubr.f32.gmra.mxu1 %v2785_v33  ;;  %2992 = vmatprep.mubr.f32.mxu0 %v2788_v15  ;;  %v2660_v33 = vmul.f32 %v6480_v23, %v2574_v2  ;;  %v2801_v15 = vmax.f32 %v2737_v57, 0.0  ;;  %v2657_v60 = vmul.f32 %v6485_v42, %v2571_v18  ;;  %v2804_v16 = vmax.f32 %v2740_v59, 0.0  ;;  %v2585_v59 = vld [vmem:[%s6472_s18 + $0x1d0] sm:$0xff] }
 0x3ec   : > { %3137 = vmatprep.mubr.f32.mxu1 %v2790_v26  ;;  %v2739_v26 = vadd.f32 %v6487_v21, %v2653_v53  ;;  %v2741_v31 = vadd.f32 %v6497_v51, %v2655_v14  ;;  %v2744_v11 = vadd.f32 %v6477_v0, %v2658_v35  ;;  %v2659_v4 = vmul.f32 %v6493_v8, %v2573_v29  ;;  %v2588_v14 = vld [vmem:[%s6472_s18 + $0x1e8] sm:$0xff]  ;;  %v2590_v35 = vld [vmem:[%s6472_s18 + $0x1f8] sm:$0xff] }
 0x3ed   : > { %v2806_v6 = vmax.f32 %v2742_v41, 0.0  ;;  %v2746_v12 = vadd.f32 %v6483_v47, %v2660_v33  ;;  %v2664_v55 = vmul.f32 %v6480_v23, %v2578_v58  ;;  %v2743_v34 = vadd.f32 %v6487_v21, %v2657_v60 }
 0x3ee   : > { %2993 = vmatmul.mubr.f32.gmra.mxu0 %v2787_v39  ;;  %v2575_v39 = vld [vmem:[%s6472_s18 + $0x180] sm:$0xff]  ;;  %v2803_v7 = vmax.f32 %v2739_v26, 0.0  ;;  %v2805_v37 = vmax.f32 %v2741_v31, 0.0  ;;  %v2808_v52 = vmax.f32 %v2744_v11, 0.0  ;;  %v2745_v48 = vadd.f32 %v6497_v51, %v2659_v4  ;;  %v2589_v31 = vld [vmem:[%s6472_s18 + $0x1f0] sm:$0xff] }
 0x3ef   : > { %3138 = vmatmul.mubr.f32.gmra.mxu1 %v2789_v50  ;;  %2997 = vmatprep.mubr.f32.mxu0 %v2792_v30  ;;  %v2577_v50 = vld [vmem:[%s6472_s18 + $0x190] sm:$0xff]  ;;  %v2662_v30 = vmul.f32 %v6475_v44, %v2576_v20  ;;  %v2666_v27 = vmul.f32 %v6475_v44, %v2580_v17  ;;  %v2810_v49 = vmax.f32 %v2746_v12, 0.0  ;;  %v2750_v13 = vadd.f32 %v6483_v47, %v2664_v55 }
 0x3f0   : > { %3142 = vmatprep.mubr.f32.mxu1 %v2794_v46  ;;  %v2661_v46 = vmul.f32 %v6485_v42, %v2575_v39  ;;  %v2663_v40 = vmul.f32 %v6493_v8, %v2577_v50  ;;  %v2807_v62 = vmax.f32 %v2743_v34, 0.0  ;;  %v2809_v9 = vmax.f32 %v2745_v48, 0.0 }
 0x3f1   : > { %v2748_v10 = vadd.f32 %v6477_v0, %v2662_v30  ;;  %v2752_v43 = vadd.f32 %v6477_v0, %v2666_v27  ;;  %v2670_v2 = vmul.f32 %v6475_v44, %v2584_v24  ;;  %v2814_v57 = vmax.f32 %v2750_v13, 0.0 }
 0x3f2   : > { %2998 = vmatmul.mubr.f32.gmra.mxu0 %v2791_v63  ;;  %v2579_v63 = vld [vmem:[%s6472_s18 + $0x1a0] sm:$0xff]  ;;  %v2749_v36 = vadd.f32 %v6497_v51, %v2663_v40  ;;  %v2671_v58 = vmul.f32 %v6493_v8, %v2585_v59  ;;  %v2674_v26 = vmul.f32 %v6475_v44, %v2588_v14  ;;  %v2676_v60 = vmul.f32 %v6480_v23, %v2590_v35 }
 0x3f3   : > { %3143 = vmatmul.mubr.f32.gmra.mxu1 %v2793_v28  ;;  %3002 = vmatprep.mubr.f32.mxu0 %v2796_v54  ;;  %v2668_v28 = vmul.f32 %v6480_v23, %v2582_v45  ;;  %v2581_v54 = vld [vmem:[%s6472_s18 + $0x1b0] sm:$0xff]  ;;  %v2665_v61 = vmul.f32 %v6485_v42, %v2579_v63  ;;  %v2812_v38 = vmax.f32 %v2748_v10, 0.0  ;;  %v2816_v33 = vmax.f32 %v2752_v43, 0.0 }
 0x3f4   : > { %3147 = vmatprep.mubr.f32.mxu1 %v2798_v3  ;;  %v2747_v3 = vadd.f32 %v6487_v21, %v2661_v46  ;;  %v2667_v25 = vmul.f32 %v6493_v8, %v2581_v54  ;;  %v2756_v20 = vadd.f32 %v6477_v0, %v2670_v2  ;;  %v2757_v50 = vadd.f32 %v6497_v51, %v2671_v58 }
 0x3f5   : > { %v2754_v53 = vadd.f32 %v6483_v47, %v2668_v28  ;;  %v2675_v12 = vmul.f32 %v6493_v8, %v2589_v31  ;;  %v2762_v55 = vadd.f32 %v6483_v47, %v2676_v60 }
 0x3f6   : > { %3003 = vmatmul.mubr.f32.gmra.mxu0 %v2795_v56  ;;  %v2583_v56 = vld [vmem:[%s6472_s18 + $0x1c0] sm:$0xff]  ;;  %v2811_v18 = vmax.f32 %v2747_v3, 0.0  ;;  %v2753_v29 = vadd.f32 %v6497_v51, %v2667_v25  ;;  %v2820_v30 = vmax.f32 %v2756_v20, 0.0  ;;  %v2821_v45 = vmax.f32 %v2757_v50, 0.0 }
 0x3f7   : > { %3148 = vmatmul.mubr.f32.gmra.mxu1 %v2797_v5  ;;  %3007 = vmatprep.mubr.f32.mxu0 %v2800_v22  ;;  %v2672_v5 = vmul.f32 %v6480_v23, %v2586_v19  ;;  %v2813_v22 = vmax.f32 %v2749_v36, 0.0  ;;  %v2669_v41 = vmul.f32 %v6485_v42, %v2583_v56  ;;  %v2760_v23 = vadd.f32 %v6477_v0, %v2674_v26 }
 0x3f8   : > { %3152 = vmatprep.mubr.f32.mxu1 %v2802_v32  ;;  %v2751_v32 = vadd.f32 %v6487_v21, %v2665_v61  ;;  %v2817_v39 = vmax.f32 %v2753_v29, 0.0  ;;  %v2761_v34 = vadd.f32 %v6497_v51, %v2675_v12  ;;  %v2826_v8 = vmax.f32 %v2762_v55, 0.0 }
 0x3f9   : > { %v2755_v4 = vadd.f32 %v6487_v21, %v2669_v41 }
 0x3fa   : > { %3008 = vmatmul.mubr.f32.gmra.mxu0 %v2799_v1  ;;  %v2818_v1 = vmax.f32 %v2754_v53, 0.0  ;;  %v2815_v11 = vmax.f32 %v2751_v32, 0.0  ;;  %v2825_v40 = vmax.f32 %v2761_v34, 0.0 }
 0x3fb   : > { %3153 = vmatmul.mubr.f32.gmra.mxu1 %v2801_v15  ;;  %3012 = vmatprep.mubr.f32.mxu0 %v2804_v16  ;;  %v2758_v15 = vadd.f32 %v6483_v47, %v2672_v5  ;;  %v2587_v16 = vld [vmem:[%s6472_s18 + $0x1e0] sm:$0xff]  ;;  %v2819_v17 = vmax.f32 %v2755_v4, 0.0 }
 0x3fc   : > { %3157 = vmatprep.mubr.f32.mxu1 %v2806_v6  ;;  %v2673_v6 = vmul.f32 %v6485_v42, %v2587_v16  ;;  %v2824_v42 = vmax.f32 %v2760_v23, 0.0 }
 0x3fd   : > { %v2822_v44 = vmax.f32 %v2758_v15, 0.0 }
 0x3fe   : > { %3013 = vmatmul.mubr.f32.gmra.mxu0 %v2803_v7  ;;  %v2759_v7 = vadd.f32 %v6487_v21, %v2673_v6  ;;  %v6685_v21 = vld [vmem:[%s6791_s8] ss:$0 sm:$0xff] }
 0x3ff   : > { %3158 = vmatmul.mubr.f32.gmra.mxu1 %v2805_v37  ;;  %3017 = vmatprep.mubr.f32.mxu0 %v2808_v52 }
 0x400   : > { %3162 = vmatprep.mubr.f32.mxu1 %v2810_v49  ;;  %v2823_v46 = vmax.f32 %v2759_v7, 0.0 }
 0x402   : > { %3018 = vmatmul.mubr.f32.gmra.mxu0 %v2807_v62 }
 0x403   : > { %3163 = vmatmul.mubr.f32.gmra.mxu1 %v2809_v9  ;;  %3022 = vmatprep.mubr.f32.mxu0 %v2812_v38 }
 0x404   : > { %3167 = vmatprep.mubr.f32.mxu1 %v2814_v57 }
 0x406   : > { %3023 = vmatmul.mubr.f32.gmra.mxu0 %v2811_v18 }
 0x407   : > { %3168 = vmatmul.mubr.f32.gmra.mxu1 %v2813_v22  ;;  %3027 = vmatprep.mubr.f32.mxu0 %v2816_v33 }
 0x408   : > { %3172 = vmatprep.mubr.f32.mxu1 %v2818_v1 }
 0x40a   : > { %3028 = vmatmul.mubr.f32.gmra.mxu0 %v2815_v11 }
 0x40b   : > { %3173 = vmatmul.mubr.f32.gmra.mxu1 %v2817_v39  ;;  %3032 = vmatprep.mubr.f32.mxu0 %v2820_v30 }
 0x40c   : > { %3177 = vmatprep.mubr.f32.mxu1 %v2822_v44 }
 0x40e   : > { %3033 = vmatmul.mubr.f32.gmra.mxu0 %v2819_v17 }
 0x40f   : > { %3178 = vmatmul.mubr.f32.gmra.mxu1 %v2821_v45  ;;  %3037 = vmatprep.mubr.f32.mxu0 %v2824_v42 }
 0x410   : > { %3182 = vmatprep.mubr.f32.mxu1 %v2826_v8 }
 0x412   : > { %3038 = vmatmul.mubr.f32.gmra.mxu0 %v2823_v46 }
 0x413   : > { %3183 = vmatmul.mubr.f32.gmra.mxu1 %v2825_v40 }
 0x496   : > { %v3411_v0 = vpop.f32.mrf.mxu0 }
 0x497   : > { %v3491_v47 = vpop.f32.mrf.mxu1 }
 0x498   : > { %v3412_v51 = vpop.f32.mrf.mxu0 }
 0x499   : > { %v3492_v37 = vpop.f32.mrf.mxu1  ;;  %v3413_v52 = vadd.f32 %v3412_v51, %v3411_v0 }
 0x49a   : > { %v3414_v48 = vpop.f32.mrf.mxu0  ;;  %v3493_v49 = vadd.f32 %v3492_v37, %v3491_v47 }
 0x49b   : > { %v3494_v27 = vpop.f32.mrf.mxu1  ;;  %v2965_v63 = vadd.f32 %v3413_v52, %v6685_v21 }
 0x49c   : > { %v3415_v10 = vpop.f32.mrf.mxu0 }
 0x49d   : > { %v3495_v13 = vpop.f32.mrf.mxu1  ;;  %v3110_v28 = vadd.f32 %v3493_v49, %v2965_v63  ;;  %v3416_v54 = vadd.f32 %v3415_v10, %v3414_v48 }
 0x49e   : > { %v3417_v24 = vpop.f32.mrf.mxu0  ;;  %v3496_v3 = vadd.f32 %v3495_v13, %v3494_v27 }
 0x49f   : > { %v3497_v19 = vpop.f32.mrf.mxu1  ;;  %3188 = vst [vmem:[%s3943_s25] sm:$0xff] %v3110_v28  ;;  %v2970_v62 = vadd.f32 %v3416_v54, %v6685_v21 }
 0x4a0   : > { %v3418_v36 = vpop.f32.mrf.mxu0 }
 0x4a1   : > { %v3498_v61 = vpop.f32.mrf.mxu1  ;;  %v3115_v9 = vadd.f32 %v3496_v3, %v2970_v62  ;;  %v3419_v43 = vadd.f32 %v3418_v36, %v3417_v24 }
 0x4a2   : > { %v3420_v25 = vpop.f32.mrf.mxu0  ;;  %v3499_v38 = vadd.f32 %v3498_v61, %v3497_v19 }
 0x4a3   : > { %v3500_v2 = vpop.f32.mrf.mxu1  ;;  %3189 = vst [vmem:[%s3943_s25 + $0x8] sm:$0xff] %v3115_v9  ;;  %v2975_v56 = vadd.f32 %v3419_v43, %v6685_v21 }
 0x4a4   : > { %v3421_v57 = vpop.f32.mrf.mxu0 }
 0x4a5   : > { %v3501_v53 = vpop.f32.mrf.mxu1  ;;  %v3120_v5 = vadd.f32 %v3499_v38, %v2975_v56  ;;  %v3422_v59 = vadd.f32 %v3421_v57, %v3420_v25 }
 0x4a6   : > { %v3423_v14 = vpop.f32.mrf.mxu0  ;;  %v3502_v22 = vadd.f32 %v3501_v53, %v3500_v2 }
 0x4a7   : > { %v3503_v35 = vpop.f32.mrf.mxu1  ;;  %3190 = vst [vmem:[%s3943_s25 + $0x10] sm:$0xff] %v3120_v5  ;;  %v2980_v18 = vadd.f32 %v3422_v59, %v6685_v21 }
 0x4a8   : > { %v3424_v32 = vpop.f32.mrf.mxu0 }
 0x4a9   : > { %v3504_v41 = vpop.f32.mrf.mxu1  ;;  %v3125_v33 = vadd.f32 %v3502_v22, %v2980_v18  ;;  %v3425_v29 = vadd.f32 %v3424_v32, %v3423_v14 }
 0x4aa   : > { %v3426_v20 = vpop.f32.mrf.mxu0  ;;  %v3505_v15 = vadd.f32 %v3504_v41, %v3503_v35 }
 0x4ab   : > { %v3506_v58 = vpop.f32.mrf.mxu1  ;;  %3191 = vst [vmem:[%s3943_s25 + $0x18] sm:$0xff] %v3125_v33  ;;  %v2985_v1 = vadd.f32 %v3425_v29, %v6685_v21 }
 0x4ac   : > { %v3427_v26 = vpop.f32.mrf.mxu0 }
 0x4ad   : > { %v3507_v60 = vpop.f32.mrf.mxu1  ;;  %v3130_v16 = vadd.f32 %v3505_v15, %v2985_v1  ;;  %v3428_v31 = vadd.f32 %v3427_v26, %v3426_v20 }
 0x4ae   : > { %v3429_v11 = vpop.f32.mrf.mxu0  ;;  %v3508_v50 = vadd.f32 %v3507_v60, %v3506_v58 }
 0x4af   : > { %v3509_v4 = vpop.f32.mrf.mxu1  ;;  %3192 = vst [vmem:[%s3943_s25 + $0x20] sm:$0xff] %v3130_v16  ;;  %v2990_v39 = vadd.f32 %v3428_v31, %v6685_v21 }
 0x4b0   : > { %v3430_v6 = vpop.f32.mrf.mxu0 }
 0x4b1   : > { %v3510_v12 = vpop.f32.mrf.mxu1  ;;  %v3135_v30 = vadd.f32 %v3508_v50, %v2990_v39  ;;  %v3431_v44 = vadd.f32 %v3430_v6, %v3429_v11 }
 0x4b2   : > { %v3432_v23 = vpop.f32.mrf.mxu0  ;;  %v3511_v45 = vadd.f32 %v3510_v12, %v3509_v4 }
 0x4b3   : > { %v3512_v55 = vpop.f32.mrf.mxu1  ;;  %3193 = vst [vmem:[%s3943_s25 + $0x28] sm:$0xff] %v3135_v30  ;;  %v2995_v17 = vadd.f32 %v3431_v44, %v6685_v21 }
 0x4b4   : > { %v3433_v7 = vpop.f32.mrf.mxu0 }
 0x4b5   : > { %v3513_v34 = vpop.f32.mrf.mxu1  ;;  %v3140_v42 = vadd.f32 %v3511_v45, %v2995_v17  ;;  %v3434_v8 = vadd.f32 %v3433_v7, %v3432_v23 }
 0x4b6   : > { %v3435_v46 = vpop.f32.mrf.mxu0  ;;  %v3514_v47 = vadd.f32 %v3513_v34, %v3512_v55 }
 0x4b7   : > { %v3515_v40 = vpop.f32.mrf.mxu1  ;;  %3194 = vst [vmem:[%s3943_s25 + $0x30] sm:$0xff] %v3140_v42  ;;  %v3000_v0 = vadd.f32 %v3434_v8, %v6685_v21 }
 0x4b8   : > { %v3436_v51 = vpop.f32.mrf.mxu0 }
 0x4b9   : > { %v3516_v37 = vpop.f32.mrf.mxu1  ;;  %v3145_v52 = vadd.f32 %v3514_v47, %v3000_v0  ;;  %v3437_v48 = vadd.f32 %v3436_v51, %v3435_v46 }
 0x4ba   : > { %v3438_v27 = vpop.f32.mrf.mxu0  ;;  %v3517_v10 = vadd.f32 %v3516_v37, %v3515_v40 }
 0x4bb   : > { %v3518_v63 = vpop.f32.mrf.mxu1  ;;  %3195 = vst [vmem:[%s3943_s25 + $0x38] sm:$0xff] %v3145_v52  ;;  %v3005_v49 = vadd.f32 %v3437_v48, %v6685_v21 }
 0x4bc   : > { %v3439_v13 = vpop.f32.mrf.mxu0 }
 0x4bd   : > { %v3519_v28 = vpop.f32.mrf.mxu1  ;;  %v3150_v54 = vadd.f32 %v3517_v10, %v3005_v49  ;;  %v3440_v24 = vadd.f32 %v3439_v13, %v3438_v27 }
 0x4be   : > { %v3441_v19 = vpop.f32.mrf.mxu0  ;;  %v3520_v36 = vadd.f32 %v3519_v28, %v3518_v63 }
 0x4bf   : > { %v3521_v62 = vpop.f32.mrf.mxu1  ;;  %3196 = vst [vmem:[%s3943_s25 + $0x40] sm:$0xff] %v3150_v54  ;;  %v3010_v3 = vadd.f32 %v3440_v24, %v6685_v21 }
 0x4c0   : > { %v3442_v61 = vpop.f32.mrf.mxu0 }
 0x4c1   : > { %v3522_v9 = vpop.f32.mrf.mxu1  ;;  %v3155_v43 = vadd.f32 %v3520_v36, %v3010_v3  ;;  %v3443_v25 = vadd.f32 %v3442_v61, %v3441_v19 }
 0x4c2   : > { %v3444_v2 = vpop.f32.mrf.mxu0  ;;  %v3523_v57 = vadd.f32 %v3522_v9, %v3521_v62 }
 0x4c3   : > { %v3524_v56 = vpop.f32.mrf.mxu1  ;;  %3197 = vst [vmem:[%s3943_s25 + $0x48] sm:$0xff] %v3155_v43  ;;  %v3015_v38 = vadd.f32 %v3443_v25, %v6685_v21 }
 0x4c4   : > { %v3445_v53 = vpop.f32.mrf.mxu0 }
 0x4c5   : > { %v3525_v5 = vpop.f32.mrf.mxu1  ;;  %v3160_v59 = vadd.f32 %v3523_v57, %v3015_v38  ;;  %v3446_v14 = vadd.f32 %v3445_v53, %v3444_v2 }
 0x4c6   : > { %v3447_v35 = vpop.f32.mrf.mxu0  ;;  %v3526_v32 = vadd.f32 %v3525_v5, %v3524_v56 }
 0x4c7   : > { %v3527_v18 = vpop.f32.mrf.mxu1  ;;  %3198 = vst [vmem:[%s3943_s25 + $0x50] sm:$0xff] %v3160_v59  ;;  %v3020_v22 = vadd.f32 %v3446_v14, %v6685_v21 }
 0x4c8   : > { %v3448_v41 = vpop.f32.mrf.mxu0 }
 0x4c9   : > { %v3528_v33 = vpop.f32.mrf.mxu1  ;;  %v3165_v29 = vadd.f32 %v3526_v32, %v3020_v22  ;;  %v3449_v20 = vadd.f32 %v3448_v41, %v3447_v35 }
 0x4ca   : > { %v3450_v58 = vpop.f32.mrf.mxu0  ;;  %v3529_v26 = vadd.f32 %v3528_v33, %v3527_v18 }
 0x4cb   : > { %v3530_v1 = vpop.f32.mrf.mxu1  ;;  %3199 = vst [vmem:[%s3943_s25 + $0x58] sm:$0xff] %v3165_v29  ;;  %v3025_v15 = vadd.f32 %v3449_v20, %v6685_v21 }
 0x4cc   : > { %v3451_v60 = vpop.f32.mrf.mxu0 }
 0x4cd   : > { %v3531_v16 = vpop.f32.mrf.mxu1  ;;  %v3170_v31 = vadd.f32 %v3529_v26, %v3025_v15  ;;  %v3452_v11 = vadd.f32 %v3451_v60, %v3450_v58 }
 0x4ce   : > { %v3453_v4 = vpop.f32.mrf.mxu0  ;;  %v3532_v6 = vadd.f32 %v3531_v16, %v3530_v1 }
 0x4cf   : > { %v3533_v39 = vpop.f32.mrf.mxu1  ;;  %3200 = vst [vmem:[%s3943_s25 + $0x60] sm:$0xff] %v3170_v31  ;;  %v3030_v50 = vadd.f32 %v3452_v11, %v6685_v21 }
 0x4d0   : > { %v3454_v12 = vpop.f32.mrf.mxu0 }
 0x4d1   : > { %v3534_v30 = vpop.f32.mrf.mxu1  ;;  %v3175_v44 = vadd.f32 %v3532_v6, %v3030_v50  ;;  %v3455_v23 = vadd.f32 %v3454_v12, %v3453_v4 }
 0x4d2   : > { %v3456_v55 = vpop.f32.mrf.mxu0  ;;  %v3535_v7 = vadd.f32 %v3534_v30, %v3533_v39 }
 0x4d3   : > { %v3536_v17 = vpop.f32.mrf.mxu1  ;;  %3201 = vst [vmem:[%s3943_s25 + $0x68] sm:$0xff] %v3175_v44  ;;  %v3035_v45 = vadd.f32 %v3455_v23, %v6685_v21 }
 0x4d4   : > { %v3457_v34 = vpop.f32.mrf.mxu0 }
 0x4d5   : > { %v3537_v42 = vpop.f32.mrf.mxu1  ;;  %v3180_v8 = vadd.f32 %v3535_v7, %v3035_v45  ;;  %v3458_v46 = vadd.f32 %v3457_v34, %v3456_v55 }
 0x4d6   : > { %v3538_v0 = vadd.f32 %v3537_v42, %v3536_v17 }
 0x4d7   : > { %3202 = vst [vmem:[%s3943_s25 + $0x70] sm:$0xff] %v3180_v8  ;;  %v3040_v40 = vadd.f32 %v3458_v46, %v6685_v21 }
 0x4d9   : > { %v3185_v47 = vadd.f32 %v3538_v0, %v3040_v40 }
 0x4db   : > { %3203 = vst [vmem:[%s3943_s25 + $0x78] sm:$0xff] %v3185_v47 }
 0x4dc PF: > { %s3220_s0 = sshll.u32 %s3943_s25, 4  ;;  %s7432_s12 = smov (!%p368_p8, %s3760_s12), 0  ;;  %s6723_s0 = int_to_ptr.vmem [resolvable:$true] %s3220_s0 }
 0x4dd   : > { %s3378_s1 = sshll.u32 %s7432_s12, 11  ;;  %s7408_s26 = sand.u32 1, %s3752_s10  }
 0x4de   : > { %s6728_s27 = scalar_lea.hbm %s6792_s9, %s3378_s1  ;;  %s6732_s28 = scalar_lea.sflag [#allocation9], %s7408_s26 }
 0x4df   : > { %s3680_s29 = scalar_lea.vmem %s6723_s0, 2048  ;;  %s3786_s13 = smov [#allocation10]  }
 0x4e0   : > { %p3681_p0 = scmp.ne.s32.totalorder %s6723_s0, %s3680_s29  ;;  %s3684_s25 = sshll.u32 %s3786_s13, 4  ;;  %s3685_s25 = int_to_ptr.vmem [resolvable:$false] %s3684_s25 }
 0x4e1   : > { %s3686_s18 = scalar_lea.vmem %s3685_s25, 4096  ;;  %p3687_p8 = scmp.lt.s32.totalorder %s6723_s0, %s3685_s25 }
 0x4e2   : > { %p3682_p12 = pnand %p3681_p0, %p3895_p7  ;;  %p3688_p1 = scmp.lt.s32.totalorder %s3686_s18, %s3680_s29 }
 0x4e4   : > { %p3683_p13 = pneg %p3682_p12  ;;  %p3689_p2 = por %p3688_p1, %p3687_p8 }
 0x4e6   : > { %p3690_p3 = pnand %p3689_p2, %p3683_p13 }
 0x4e8   : > { %3693 = shalt.err (!%p3690_p3)
}
 0x4e9   : > { %s3694_s12 = scalar_lea.hbm %s6728_s27, 2048  ;;  %s3698_s1 = scalar_lea.hbm %s6792_s9, 4096 }
 0x4ea   : > { %p3695_p4 = scmp.ne.s32.totalorder %s6728_s27, %s3694_s12  ;;  %p3699_p9 = scmp.lt.s32.totalorder %s6728_s27, %s6792_s9 }
 0x4eb   : > { %p3700_p10 = scmp.lt.s32.totalorder %s3698_s1, %s3694_s12 }
 0x4ec   : > { %p3696_p5 = pnand %p3695_p4, %p3895_p7 }
 0x4ed   : > { %p3701_p11 = por %p3700_p10, %p3699_p9 }
 0x4ee   : > { %p3697_p6 = pneg %p3696_p5 }
 0x4f0   : > { %p3702_p0 = pnand %p3701_p11, %p3697_p6 }
 0x4f2   : > { %3705 = shalt.err (!%p3702_p0)
}
 0x4f3   : > { %s3787_s26 = smov 128   ;;  %s3788_s29 = smov 8  }
 0x4f4   : > { %3551 = dma.vmem_to_hbm [thread:$0]  (%p3895_p7), %s6723_s0, 2048, %s6728_s27, %s6732_s28, %s3787_s26, %s3787_s26, %s3788_s29  }
 0x4f5 PF: > { %p3563_p12 = scmp.ge.s32.totalorder %s3776_s16, 2  ;;  %s3235_s13 = sand.u32 1, %s3748_s30  }
 0x4f6   : > { %p7409_p13 = scmp.ne.s32.totalorder %s6988_s24, 0  ;;  %s3236_s25 = scalar_lea.sflag [#allocation9], %s3235_s13 }
 0x4f8   : > { %p3558_p8 = pnand %p3563_p12, %p7409_p13 }
 0x4fa   : > { %p3559_p1 = pneg %p3558_p8 }
 0x4fc   : > { %3743 = dma.done.wait (%p3559_p1), %s3236_s25, 2048  }
 0x4fd   : > { %3745 = vsyncadd (%p3559_p1), %s3236_s25, 4294965248  ;;  %s23_s16 = sadd.s32 1, %s3776_s16   ;;  %s7410_s23 = sld [smem:[#allocation13_spill]] }
 0x4fe   : > { %p20_p2 = scmp.ge.s32.totalorder %s23_s16, 8   ;;  %s7411_s0 = sld [smem:[#allocation14_spill]] }
 0x4ff   : > { %s7412_s30 = smov %s3752_s10  ;;  %s7413_s10 = smov %s3756_s11 }
 0x500   : > { %s7414_s11 = smov %s3918_s20  ;;  %s7415_s12 = smov %s3768_s14 }
 0x501   : > { %s7416_s13 = smov %s3772_s15  ;;  %22 = sbr.rel (!%p20_p2) target bundleno = 9 (0x9), region = 134 }
 0x503   : > { %s7417_s14 = smov %s7410_s23 }
 0x504   : > { %s7418_s15 = smov %s7411_s0 }
 0x506   :  { %3241 = vsyncpa [#allocation8], 1 }
 0x507   :  { %3243 = vsyncpa [#allocation8 + $0x1], 1 }
 0x508   :  { %3244 = vsyncpa [#allocation9], 1 }
 0x509   :  { %3246 = vsyncpa [#allocation9 + $0x1], 1 }

</bundles_post_ra>
